<compile_context>
chip_gen: v7x
topology: tpu7x:2x2x1
jax: 0.10.0
libtpu: 0.0.40
codegen_flags: <defaults>
</compile_context>

<pallas_src>
import functools
import numpy as np
import jax
import jax.numpy as jnp
from jax.experimental import pallas as pl
from jax.experimental.pallas import tpu as pltpu


# ----------------------------- Pallas kernel ---------------------------------
def _transformer_block_kernel(
    xq_ref, xkv_ref, wq_ref, wkv_ref, wo_ref, w13_ref, w2_ref,
    g1_ref, g2_ref, cosq_ref, sinq_ref, cosk_ref, sink_ref,
    out_ref,
    q_scr, k_scr, v_scr, m_scr, l_scr, acc_scr,
    *, num_heads, d_k, d_model, d_ff, eps, tq, tk):
  H = num_heads
  D = d_model
  half = d_k // 2
  qi = pl.program_id(1)
  kv_i = pl.program_id(2)
  nk = pl.num_programs(2)
  inv_sqrt_dk = 1.0 / np.sqrt(d_k)

  def rmsnorm(v, g):
    ms = jnp.mean(v * v, axis=-1, keepdims=True)
    return v * jax.lax.rsqrt(ms + eps) * g

  # ---------------- init: first KV step of this (batch, q-tile) ----------------
  @pl.when(kv_i == 0)
  def _init():
    xq = xq_ref[0].astype(jnp.float32)                        # (TQ, D)
    hq = rmsnorm(xq, g1_ref[...])
    q_all = jnp.dot(hq.astype(jnp.bfloat16), wq_ref[...],
                    preferred_element_type=jnp.float32)       # (TQ, D), NeoX head layout
    cos = cosq_ref[...]                                       # (TQ, d_k//2)
    sin = sinq_ref[...]
    # Scatter rope'd (and 1/sqrt(d_k)-prescaled) Q into per-head scratch.
    # Static loop / static slices: pure VPU math + stores, no concat on the hot path.
    for hh in range(H):
      a = hh * d_k
      t1 = q_all[:, a:a + half]
      t2 = q_all[:, a + half:a + d_k]
      q_scr[hh, :, :half] = (t1 * cos - t2 * sin) * inv_sqrt_dk
      q_scr[hh, :, half:] = (t2 * cos + t1 * sin) * inv_sqrt_dk
    m_scr[...] = jnp.full((H, tq, 1), -jnp.inf, jnp.float32)
    l_scr[...] = jnp.zeros((H, tq, 1), jnp.float32)
    acc_scr[...] = jnp.zeros((H, tq, d_k), jnp.float32)

  # ------------- KV-tile update; skip fully-masked (kv > qi) tiles -------------
  @pl.when(kv_i <= qi)
  def _update():
    xkv = xkv_ref[0].astype(jnp.float32)                      # (TK, D)
    hk = rmsnorm(xkv, g1_ref[...])
    kv_all = jnp.dot(hk.astype(jnp.bfloat16), wkv_ref[...],
                     preferred_element_type=jnp.float32)      # (TK, 2D): [K | V]
    cos = cosk_ref[...]                                       # (TK, d_k//2)
    sin = sink_ref[...]
    for hh in range(H):                                       # light scatter loop
      a = hh * d_k
      t1 = kv_all[:, a:a + half]
      t2 = kv_all[:, a + half:a + d_k]
      k_scr[hh, :, :half] = t1 * cos - t2 * sin
      k_scr[hh, :, half:] = t2 * cos + t1 * sin
      v_scr[hh] = kv_all[:, D + a:D + a + d_k]

    row = jax.lax.broadcasted_iota(jnp.int32, (tq, tk), 0) + qi * tq
    col = jax.lax.broadcasted_iota(jnp.int32, (tq, tk), 1) + kv_i * tk
    causal = row >= col

    # Heavy per-head online-softmax update: fori_loop bounds vreg live ranges.
    def head_body(hh, carry):
      q_h = q_scr[hh].astype(jnp.bfloat16)                    # (TQ, d_k)
      k_h = k_scr[hh].astype(jnp.bfloat16)                    # (TK, d_k)
      v_h = v_scr[hh].astype(jnp.bfloat16)                    # (TK, d_k)
      s = jax.lax.dot_general(q_h, k_h, (((1,), (1,)), ((), ())),
                              preferred_element_type=jnp.float32)   # (TQ, TK)
      s = jnp.where(causal, s, -1e9)                          # matches masked_fill(-1e9)
      m_old = m_scr[hh]                                       # (TQ, 1)
      m_new = jnp.maximum(m_old, jnp.max(s, axis=-1, keepdims=True))
      alpha = jnp.exp(m_old - m_new)
      p = jnp.exp(s - m_new)
      l_scr[hh] = alpha * l_scr[hh] + jnp.sum(p, axis=-1, keepdims=True)
      acc_scr[hh] = alpha * acc_scr[hh] + jnp.dot(
          p.astype(jnp.bfloat16), v_h, preferred_element_type=jnp.float32)
      m_scr[hh] = m_new
      return carry
    jax.lax.fori_loop(0, H, head_body, 0, unroll=True)

  # -------- finalize: output projection folded into head loop, then FFN --------
  @pl.when(kv_i == nk - 1)
  def _finalize():
    xq = xq_ref[0].astype(jnp.float32)                        # (TQ, D)

    def out_body(hh, attn):
      # NOTE: approx reciprocal (EUP) -> attention rows sum to 1 +/- ~1e-3 (inference OK).
      o_h = acc_scr[hh] * pl.reciprocal(l_scr[hh], approx=True)     # (TQ, d_k)
      return attn + jnp.dot(o_h.astype(jnp.bfloat16), wo_ref[hh],
                            preferred_element_type=jnp.float32)
    attn = jax.lax.fori_loop(0, H, out_body,
                             jnp.zeros((tq, D), jnp.float32), unroll=True)
    x1 = xq + attn

    h2 = rmsnorm(x1, g2_ref[...])
    t13 = jnp.dot(h2.astype(jnp.bfloat16), w13_ref[...],
                  preferred_element_type=jnp.float32)         # (TQ, 2*d_ff)
    t1 = t13[:, :d_ff]
    t3 = t13[:, d_ff:]
    t4 = jax.nn.sigmoid(t1) * t1 * t3                         # f32 gate (v5e-safe)
    ffn = jnp.dot(t4.astype(jnp.bfloat16), w2_ref[...],
                  preferred_element_type=jnp.float32)         # (TQ, D)

    out_ref[0] = (x1 + ffn).astype(out_ref.dtype)


# ----------------------- one-time parameter preparation -----------------------
def prepare_block_params(params, *, num_heads):
  """Weight fusion / transpose / bf16 cast / NeoX permutation.

  Hoisted out of the per-call path (call once at parameter-load time) so forward
  calls do not re-materialize weights in HBM.
  """
  D = params["wq"].shape[0]
  d_k = D // num_heads
  # NeoX reorder of Wq / Wk output features: per head, [even dims..., odd dims...].
  # Q and K share the permutation (per-head Q.K^T invariant); V / Wo are untouched,
  # so RoPE in the kernel becomes a half-split rotation with no pair-swap matmul.
  perm_head = np.concatenate([np.arange(0, d_k, 2), np.arange(1, d_k, 2)])
  full_perm = np.concatenate([h * d_k + perm_head for h in range(num_heads)])
  wq_neox = jnp.asarray(params["wq"])[full_perm, :]
  wk_neox = jnp.asarray(params["wk"])[full_perm, :]
  return dict(
      wq_t=wq_neox.T.astype(jnp.bfloat16),                                    # (D, D)
      wkv_t=jnp.concatenate([wk_neox, params["wv"]], axis=0).T
            .astype(jnp.bfloat16),                                            # (D, 2D)
      wo_h=params["wo"].T.reshape(num_heads, d_k, D).astype(jnp.bfloat16),    # (H, d_k, D)
      w13_t=jnp.concatenate([params["w1"], params["w3"]], axis=0).T
            .astype(jnp.bfloat16),                                            # (D, 2*d_ff)
      w2_t=params["w2"].T.astype(jnp.bfloat16),                               # (d_ff, D)
      g1=params["g1"].reshape(1, D).astype(jnp.float32),
      g2=params["g2"].reshape(1, D).astype(jnp.float32),
  )


# ----------------------------- forward wrapper --------------------------------
def transformer_block_pallas(x, prep, *, num_heads, theta, eps=1e-5, q_tile=128):
  B, S, D = x.shape
  d_k = D // num_heads
  half = d_k // 2
  d_ff = prep["w2_t"].shape[0]

  # q/kv tile sizes (use 256 on v6e/v7x, 128 on v5e at production S; demo S=8 -> 8).
  TQ = min(q_tile, S)
  assert S % TQ == 0, "sequence length must be a multiple of the q tile"
  TK = TQ
  NQ = S // TQ
  NK = S // TK

  # RoPE tables, one head's worth: (S, d_k//2); tiled over the q / kv grid axes.
  pos = jnp.arange(S, dtype=jnp.float32)
  freq = 1.0 / (theta ** (jnp.arange(0, d_k, 2, dtype=jnp.float32) / d_k))
  angles = jnp.outer(pos, freq)
  cos_t = jnp.cos(angles).astype(jnp.float32)
  sin_t = jnp.sin(angles).astype(jnp.float32)

  kernel = functools.partial(
      _transformer_block_kernel,
      num_heads=num_heads, d_k=d_k, d_model=D, d_ff=d_ff, eps=eps, tq=TQ, tk=TK)

  args = (x, x, prep["wq_t"], prep["wkv_t"], prep["wo_h"], prep["w13_t"],
          prep["w2_t"], prep["g1"], prep["g2"], cos_t, sin_t, cos_t, sin_t)

  def call(single_buffer_weights):
    def const_spec(shape):
      # Grid-invariant operand: constant index_map; single-buffer it (double buffering
      # would only double its VMEM footprint for zero benefit).
      idx = lambda b, qi, kv, _n=len(shape): (0,) * _n
      if single_buffer_weights:
        return pl.BlockSpec(shape, idx, pipeline_mode=pl.Buffered(buffer_count=1))
      return pl.BlockSpec(shape, idx)

    return pl.pallas_call(
        kernel,
        out_shape=jax.ShapeDtypeStruct((B, S, D), x.dtype),
        grid=(B, NQ, NK),
        in_specs=[
            pl.BlockSpec((1, TQ, D), lambda b, qi, kv: (b, qi, 0)),   # x, q-tile rows
            pl.BlockSpec((1, TK, D), lambda b, qi, kv: (b, kv, 0)),   # x, kv-tile rows
            const_spec((D, D)),                                        # Wq^T       (bf16)
            const_spec((D, 2 * D)),                                    # [Wk;Wv]^T  (bf16)
            const_spec((num_heads, d_k, D)),                           # Wo^T/head  (bf16)
            const_spec((D, 2 * d_ff)),                                 # [W1;W3]^T  (bf16)
            const_spec((d_ff, D)),                                     # W2^T       (bf16)
            const_spec((1, D)),                                        # g1 (ln1)
            const_spec((1, D)),                                        # g2 (ln2)
            pl.BlockSpec((TQ, half), lambda b, qi, kv: (qi, 0)),       # cos, q rows
            pl.BlockSpec((TQ, half), lambda b, qi, kv: (qi, 0)),       # sin, q rows
            pl.BlockSpec((TK, half), lambda b, qi, kv: (kv, 0)),       # cos, kv rows
            pl.BlockSpec((TK, half), lambda b, qi, kv: (kv, 0)),       # sin, kv rows
        ],
        out_specs=pl.BlockSpec((1, TQ, D), lambda b, qi, kv: (b, qi, 0)),
        scratch_shapes=[
            pltpu.VMEM((num_heads, TQ, d_k), jnp.float32),   # rope'd, prescaled Q
            pltpu.VMEM((num_heads, TK, d_k), jnp.float32),   # rope'd K (current tile)
            pltpu.VMEM((num_heads, TK, d_k), jnp.float32),   # V (current tile)
            pltpu.VMEM((num_heads, TQ, 1), jnp.float32),     # running max m
            pltpu.VMEM((num_heads, TQ, 1), jnp.float32),     # running denom l
            pltpu.VMEM((num_heads, TQ, d_k), jnp.float32),   # running numerator acc
        ],
        compiler_params=pltpu.CompilerParams(
            dimension_semantics=("parallel", "parallel", "arbitrary"),
            vmem_limit_bytes=64 * 1024 * 1024),
    )(*args)

  try:
    return call(True)
  except Exception:
    # Feature-detect fallback: pl.Buffered(1) not supported by this jax/libtpu build;
    # fall back to default double buffering (correctness unaffected).
    return call(False)


# ----------------------------- pure-JAX reference -----------------------------
def _reference(x, params, *, num_heads, theta, eps=1e-5):
  B, S, D = x.shape
  d_k = D // num_heads

  def rmsnorm(v, g):
    ms = jnp.sum(v * v, axis=-1, keepdims=True) / D
    return v / jnp.sqrt(ms + eps) * g

  def linear(v, w):  # y = v @ w.T  (matches the einsum in the PyTorch Linear)
    return jnp.einsum("oi,...i->...o", w, v)

  pos = jnp.arange(S, dtype=jnp.float32)
  freq = 1.0 / (theta ** (jnp.arange(0, d_k, 2, dtype=jnp.float32) / d_k))
  angles = jnp.outer(pos, freq)
  cos, sin = jnp.cos(angles), jnp.sin(angles)          # (S, d_k//2)

  def rope(v):  # v: (B, H, S, d_k), interleaved pairs
    ve, vo = v[..., 0::2], v[..., 1::2]
    c, s = cos[None, None], sin[None, None]
    return jnp.stack([c * ve - s * vo, s * ve + c * vo], axis=-1).reshape(v.shape)

  h = rmsnorm(x, params["g1"])
  q = linear(h, params["wq"]).reshape(B, S, num_heads, d_k).transpose(0, 2, 1, 3)
  k = linear(h, params["wk"]).reshape(B, S, num_heads, d_k).transpose(0, 2, 1, 3)
  v = linear(h, params["wv"]).reshape(B, S, num_heads, d_k).transpose(0, 2, 1, 3)
  q, k = rope(q), rope(k)
  scores = jnp.einsum("bhqd,bhkd->bhqk", q, k) / np.sqrt(d_k)
  causal = jnp.tril(jnp.ones((S, S), bool))
  scores = jnp.where(causal[None, None], scores, -1e9)
  m = jnp.max(scores, axis=-1, keepdims=True)
  e = jnp.exp(scores - m)
  w = e / jnp.sum(e, axis=-1, keepdims=True)
  attn = jnp.einsum("bhqk,bhkd->bhqd", w, v).transpose(0, 2, 1, 3).reshape(B, S, D)
  x1 = x + linear(attn, params["wo"])

  h2 = rmsnorm(x1, params["g2"])
  t1 = linear(h2, params["w1"])
  t3 = linear(h2, params["w3"])
  ffn = linear(jax.nn.sigmoid(t1) * t1 * t3, params["w2"])
  return x1 + ffn


# ----------------------------- main -------------------------------------------
if __name__ == "__main__":
  B, S, D = 2, 8, 32
  num_heads, d_ff, theta = 4, 64, 10000.0

  key = jax.random.PRNGKey(0)
  ks = jax.random.split(key, 8)

  def trunc_init(k, shape, fan_in, fan_out):
    std = np.sqrt(2.0 / (fan_in + fan_out))
    return jax.random.truncated_normal(k, -3.0, 3.0, shape, jnp.float32) * std

  params = {
      # Linear(d_model, d_model): stored weight shape (d_model, d_model), y = x @ W.T
      "wq": trunc_init(ks[0], (D, D), D, D),
      "wk": trunc_init(ks[1], (D, D), D, D),
      "wv": trunc_init(ks[2], (D, D), D, D),
      "wo": trunc_init(ks[3], (D, D), D, D),
      # SwiGLU: w1 = Linear(d_ff, d_model) -> shape (d_ff, d_model), maps D -> d_ff
      "w1": trunc_init(ks[4], (d_ff, D), d_ff, D),
      # w2 = Linear(d_model, d_ff) -> shape (d_model, d_ff), maps d_ff -> D
      "w2": trunc_init(ks[5], (D, d_ff), D, d_ff),
      "w3": trunc_init(ks[6], (d_ff, D), d_ff, D),
      # RMSNorm gains (init = ones, as in the module)
      "g1": jnp.ones((D,), jnp.float32),
      "g2": jnp.ones((D,), jnp.float32),
  }

  x = jax.random.normal(ks[7], (B, S, D), jnp.float32)

  prep = prepare_block_params(params, num_heads=num_heads)   # one-time weight prep
  out = transformer_block_pallas(x, prep, num_heads=num_heads, theta=theta)
  out = jax.block_until_ready(out)

  ref = _reference(x, params, num_heads=num_heads, theta=theta)
  # Tolerance reflects bf16 MXU operands (f32 accumulation) and the approx softmax
  # reciprocal; structural errors would be O(1).
  np.testing.assert_allclose(np.asarray(out), np.asarray(ref), rtol=5e-2, atol=1.5e-1)

  print("KERNEL_OK")
</pallas_src>

<mosaic_0001>
module attributes {stable_mosaic.version = 11 : i64} {
  func.func @_transformer_block_kernel(%arg0: i32, %arg1: i32, %arg2: i32, %arg3: memref<1x8x32xf32, #tpu.memory_space<vmem>>, %arg4: memref<1x8x32xf32, #tpu.memory_space<vmem>>, %arg5: memref<32x32xbf16, #tpu.memory_space<vmem>>, %arg6: memref<32x64xbf16, #tpu.memory_space<vmem>>, %arg7: memref<4x8x32xbf16, #tpu.memory_space<vmem>>, %arg8: memref<32x128xbf16, #tpu.memory_space<vmem>>, %arg9: memref<64x32xbf16, #tpu.memory_space<vmem>>, %arg10: memref<1x32xf32, #tpu.memory_space<vmem>>, %arg11: memref<1x32xf32, #tpu.memory_space<vmem>>, %arg12: memref<8x4xf32, #tpu.memory_space<vmem>>, %arg13: memref<8x4xf32, #tpu.memory_space<vmem>>, %arg14: memref<8x4xf32, #tpu.memory_space<vmem>>, %arg15: memref<8x4xf32, #tpu.memory_space<vmem>>, %arg16: memref<1x8x32xf32, #tpu.memory_space<vmem>>, %arg17: memref<4x8x8xf32, #tpu.memory_space<vmem>>, %arg18: memref<4x8x8xf32, #tpu.memory_space<vmem>>, %arg19: memref<4x8x8xf32, #tpu.memory_space<vmem>>, %arg20: memref<4x8x1xf32, #tpu.memory_space<vmem>>, %arg21: memref<4x8x1xf32, #tpu.memory_space<vmem>>, %arg22: memref<4x8x8xf32, #tpu.memory_space<vmem>>) attributes {dimension_semantics = [#tpu.dimension_semantics<parallel>, #tpu.dimension_semantics<parallel>, #tpu.dimension_semantics<arbitrary>], iteration_bounds = array<i64: 2, 1, 1>, scalar_prefetch = 0 : i64, scratch_operands = 6 : i64, tpu.core_type = #tpu.core_type<tc>, window_params = [{transform_indices = @transform_0, window_bounds = array<i64: 1, 8, 32>}, {transform_indices = @transform_1, window_bounds = array<i64: 1, 8, 32>}, {pipeline_mode = #tpu.pipeline_mode<synchronous>, transform_indices = @transform_2, window_bounds = array<i64: 32, 32>}, {pipeline_mode = #tpu.pipeline_mode<synchronous>, transform_indices = @transform_3, window_bounds = array<i64: 32, 64>}, {pipeline_mode = #tpu.pipeline_mode<synchronous>, transform_indices = @transform_4, window_bounds = array<i64: 4, 8, 32>}, {pipeline_mode = #tpu.pipeline_mode<synchronous>, transform_indices = @transform_5, window_bounds = array<i64: 32, 128>}, {pipeline_mode = #tpu.pipeline_mode<synchronous>, transform_indices = @transform_6, window_bounds = array<i64: 64, 32>}, {pipeline_mode = #tpu.pipeline_mode<synchronous>, transform_indices = @transform_7, window_bounds = array<i64: 1, 32>}, {pipeline_mode = #tpu.pipeline_mode<synchronous>, transform_indices = @transform_8, window_bounds = array<i64: 1, 32>}, {transform_indices = @transform_9, window_bounds = array<i64: 8, 4>}, {transform_indices = @transform_10, window_bounds = array<i64: 8, 4>}, {transform_indices = @transform_11, window_bounds = array<i64: 8, 4>}, {transform_indices = @transform_12, window_bounds = array<i64: 8, 4>}, {transform_indices = @transform_13, window_bounds = array<i64: 1, 8, 32>}]} {
    %c0_i32 = arith.constant 0 : i32
    %0 = arith.cmpi eq, %arg2, %c0_i32 : i32
    %1 = arith.extui %0 : i1 to i32
    %c0_i32_0 = arith.constant 0 : i32
    %2 = arith.cmpi ne, %1, %c0_i32_0 : i32
    scf.if %2 {
      %c0 = arith.constant 0 : index
      %c0_4 = arith.constant 0 : index
      %c0_5 = arith.constant 0 : index
      %9 = vector.load %arg3[%c0, %c0_4, %c0_5] : memref<1x8x32xf32, #tpu.memory_space<vmem>>, vector<1x8x32xf32>
      %10 = vector.shape_cast %9 : vector<1x8x32xf32> to vector<8x32xf32>
      %c0_6 = arith.constant 0 : index
      %c0_7 = arith.constant 0 : index
      %11 = vector.load %arg10[%c0_6, %c0_7] : memref<1x32xf32, #tpu.memory_space<vmem>>, vector<1x32xf32>
      %12 = arith.mulf %10, %10 : vector<8x32xf32>
      %cst = arith.constant dense<0.000000e+00> : vector<8xf32>
      %13 = vector.multi_reduction <add>, %12, %cst [1] : vector<8x32xf32> to vector<8xf32>
      %14 = vector.shape_cast %13 : vector<8xf32> to vector<8x1xf32>
      %cst_8 = arith.constant 3.200000e+01 : f32
      %15 = vector.broadcast %cst_8 : f32 to vector<8x1xf32>
      %16 = arith.divf %14, %15 : vector<8x1xf32>
      %cst_9 = arith.constant 9.99999974E-6 : f32
      %17 = vector.broadcast %cst_9 : f32 to vector<8x1xf32>
      %18 = arith.addf %16, %17 : vector<8x1xf32>
      %19 = math.rsqrt %18 : vector<8x1xf32>
      %20 = vector.broadcast %19 : vector<8x1xf32> to vector<8x32xf32>
      %21 = arith.mulf %10, %20 : vector<8x32xf32>
      %22 = vector.broadcast %11 : vector<1x32xf32> to vector<8x32xf32>
      %23 = arith.mulf %21, %22 : vector<8x32xf32>
      %24 = arith.truncf %23 : vector<8x32xf32> to vector<8x32xbf16>
      %c0_10 = arith.constant 0 : index
      %c0_11 = arith.constant 0 : index
      %25 = vector.load %arg5[%c0_10, %c0_11] : memref<32x32xbf16, #tpu.memory_space<vmem>>, vector<32x32xbf16>
      %cst_12 = arith.constant dense<0.000000e+00> : vector<8x32xf32>
      %26 = tpu.matmul %24, %25, %cst_12 {dimension_numbers = #tpu.dot_dimension_numbers<[1], [0], [0], [1], [0, 0, 1, 1], [], []>} : vector<8x32xbf16>, vector<32x32xbf16>, vector<8x32xf32> -> vector<8x32xf32>
      %c0_13 = arith.constant 0 : index
      %c0_14 = arith.constant 0 : index
      %27 = vector.load %arg12[%c0_13, %c0_14] : memref<8x4xf32, #tpu.memory_space<vmem>>, vector<8x4xf32>
      %c0_15 = arith.constant 0 : index
      %c0_16 = arith.constant 0 : index
      %28 = vector.load %arg13[%c0_15, %c0_16] : memref<8x4xf32, #tpu.memory_space<vmem>>, vector<8x4xf32>
      %29 = vector.extract_strided_slice %26 {offsets = [0, 0], sizes = [8, 4], strides = [1, 1]} : vector<8x32xf32> to vector<8x4xf32>
      %30 = vector.extract_strided_slice %26 {offsets = [0, 4], sizes = [8, 4], strides = [1, 1]} : vector<8x32xf32> to vector<8x4xf32>
      %31 = arith.mulf %29, %27 : vector<8x4xf32>
      %32 = arith.mulf %30, %28 : vector<8x4xf32>
      %33 = arith.subf %31, %32 : vector<8x4xf32>
      %cst_17 = arith.constant 0.353553385 : f32
      %34 = vector.broadcast %cst_17 : f32 to vector<8x4xf32>
      %35 = arith.mulf %33, %34 : vector<8x4xf32>
      %c0_18 = arith.constant 0 : index
      %c0_19 = arith.constant 0 : index
      %c0_20 = arith.constant 0 : index
      %36 = vector.load %arg17[%c0_18, %c0_19, %c0_20] : memref<4x8x8xf32, #tpu.memory_space<vmem>>, vector<1x8x4xf32>
      %37 = vector.shape_cast %36 : vector<1x8x4xf32> to vector<8x4xf32>
      %38 = vector.shape_cast %35 : vector<8x4xf32> to vector<1x8x4xf32>
      tpu.vector_store %arg17[%c0_18, %c0_19, %c0_20], %38 {strides = array<i32>} : memref<4x8x8xf32, #tpu.memory_space<vmem>>, vector<1x8x4xf32>,
      %39 = arith.mulf %30, %27 : vector<8x4xf32>
      %40 = arith.mulf %29, %28 : vector<8x4xf32>
      %41 = arith.addf %39, %40 : vector<8x4xf32>
      %cst_21 = arith.constant 0.353553385 : f32
      %42 = vector.broadcast %cst_21 : f32 to vector<8x4xf32>
      %43 = arith.mulf %41, %42 : vector<8x4xf32>
      %c0_22 = arith.constant 0 : index
      %c0_23 = arith.constant 0 : index
      %c4 = arith.constant 4 : index
      %44 = vector.load %arg17[%c0_22, %c0_23, %c4] : memref<4x8x8xf32, #tpu.memory_space<vmem>>, vector<1x8x4xf32>
      %45 = vector.shape_cast %44 : vector<1x8x4xf32> to vector<8x4xf32>
      %46 = vector.shape_cast %43 : vector<8x4xf32> to vector<1x8x4xf32>
      tpu.vector_store %arg17[%c0_22, %c0_23, %c4], %46 {strides = array<i32>} : memref<4x8x8xf32, #tpu.memory_space<vmem>>, vector<1x8x4xf32>,
      %47 = vector.extract_strided_slice %26 {offsets = [0, 8], sizes = [8, 4], strides = [1, 1]} : vector<8x32xf32> to vector<8x4xf32>
      %48 = vector.extract_strided_slice %26 {offsets = [0, 12], sizes = [8, 4], strides = [1, 1]} : vector<8x32xf32> to vector<8x4xf32>
      %49 = arith.mulf %47, %27 : vector<8x4xf32>
      %50 = arith.mulf %48, %28 : vector<8x4xf32>
      %51 = arith.subf %49, %50 : vector<8x4xf32>
      %cst_24 = arith.constant 0.353553385 : f32
      %52 = vector.broadcast %cst_24 : f32 to vector<8x4xf32>
      %53 = arith.mulf %51, %52 : vector<8x4xf32>
      %c1 = arith.constant 1 : index
      %c0_25 = arith.constant 0 : index
      %c0_26 = arith.constant 0 : index
      %54 = vector.load %arg17[%c1, %c0_25, %c0_26] : memref<4x8x8xf32, #tpu.memory_space<vmem>>, vector<1x8x4xf32>
      %55 = vector.shape_cast %54 : vector<1x8x4xf32> to vector<8x4xf32>
      %56 = vector.shape_cast %53 : vector<8x4xf32> to vector<1x8x4xf32>
      tpu.vector_store %arg17[%c1, %c0_25, %c0_26], %56 {strides = array<i32>} : memref<4x8x8xf32, #tpu.memory_space<vmem>>, vector<1x8x4xf32>,
      %57 = arith.mulf %48, %27 : vector<8x4xf32>
      %58 = arith.mulf %47, %28 : vector<8x4xf32>
      %59 = arith.addf %57, %58 : vector<8x4xf32>
      %cst_27 = arith.constant 0.353553385 : f32
      %60 = vector.broadcast %cst_27 : f32 to vector<8x4xf32>
      %61 = arith.mulf %59, %60 : vector<8x4xf32>
      %c1_28 = arith.constant 1 : index
      %c0_29 = arith.constant 0 : index
      %c4_30 = arith.constant 4 : index
      %62 = vector.load %arg17[%c1_28, %c0_29, %c4_30] : memref<4x8x8xf32, #tpu.memory_space<vmem>>, vector<1x8x4xf32>
      %63 = vector.shape_cast %62 : vector<1x8x4xf32> to vector<8x4xf32>
      %64 = vector.shape_cast %61 : vector<8x4xf32> to vector<1x8x4xf32>
      tpu.vector_store %arg17[%c1_28, %c0_29, %c4_30], %64 {strides = array<i32>} : memref<4x8x8xf32, #tpu.memory_space<vmem>>, vector<1x8x4xf32>,
      %65 = vector.extract_strided_slice %26 {offsets = [0, 16], sizes = [8, 4], strides = [1, 1]} : vector<8x32xf32> to vector<8x4xf32>
      %66 = vector.extract_strided_slice %26 {offsets = [0, 20], sizes = [8, 4], strides = [1, 1]} : vector<8x32xf32> to vector<8x4xf32>
      %67 = arith.mulf %65, %27 : vector<8x4xf32>
      %68 = arith.mulf %66, %28 : vector<8x4xf32>
      %69 = arith.subf %67, %68 : vector<8x4xf32>
      %cst_31 = arith.constant 0.353553385 : f32
      %70 = vector.broadcast %cst_31 : f32 to vector<8x4xf32>
      %71 = arith.mulf %69, %70 : vector<8x4xf32>
      %c2 = arith.constant 2 : index
      %c0_32 = arith.constant 0 : index
      %c0_33 = arith.constant 0 : index
      %72 = vector.load %arg17[%c2, %c0_32, %c0_33] : memref<4x8x8xf32, #tpu.memory_space<vmem>>, vector<1x8x4xf32>
      %73 = vector.shape_cast %72 : vector<1x8x4xf32> to vector<8x4xf32>
      %74 = vector.shape_cast %71 : vector<8x4xf32> to vector<1x8x4xf32>
      tpu.vector_store %arg17[%c2, %c0_32, %c0_33], %74 {strides = array<i32>} : memref<4x8x8xf32, #tpu.memory_space<vmem>>, vector<1x8x4xf32>,
      %75 = arith.mulf %66, %27 : vector<8x4xf32>
      %76 = arith.mulf %65, %28 : vector<8x4xf32>
      %77 = arith.addf %75, %76 : vector<8x4xf32>
      %cst_34 = arith.constant 0.353553385 : f32
      %78 = vector.broadcast %cst_34 : f32 to vector<8x4xf32>
      %79 = arith.mulf %77, %78 : vector<8x4xf32>
      %c2_35 = arith.constant 2 : index
      %c0_36 = arith.constant 0 : index
      %c4_37 = arith.constant 4 : index
      %80 = vector.load %arg17[%c2_35, %c0_36, %c4_37] : memref<4x8x8xf32, #tpu.memory_space<vmem>>, vector<1x8x4xf32>
      %81 = vector.shape_cast %80 : vector<1x8x4xf32> to vector<8x4xf32>
      %82 = vector.shape_cast %79 : vector<8x4xf32> to vector<1x8x4xf32>
      tpu.vector_store %arg17[%c2_35, %c0_36, %c4_37], %82 {strides = array<i32>} : memref<4x8x8xf32, #tpu.memory_space<vmem>>, vector<1x8x4xf32>,
      %83 = vector.extract_strided_slice %26 {offsets = [0, 24], sizes = [8, 4], strides = [1, 1]} : vector<8x32xf32> to vector<8x4xf32>
      %84 = vector.extract_strided_slice %26 {offsets = [0, 28], sizes = [8, 4], strides = [1, 1]} : vector<8x32xf32> to vector<8x4xf32>
      %85 = arith.mulf %83, %27 : vector<8x4xf32>
      %86 = arith.mulf %84, %28 : vector<8x4xf32>
      %87 = arith.subf %85, %86 : vector<8x4xf32>
      %cst_38 = arith.constant 0.353553385 : f32
      %88 = vector.broadcast %cst_38 : f32 to vector<8x4xf32>
      %89 = arith.mulf %87, %88 : vector<8x4xf32>
      %c3 = arith.constant 3 : index
      %c0_39 = arith.constant 0 : index
      %c0_40 = arith.constant 0 : index
      %90 = vector.load %arg17[%c3, %c0_39, %c0_40] : memref<4x8x8xf32, #tpu.memory_space<vmem>>, vector<1x8x4xf32>
      %91 = vector.shape_cast %90 : vector<1x8x4xf32> to vector<8x4xf32>
      %92 = vector.shape_cast %89 : vector<8x4xf32> to vector<1x8x4xf32>
      tpu.vector_store %arg17[%c3, %c0_39, %c0_40], %92 {strides = array<i32>} : memref<4x8x8xf32, #tpu.memory_space<vmem>>, vector<1x8x4xf32>,
      %93 = arith.mulf %84, %27 : vector<8x4xf32>
      %94 = arith.mulf %83, %28 : vector<8x4xf32>
      %95 = arith.addf %93, %94 : vector<8x4xf32>
      %cst_41 = arith.constant 0.353553385 : f32
      %96 = vector.broadcast %cst_41 : f32 to vector<8x4xf32>
      %97 = arith.mulf %95, %96 : vector<8x4xf32>
      %c3_42 = arith.constant 3 : index
      %c0_43 = arith.constant 0 : index
      %c4_44 = arith.constant 4 : index
      %98 = vector.load %arg17[%c3_42, %c0_43, %c4_44] : memref<4x8x8xf32, #tpu.memory_space<vmem>>, vector<1x8x4xf32>
      %99 = vector.shape_cast %98 : vector<1x8x4xf32> to vector<8x4xf32>
      %100 = vector.shape_cast %97 : vector<8x4xf32> to vector<1x8x4xf32>
      tpu.vector_store %arg17[%c3_42, %c0_43, %c4_44], %100 {strides = array<i32>} : memref<4x8x8xf32, #tpu.memory_space<vmem>>, vector<1x8x4xf32>,
      %cst_45 = arith.constant 0xFF800000 : f32
      %101 = vector.broadcast %cst_45 : f32 to vector<4x8x1xf32>
      %c0_46 = arith.constant 0 : index
      %c0_47 = arith.constant 0 : index
      %c0_48 = arith.constant 0 : index
      %102 = vector.load %arg20[%c0_46, %c0_47, %c0_48] : memref<4x8x1xf32, #tpu.memory_space<vmem>>, vector<4x8x1xf32>
      tpu.vector_store %arg20[%c0_46, %c0_47, %c0_48], %101 {strides = array<i32>} : memref<4x8x1xf32, #tpu.memory_space<vmem>>, vector<4x8x1xf32>,
      %cst_49 = arith.constant 0.000000e+00 : f32
      %103 = vector.broadcast %cst_49 : f32 to vector<4x8x1xf32>
      %c0_50 = arith.constant 0 : index
      %c0_51 = arith.constant 0 : index
      %c0_52 = arith.constant 0 : index
      %104 = vector.load %arg21[%c0_50, %c0_51, %c0_52] : memref<4x8x1xf32, #tpu.memory_space<vmem>>, vector<4x8x1xf32>
      tpu.vector_store %arg21[%c0_50, %c0_51, %c0_52], %103 {strides = array<i32>} : memref<4x8x1xf32, #tpu.memory_space<vmem>>, vector<4x8x1xf32>,
      %cst_53 = arith.constant 0.000000e+00 : f32
      %105 = vector.broadcast %cst_53 : f32 to vector<4x8x8xf32>
      %c0_54 = arith.constant 0 : index
      %c0_55 = arith.constant 0 : index
      %c0_56 = arith.constant 0 : index
      %106 = vector.load %arg22[%c0_54, %c0_55, %c0_56] : memref<4x8x8xf32, #tpu.memory_space<vmem>>, vector<4x8x8xf32>
      tpu.vector_store %arg22[%c0_54, %c0_55, %c0_56], %105 {strides = array<i32>} : memref<4x8x8xf32, #tpu.memory_space<vmem>>, vector<4x8x8xf32>,
    } else {
    }
    %3 = arith.cmpi sle, %arg2, %arg1 : i32
    %4 = arith.extui %3 : i1 to i32
    %c0_i32_1 = arith.constant 0 : i32
    %5 = arith.cmpi ne, %4, %c0_i32_1 : i32
    scf.if %5 {
      %c0 = arith.constant 0 : index
      %c0_4 = arith.constant 0 : index
      %c0_5 = arith.constant 0 : index
      %9 = vector.load %arg4[%c0, %c0_4, %c0_5] : memref<1x8x32xf32, #tpu.memory_space<vmem>>, vector<1x8x32xf32>
      %10 = vector.shape_cast %9 : vector<1x8x32xf32> to vector<8x32xf32>
      %c0_6 = arith.constant 0 : index
      %c0_7 = arith.constant 0 : index
      %11 = vector.load %arg10[%c0_6, %c0_7] : memref<1x32xf32, #tpu.memory_space<vmem>>, vector<1x32xf32>
      %12 = arith.mulf %10, %10 : vector<8x32xf32>
      %cst = arith.constant dense<0.000000e+00> : vector<8xf32>
      %13 = vector.multi_reduction <add>, %12, %cst [1] : vector<8x32xf32> to vector<8xf32>
      %14 = vector.shape_cast %13 : vector<8xf32> to vector<8x1xf32>
      %cst_8 = arith.constant 3.200000e+01 : f32
      %15 = vector.broadcast %cst_8 : f32 to vector<8x1xf32>
      %16 = arith.divf %14, %15 : vector<8x1xf32>
      %cst_9 = arith.constant 9.99999974E-6 : f32
      %17 = vector.broadcast %cst_9 : f32 to vector<8x1xf32>
      %18 = arith.addf %16, %17 : vector<8x1xf32>
      %19 = math.rsqrt %18 : vector<8x1xf32>
      %20 = vector.broadcast %19 : vector<8x1xf32> to vector<8x32xf32>
      %21 = arith.mulf %10, %20 : vector<8x32xf32>
      %22 = vector.broadcast %11 : vector<1x32xf32> to vector<8x32xf32>
      %23 = arith.mulf %21, %22 : vector<8x32xf32>
      %24 = arith.truncf %23 : vector<8x32xf32> to vector<8x32xbf16>
      %c0_10 = arith.constant 0 : index
      %c0_11 = arith.constant 0 : index
      %25 = vector.load %arg6[%c0_10, %c0_11] : memref<32x64xbf16, #tpu.memory_space<vmem>>, vector<32x64xbf16>
      %cst_12 = arith.constant dense<0.000000e+00> : vector<8x64xf32>
      %26 = tpu.matmul %24, %25, %cst_12 {dimension_numbers = #tpu.dot_dimension_numbers<[1], [0], [0], [1], [0, 0, 1, 1], [], []>} : vector<8x32xbf16>, vector<32x64xbf16>, vector<8x64xf32> -> vector<8x64xf32>
      %c0_13 = arith.constant 0 : index
      %c0_14 = arith.constant 0 : index
      %27 = vector.load %arg14[%c0_13, %c0_14] : memref<8x4xf32, #tpu.memory_space<vmem>>, vector<8x4xf32>
      %c0_15 = arith.constant 0 : index
      %c0_16 = arith.constant 0 : index
      %28 = vector.load %arg15[%c0_15, %c0_16] : memref<8x4xf32, #tpu.memory_space<vmem>>, vector<8x4xf32>
      %29 = vector.extract_strided_slice %26 {offsets = [0, 0], sizes = [8, 4], strides = [1, 1]} : vector<8x64xf32> to vector<8x4xf32>
      %30 = vector.extract_strided_slice %26 {offsets = [0, 4], sizes = [8, 4], strides = [1, 1]} : vector<8x64xf32> to vector<8x4xf32>
      %31 = arith.mulf %29, %27 : vector<8x4xf32>
      %32 = arith.mulf %30, %28 : vector<8x4xf32>
      %33 = arith.subf %31, %32 : vector<8x4xf32>
      %c0_17 = arith.constant 0 : index
      %c0_18 = arith.constant 0 : index
      %c0_19 = arith.constant 0 : index
      %34 = vector.load %arg18[%c0_17, %c0_18, %c0_19] : memref<4x8x8xf32, #tpu.memory_space<vmem>>, vector<1x8x4xf32>
      %35 = vector.shape_cast %34 : vector<1x8x4xf32> to vector<8x4xf32>
      %36 = vector.shape_cast %33 : vector<8x4xf32> to vector<1x8x4xf32>
      tpu.vector_store %arg18[%c0_17, %c0_18, %c0_19], %36 {strides = array<i32>} : memref<4x8x8xf32, #tpu.memory_space<vmem>>, vector<1x8x4xf32>,
      %37 = arith.mulf %30, %27 : vector<8x4xf32>
      %38 = arith.mulf %29, %28 : vector<8x4xf32>
      %39 = arith.addf %37, %38 : vector<8x4xf32>
      %c0_20 = arith.constant 0 : index
      %c0_21 = arith.constant 0 : index
      %c4 = arith.constant 4 : index
      %40 = vector.load %arg18[%c0_20, %c0_21, %c4] : memref<4x8x8xf32, #tpu.memory_space<vmem>>, vector<1x8x4xf32>
      %41 = vector.shape_cast %40 : vector<1x8x4xf32> to vector<8x4xf32>
      %42 = vector.shape_cast %39 : vector<8x4xf32> to vector<1x8x4xf32>
      tpu.vector_store %arg18[%c0_20, %c0_21, %c4], %42 {strides = array<i32>} : memref<4x8x8xf32, #tpu.memory_space<vmem>>, vector<1x8x4xf32>,
      %43 = vector.extract_strided_slice %26 {offsets = [0, 32], sizes = [8, 8], strides = [1, 1]} : vector<8x64xf32> to vector<8x8xf32>
      %c0_22 = arith.constant 0 : index
      %c0_23 = arith.constant 0 : index
      %c0_24 = arith.constant 0 : index
      %44 = vector.load %arg19[%c0_22, %c0_23, %c0_24] : memref<4x8x8xf32, #tpu.memory_space<vmem>>, vector<1x8x8xf32>
      %45 = vector.shape_cast %44 : vector<1x8x8xf32> to vector<8x8xf32>
      %46 = vector.shape_cast %43 : vector<8x8xf32> to vector<1x8x8xf32>
      tpu.vector_store %arg19[%c0_22, %c0_23, %c0_24], %46 {strides = array<i32>} : memref<4x8x8xf32, #tpu.memory_space<vmem>>, vector<1x8x8xf32>,
      %47 = vector.extract_strided_slice %26 {offsets = [0, 8], sizes = [8, 4], strides = [1, 1]} : vector<8x64xf32> to vector<8x4xf32>
      %48 = vector.extract_strided_slice %26 {offsets = [0, 12], sizes = [8, 4], strides = [1, 1]} : vector<8x64xf32> to vector<8x4xf32>
      %49 = arith.mulf %47, %27 : vector<8x4xf32>
      %50 = arith.mulf %48, %28 : vector<8x4xf32>
      %51 = arith.subf %49, %50 : vector<8x4xf32>
      %c1 = arith.constant 1 : index
      %c0_25 = arith.constant 0 : index
      %c0_26 = arith.constant 0 : index
      %52 = vector.load %arg18[%c1, %c0_25, %c0_26] : memref<4x8x8xf32, #tpu.memory_space<vmem>>, vector<1x8x4xf32>
      %53 = vector.shape_cast %52 : vector<1x8x4xf32> to vector<8x4xf32>
      %54 = vector.shape_cast %51 : vector<8x4xf32> to vector<1x8x4xf32>
      tpu.vector_store %arg18[%c1, %c0_25, %c0_26], %54 {strides = array<i32>} : memref<4x8x8xf32, #tpu.memory_space<vmem>>, vector<1x8x4xf32>,
      %55 = arith.mulf %48, %27 : vector<8x4xf32>
      %56 = arith.mulf %47, %28 : vector<8x4xf32>
      %57 = arith.addf %55, %56 : vector<8x4xf32>
      %c1_27 = arith.constant 1 : index
      %c0_28 = arith.constant 0 : index
      %c4_29 = arith.constant 4 : index
      %58 = vector.load %arg18[%c1_27, %c0_28, %c4_29] : memref<4x8x8xf32, #tpu.memory_space<vmem>>, vector<1x8x4xf32>
      %59 = vector.shape_cast %58 : vector<1x8x4xf32> to vector<8x4xf32>
      %60 = vector.shape_cast %57 : vector<8x4xf32> to vector<1x8x4xf32>
      tpu.vector_store %arg18[%c1_27, %c0_28, %c4_29], %60 {strides = array<i32>} : memref<4x8x8xf32, #tpu.memory_space<vmem>>, vector<1x8x4xf32>,
      %61 = vector.extract_strided_slice %26 {offsets = [0, 40], sizes = [8, 8], strides = [1, 1]} : vector<8x64xf32> to vector<8x8xf32>
      %c1_30 = arith.constant 1 : index
      %c0_31 = arith.constant 0 : index
      %c0_32 = arith.constant 0 : index
      %62 = vector.load %arg19[%c1_30, %c0_31, %c0_32] : memref<4x8x8xf32, #tpu.memory_space<vmem>>, vector<1x8x8xf32>
      %63 = vector.shape_cast %62 : vector<1x8x8xf32> to vector<8x8xf32>
      %64 = vector.shape_cast %61 : vector<8x8xf32> to vector<1x8x8xf32>
      tpu.vector_store %arg19[%c1_30, %c0_31, %c0_32], %64 {strides = array<i32>} : memref<4x8x8xf32, #tpu.memory_space<vmem>>, vector<1x8x8xf32>,
      %65 = vector.extract_strided_slice %26 {offsets = [0, 16], sizes = [8, 4], strides = [1, 1]} : vector<8x64xf32> to vector<8x4xf32>
      %66 = vector.extract_strided_slice %26 {offsets = [0, 20], sizes = [8, 4], strides = [1, 1]} : vector<8x64xf32> to vector<8x4xf32>
      %67 = arith.mulf %65, %27 : vector<8x4xf32>
      %68 = arith.mulf %66, %28 : vector<8x4xf32>
      %69 = arith.subf %67, %68 : vector<8x4xf32>
      %c2 = arith.constant 2 : index
      %c0_33 = arith.constant 0 : index
      %c0_34 = arith.constant 0 : index
      %70 = vector.load %arg18[%c2, %c0_33, %c0_34] : memref<4x8x8xf32, #tpu.memory_space<vmem>>, vector<1x8x4xf32>
      %71 = vector.shape_cast %70 : vector<1x8x4xf32> to vector<8x4xf32>
      %72 = vector.shape_cast %69 : vector<8x4xf32> to vector<1x8x4xf32>
      tpu.vector_store %arg18[%c2, %c0_33, %c0_34], %72 {strides = array<i32>} : memref<4x8x8xf32, #tpu.memory_space<vmem>>, vector<1x8x4xf32>,
      %73 = arith.mulf %66, %27 : vector<8x4xf32>
      %74 = arith.mulf %65, %28 : vector<8x4xf32>
      %75 = arith.addf %73, %74 : vector<8x4xf32>
      %c2_35 = arith.constant 2 : index
      %c0_36 = arith.constant 0 : index
      %c4_37 = arith.constant 4 : index
      %76 = vector.load %arg18[%c2_35, %c0_36, %c4_37] : memref<4x8x8xf32, #tpu.memory_space<vmem>>, vector<1x8x4xf32>
      %77 = vector.shape_cast %76 : vector<1x8x4xf32> to vector<8x4xf32>
      %78 = vector.shape_cast %75 : vector<8x4xf32> to vector<1x8x4xf32>
      tpu.vector_store %arg18[%c2_35, %c0_36, %c4_37], %78 {strides = array<i32>} : memref<4x8x8xf32, #tpu.memory_space<vmem>>, vector<1x8x4xf32>,
      %79 = vector.extract_strided_slice %26 {offsets = [0, 48], sizes = [8, 8], strides = [1, 1]} : vector<8x64xf32> to vector<8x8xf32>
      %c2_38 = arith.constant 2 : index
      %c0_39 = arith.constant 0 : index
      %c0_40 = arith.constant 0 : index
      %80 = vector.load %arg19[%c2_38, %c0_39, %c0_40] : memref<4x8x8xf32, #tpu.memory_space<vmem>>, vector<1x8x8xf32>
      %81 = vector.shape_cast %80 : vector<1x8x8xf32> to vector<8x8xf32>
      %82 = vector.shape_cast %79 : vector<8x8xf32> to vector<1x8x8xf32>
      tpu.vector_store %arg19[%c2_38, %c0_39, %c0_40], %82 {strides = array<i32>} : memref<4x8x8xf32, #tpu.memory_space<vmem>>, vector<1x8x8xf32>,
      %83 = vector.extract_strided_slice %26 {offsets = [0, 24], sizes = [8, 4], strides = [1, 1]} : vector<8x64xf32> to vector<8x4xf32>
      %84 = vector.extract_strided_slice %26 {offsets = [0, 28], sizes = [8, 4], strides = [1, 1]} : vector<8x64xf32> to vector<8x4xf32>
      %85 = arith.mulf %83, %27 : vector<8x4xf32>
      %86 = arith.mulf %84, %28 : vector<8x4xf32>
      %87 = arith.subf %85, %86 : vector<8x4xf32>
      %c3 = arith.constant 3 : index
      %c0_41 = arith.constant 0 : index
      %c0_42 = arith.constant 0 : index
      %88 = vector.load %arg18[%c3, %c0_41, %c0_42] : memref<4x8x8xf32, #tpu.memory_space<vmem>>, vector<1x8x4xf32>
      %89 = vector.shape_cast %88 : vector<1x8x4xf32> to vector<8x4xf32>
      %90 = vector.shape_cast %87 : vector<8x4xf32> to vector<1x8x4xf32>
      tpu.vector_store %arg18[%c3, %c0_41, %c0_42], %90 {strides = array<i32>} : memref<4x8x8xf32, #tpu.memory_space<vmem>>, vector<1x8x4xf32>,
      %91 = arith.mulf %84, %27 : vector<8x4xf32>
      %92 = arith.mulf %83, %28 : vector<8x4xf32>
      %93 = arith.addf %91, %92 : vector<8x4xf32>
      %c3_43 = arith.constant 3 : index
      %c0_44 = arith.constant 0 : index
      %c4_45 = arith.constant 4 : index
      %94 = vector.load %arg18[%c3_43, %c0_44, %c4_45] : memref<4x8x8xf32, #tpu.memory_space<vmem>>, vector<1x8x4xf32>
      %95 = vector.shape_cast %94 : vector<1x8x4xf32> to vector<8x4xf32>
      %96 = vector.shape_cast %93 : vector<8x4xf32> to vector<1x8x4xf32>
      tpu.vector_store %arg18[%c3_43, %c0_44, %c4_45], %96 {strides = array<i32>} : memref<4x8x8xf32, #tpu.memory_space<vmem>>, vector<1x8x4xf32>,
      %97 = vector.extract_strided_slice %26 {offsets = [0, 56], sizes = [8, 8], strides = [1, 1]} : vector<8x64xf32> to vector<8x8xf32>
      %c3_46 = arith.constant 3 : index
      %c0_47 = arith.constant 0 : index
      %c0_48 = arith.constant 0 : index
      %98 = vector.load %arg19[%c3_46, %c0_47, %c0_48] : memref<4x8x8xf32, #tpu.memory_space<vmem>>, vector<1x8x8xf32>
      %99 = vector.shape_cast %98 : vector<1x8x8xf32> to vector<8x8xf32>
      %100 = vector.shape_cast %97 : vector<8x8xf32> to vector<1x8x8xf32>
      tpu.vector_store %arg19[%c3_46, %c0_47, %c0_48], %100 {strides = array<i32>} : memref<4x8x8xf32, #tpu.memory_space<vmem>>, vector<1x8x8xf32>,
      %101 = tpu.iota {dimensions = array<i32: 0>} : vector<8x8xi32>
      %c8_i32 = arith.constant 8 : i32
      %102 = arith.muli %arg1, %c8_i32 : i32
      %103 = vector.broadcast %102 : i32 to vector<8x8xi32>
      %104 = arith.addi %101, %103 : vector<8x8xi32>
      %105 = tpu.iota {dimensions = array<i32: 1>} : vector<8x8xi32>
      %c8_i32_49 = arith.constant 8 : i32
      %106 = arith.muli %arg2, %c8_i32_49 : i32
      %107 = vector.broadcast %106 : i32 to vector<8x8xi32>
      %108 = arith.addi %105, %107 : vector<8x8xi32>
      %109 = arith.cmpi sge, %104, %108 : vector<8x8xi32>
      %c0_i32_50 = arith.constant 0 : i32
      %110 = arith.index_cast %c0_i32_50 : i32 to index
      %c0_51 = arith.constant 0 : index
      %c0_52 = arith.constant 0 : index
      %111 = vector.load %arg17[%110, %c0_51, %c0_52] : memref<4x8x8xf32, #tpu.memory_space<vmem>>, vector<1x8x8xf32>
      %112 = vector.shape_cast %111 : vector<1x8x8xf32> to vector<8x8xf32>
      %113 = arith.truncf %112 : vector<8x8xf32> to vector<8x8xbf16>
      %114 = arith.index_cast %c0_i32_50 : i32 to index
      %c0_53 = arith.constant 0 : index
      %c0_54 = arith.constant 0 : index
      %115 = vector.load %arg18[%114, %c0_53, %c0_54] : memref<4x8x8xf32, #tpu.memory_space<vmem>>, vector<1x8x8xf32>
      %116 = vector.shape_cast %115 : vector<1x8x8xf32> to vector<8x8xf32>
      %117 = arith.truncf %116 : vector<8x8xf32> to vector<8x8xbf16>
      %118 = arith.index_cast %c0_i32_50 : i32 to index
      %c0_55 = arith.constant 0 : index
      %c0_56 = arith.constant 0 : index
      %119 = vector.load %arg19[%118, %c0_55, %c0_56] : memref<4x8x8xf32, #tpu.memory_space<vmem>>, vector<1x8x8xf32>
      %120 = vector.shape_cast %119 : vector<1x8x8xf32> to vector<8x8xf32>
      %121 = arith.truncf %120 : vector<8x8xf32> to vector<8x8xbf16>
      %cst_57 = arith.constant dense<0.000000e+00> : vector<8x8xf32>
      %122 = tpu.matmul %113, %117, %cst_57 {dimension_numbers = #tpu.dot_dimension_numbers<[1], [1], [0], [0], [0, 0, 1, 0], [], []>} : vector<8x8xbf16>, vector<8x8xbf16>, vector<8x8xf32> -> vector<8x8xf32>
      %cst_58 = arith.constant -1.000000e+09 : f32
      %123 = vector.broadcast %cst_58 : f32 to vector<8x8xf32>
      %124 = arith.select %109, %122, %123 : vector<8x8xi1>, vector<8x8xf32>
      %125 = arith.index_cast %c0_i32_50 : i32 to index
      %c0_59 = arith.constant 0 : index
      %c0_60 = arith.constant 0 : index
      %126 = vector.load %arg20[%125, %c0_59, %c0_60] : memref<4x8x1xf32, #tpu.memory_space<vmem>>, vector<1x8x1xf32>
      %127 = vector.shape_cast %126 : vector<1x8x1xf32> to vector<8x1xf32>
      %cst_61 = arith.constant dense<0xFF800000> : vector<8xf32>
      %128 = vector.multi_reduction <maximumf>, %124, %cst_61 [1] : vector<8x8xf32> to vector<8xf32>
      %129 = vector.shape_cast %128 : vector<8xf32> to vector<8x1xf32>
      %130 = arith.maximumf %127, %129 : vector<8x1xf32>
      %131 = arith.subf %127, %130 : vector<8x1xf32>
      %132 = math.exp %131 : vector<8x1xf32>
      %133 = vector.broadcast %130 : vector<8x1xf32> to vector<8x8xf32>
      %134 = arith.subf %124, %133 : vector<8x8xf32>
      %135 = math.exp %134 : vector<8x8xf32>
      %136 = arith.index_cast %c0_i32_50 : i32 to index
      %c0_62 = arith.constant 0 : index
      %c0_63 = arith.constant 0 : index
      %137 = vector.load %arg21[%136, %c0_62, %c0_63] : memref<4x8x1xf32, #tpu.memory_space<vmem>>, vector<1x8x1xf32>
      %138 = vector.shape_cast %137 : vector<1x8x1xf32> to vector<8x1xf32>
      %139 = arith.mulf %132, %138 : vector<8x1xf32>
      %cst_64 = arith.constant dense<0.000000e+00> : vector<8xf32>
      %140 = vector.multi_reduction <add>, %135, %cst_64 [1] : vector<8x8xf32> to vector<8xf32>
      %141 = vector.shape_cast %140 : vector<8xf32> to vector<8x1xf32>
      %142 = arith.addf %139, %141 : vector<8x1xf32>
      %143 = arith.index_cast %c0_i32_50 : i32 to index
      %c0_65 = arith.constant 0 : index
      %c0_66 = arith.constant 0 : index
      %144 = vector.load %arg21[%143, %c0_65, %c0_66] : memref<4x8x1xf32, #tpu.memory_space<vmem>>, vector<1x8x1xf32>
      %145 = vector.shape_cast %144 : vector<1x8x1xf32> to vector<8x1xf32>
      %146 = vector.shape_cast %142 : vector<8x1xf32> to vector<1x8x1xf32>
      tpu.vector_store %arg21[%143, %c0_65, %c0_66], %146 {strides = array<i32>} : memref<4x8x1xf32, #tpu.memory_space<vmem>>, vector<1x8x1xf32>,
      %147 = arith.index_cast %c0_i32_50 : i32 to index
      %c0_67 = arith.constant 0 : index
      %c0_68 = arith.constant 0 : index
      %148 = vector.load %arg22[%147, %c0_67, %c0_68] : memref<4x8x8xf32, #tpu.memory_space<vmem>>, vector<1x8x8xf32>
      %149 = vector.shape_cast %148 : vector<1x8x8xf32> to vector<8x8xf32>
      %150 = vector.broadcast %132 : vector<8x1xf32> to vector<8x8xf32>
      %151 = arith.mulf %150, %149 : vector<8x8xf32>
      %152 = arith.truncf %135 : vector<8x8xf32> to vector<8x8xbf16>
      %cst_69 = arith.constant dense<0.000000e+00> : vector<8x8xf32>
      %153 = tpu.matmul %152, %121, %cst_69 {dimension_numbers = #tpu.dot_dimension_numbers<[1], [0], [0], [1], [0, 0, 1, 1], [], []>} : vector<8x8xbf16>, vector<8x8xbf16>, vector<8x8xf32> -> vector<8x8xf32>
      %154 = arith.addf %151, %153 : vector<8x8xf32>
      %155 = arith.index_cast %c0_i32_50 : i32 to index
      %c0_70 = arith.constant 0 : index
      %c0_71 = arith.constant 0 : index
      %156 = vector.load %arg22[%155, %c0_70, %c0_71] : memref<4x8x8xf32, #tpu.memory_space<vmem>>, vector<1x8x8xf32>
      %157 = vector.shape_cast %156 : vector<1x8x8xf32> to vector<8x8xf32>
      %158 = vector.shape_cast %154 : vector<8x8xf32> to vector<1x8x8xf32>
      tpu.vector_store %arg22[%155, %c0_70, %c0_71], %158 {strides = array<i32>} : memref<4x8x8xf32, #tpu.memory_space<vmem>>, vector<1x8x8xf32>,
      %159 = arith.index_cast %c0_i32_50 : i32 to index
      %c0_72 = arith.constant 0 : index
      %c0_73 = arith.constant 0 : index
      %160 = vector.load %arg20[%159, %c0_72, %c0_73] : memref<4x8x1xf32, #tpu.memory_space<vmem>>, vector<1x8x1xf32>
      %161 = vector.shape_cast %160 : vector<1x8x1xf32> to vector<8x1xf32>
      %162 = vector.shape_cast %130 : vector<8x1xf32> to vector<1x8x1xf32>
      tpu.vector_store %arg20[%159, %c0_72, %c0_73], %162 {strides = array<i32>} : memref<4x8x1xf32, #tpu.memory_space<vmem>>, vector<1x8x1xf32>,
      %c1_i32 = arith.constant 1 : i32
      %163 = arith.index_cast %c1_i32 : i32 to index
      %c0_74 = arith.constant 0 : index
      %c0_75 = arith.constant 0 : index
      %164 = vector.load %arg17[%163, %c0_74, %c0_75] : memref<4x8x8xf32, #tpu.memory_space<vmem>>, vector<1x8x8xf32>
      %165 = vector.shape_cast %164 : vector<1x8x8xf32> to vector<8x8xf32>
      %166 = arith.truncf %165 : vector<8x8xf32> to vector<8x8xbf16>
      %167 = arith.index_cast %c1_i32 : i32 to index
      %c0_76 = arith.constant 0 : index
      %c0_77 = arith.constant 0 : index
      %168 = vector.load %arg18[%167, %c0_76, %c0_77] : memref<4x8x8xf32, #tpu.memory_space<vmem>>, vector<1x8x8xf32>
      %169 = vector.shape_cast %168 : vector<1x8x8xf32> to vector<8x8xf32>
      %170 = arith.truncf %169 : vector<8x8xf32> to vector<8x8xbf16>
      %171 = arith.index_cast %c1_i32 : i32 to index
      %c0_78 = arith.constant 0 : index
      %c0_79 = arith.constant 0 : index
      %172 = vector.load %arg19[%171, %c0_78, %c0_79] : memref<4x8x8xf32, #tpu.memory_space<vmem>>, vector<1x8x8xf32>
      %173 = vector.shape_cast %172 : vector<1x8x8xf32> to vector<8x8xf32>
      %174 = arith.truncf %173 : vector<8x8xf32> to vector<8x8xbf16>
      %cst_80 = arith.constant dense<0.000000e+00> : vector<8x8xf32>
      %175 = tpu.matmul %166, %170, %cst_80 {dimension_numbers = #tpu.dot_dimension_numbers<[1], [1], [0], [0], [0, 0, 1, 0], [], []>} : vector<8x8xbf16>, vector<8x8xbf16>, vector<8x8xf32> -> vector<8x8xf32>
      %cst_81 = arith.constant -1.000000e+09 : f32
      %176 = vector.broadcast %cst_81 : f32 to vector<8x8xf32>
      %177 = arith.select %109, %175, %176 : vector<8x8xi1>, vector<8x8xf32>
      %178 = arith.index_cast %c1_i32 : i32 to index
      %c0_82 = arith.constant 0 : index
      %c0_83 = arith.constant 0 : index
      %179 = vector.load %arg20[%178, %c0_82, %c0_83] : memref<4x8x1xf32, #tpu.memory_space<vmem>>, vector<1x8x1xf32>
      %180 = vector.shape_cast %179 : vector<1x8x1xf32> to vector<8x1xf32>
      %cst_84 = arith.constant dense<0xFF800000> : vector<8xf32>
      %181 = vector.multi_reduction <maximumf>, %177, %cst_84 [1] : vector<8x8xf32> to vector<8xf32>
      %182 = vector.shape_cast %181 : vector<8xf32> to vector<8x1xf32>
      %183 = arith.maximumf %180, %182 : vector<8x1xf32>
      %184 = arith.subf %180, %183 : vector<8x1xf32>
      %185 = math.exp %184 : vector<8x1xf32>
      %186 = vector.broadcast %183 : vector<8x1xf32> to vector<8x8xf32>
      %187 = arith.subf %177, %186 : vector<8x8xf32>
      %188 = math.exp %187 : vector<8x8xf32>
      %189 = arith.index_cast %c1_i32 : i32 to index
      %c0_85 = arith.constant 0 : index
      %c0_86 = arith.constant 0 : index
      %190 = vector.load %arg21[%189, %c0_85, %c0_86] : memref<4x8x1xf32, #tpu.memory_space<vmem>>, vector<1x8x1xf32>
      %191 = vector.shape_cast %190 : vector<1x8x1xf32> to vector<8x1xf32>
      %192 = arith.mulf %185, %191 : vector<8x1xf32>
      %cst_87 = arith.constant dense<0.000000e+00> : vector<8xf32>
      %193 = vector.multi_reduction <add>, %188, %cst_87 [1] : vector<8x8xf32> to vector<8xf32>
      %194 = vector.shape_cast %193 : vector<8xf32> to vector<8x1xf32>
      %195 = arith.addf %192, %194 : vector<8x1xf32>
      %196 = arith.index_cast %c1_i32 : i32 to index
      %c0_88 = arith.constant 0 : index
      %c0_89 = arith.constant 0 : index
      %197 = vector.load %arg21[%196, %c0_88, %c0_89] : memref<4x8x1xf32, #tpu.memory_space<vmem>>, vector<1x8x1xf32>
      %198 = vector.shape_cast %197 : vector<1x8x1xf32> to vector<8x1xf32>
      %199 = vector.shape_cast %195 : vector<8x1xf32> to vector<1x8x1xf32>
      tpu.vector_store %arg21[%196, %c0_88, %c0_89], %199 {strides = array<i32>} : memref<4x8x1xf32, #tpu.memory_space<vmem>>, vector<1x8x1xf32>,
      %200 = arith.index_cast %c1_i32 : i32 to index
      %c0_90 = arith.constant 0 : index
      %c0_91 = arith.constant 0 : index
      %201 = vector.load %arg22[%200, %c0_90, %c0_91] : memref<4x8x8xf32, #tpu.memory_space<vmem>>, vector<1x8x8xf32>
      %202 = vector.shape_cast %201 : vector<1x8x8xf32> to vector<8x8xf32>
      %203 = vector.broadcast %185 : vector<8x1xf32> to vector<8x8xf32>
      %204 = arith.mulf %203, %202 : vector<8x8xf32>
      %205 = arith.truncf %188 : vector<8x8xf32> to vector<8x8xbf16>
      %cst_92 = arith.constant dense<0.000000e+00> : vector<8x8xf32>
      %206 = tpu.matmul %205, %174, %cst_92 {dimension_numbers = #tpu.dot_dimension_numbers<[1], [0], [0], [1], [0, 0, 1, 1], [], []>} : vector<8x8xbf16>, vector<8x8xbf16>, vector<8x8xf32> -> vector<8x8xf32>
      %207 = arith.addf %204, %206 : vector<8x8xf32>
      %208 = arith.index_cast %c1_i32 : i32 to index
      %c0_93 = arith.constant 0 : index
      %c0_94 = arith.constant 0 : index
      %209 = vector.load %arg22[%208, %c0_93, %c0_94] : memref<4x8x8xf32, #tpu.memory_space<vmem>>, vector<1x8x8xf32>
      %210 = vector.shape_cast %209 : vector<1x8x8xf32> to vector<8x8xf32>
      %211 = vector.shape_cast %207 : vector<8x8xf32> to vector<1x8x8xf32>
      tpu.vector_store %arg22[%208, %c0_93, %c0_94], %211 {strides = array<i32>} : memref<4x8x8xf32, #tpu.memory_space<vmem>>, vector<1x8x8xf32>,
      %212 = arith.index_cast %c1_i32 : i32 to index
      %c0_95 = arith.constant 0 : index
      %c0_96 = arith.constant 0 : index
      %213 = vector.load %arg20[%212, %c0_95, %c0_96] : memref<4x8x1xf32, #tpu.memory_space<vmem>>, vector<1x8x1xf32>
      %214 = vector.shape_cast %213 : vector<1x8x1xf32> to vector<8x1xf32>
      %215 = vector.shape_cast %183 : vector<8x1xf32> to vector<1x8x1xf32>
      tpu.vector_store %arg20[%212, %c0_95, %c0_96], %215 {strides = array<i32>} : memref<4x8x1xf32, #tpu.memory_space<vmem>>, vector<1x8x1xf32>,
      %c2_i32 = arith.constant 2 : i32
      %216 = arith.index_cast %c2_i32 : i32 to index
      %c0_97 = arith.constant 0 : index
      %c0_98 = arith.constant 0 : index
      %217 = vector.load %arg17[%216, %c0_97, %c0_98] : memref<4x8x8xf32, #tpu.memory_space<vmem>>, vector<1x8x8xf32>
      %218 = vector.shape_cast %217 : vector<1x8x8xf32> to vector<8x8xf32>
      %219 = arith.truncf %218 : vector<8x8xf32> to vector<8x8xbf16>
      %220 = arith.index_cast %c2_i32 : i32 to index
      %c0_99 = arith.constant 0 : index
      %c0_100 = arith.constant 0 : index
      %221 = vector.load %arg18[%220, %c0_99, %c0_100] : memref<4x8x8xf32, #tpu.memory_space<vmem>>, vector<1x8x8xf32>
      %222 = vector.shape_cast %221 : vector<1x8x8xf32> to vector<8x8xf32>
      %223 = arith.truncf %222 : vector<8x8xf32> to vector<8x8xbf16>
      %224 = arith.index_cast %c2_i32 : i32 to index
      %c0_101 = arith.constant 0 : index
      %c0_102 = arith.constant 0 : index
      %225 = vector.load %arg19[%224, %c0_101, %c0_102] : memref<4x8x8xf32, #tpu.memory_space<vmem>>, vector<1x8x8xf32>
      %226 = vector.shape_cast %225 : vector<1x8x8xf32> to vector<8x8xf32>
      %227 = arith.truncf %226 : vector<8x8xf32> to vector<8x8xbf16>
      %cst_103 = arith.constant dense<0.000000e+00> : vector<8x8xf32>
      %228 = tpu.matmul %219, %223, %cst_103 {dimension_numbers = #tpu.dot_dimension_numbers<[1], [1], [0], [0], [0, 0, 1, 0], [], []>} : vector<8x8xbf16>, vector<8x8xbf16>, vector<8x8xf32> -> vector<8x8xf32>
      %cst_104 = arith.constant -1.000000e+09 : f32
      %229 = vector.broadcast %cst_104 : f32 to vector<8x8xf32>
      %230 = arith.select %109, %228, %229 : vector<8x8xi1>, vector<8x8xf32>
      %231 = arith.index_cast %c2_i32 : i32 to index
      %c0_105 = arith.constant 0 : index
      %c0_106 = arith.constant 0 : index
      %232 = vector.load %arg20[%231, %c0_105, %c0_106] : memref<4x8x1xf32, #tpu.memory_space<vmem>>, vector<1x8x1xf32>
      %233 = vector.shape_cast %232 : vector<1x8x1xf32> to vector<8x1xf32>
      %cst_107 = arith.constant dense<0xFF800000> : vector<8xf32>
      %234 = vector.multi_reduction <maximumf>, %230, %cst_107 [1] : vector<8x8xf32> to vector<8xf32>
      %235 = vector.shape_cast %234 : vector<8xf32> to vector<8x1xf32>
      %236 = arith.maximumf %233, %235 : vector<8x1xf32>
      %237 = arith.subf %233, %236 : vector<8x1xf32>
      %238 = math.exp %237 : vector<8x1xf32>
      %239 = vector.broadcast %236 : vector<8x1xf32> to vector<8x8xf32>
      %240 = arith.subf %230, %239 : vector<8x8xf32>
      %241 = math.exp %240 : vector<8x8xf32>
      %242 = arith.index_cast %c2_i32 : i32 to index
      %c0_108 = arith.constant 0 : index
      %c0_109 = arith.constant 0 : index
      %243 = vector.load %arg21[%242, %c0_108, %c0_109] : memref<4x8x1xf32, #tpu.memory_space<vmem>>, vector<1x8x1xf32>
      %244 = vector.shape_cast %243 : vector<1x8x1xf32> to vector<8x1xf32>
      %245 = arith.mulf %238, %244 : vector<8x1xf32>
      %cst_110 = arith.constant dense<0.000000e+00> : vector<8xf32>
      %246 = vector.multi_reduction <add>, %241, %cst_110 [1] : vector<8x8xf32> to vector<8xf32>
      %247 = vector.shape_cast %246 : vector<8xf32> to vector<8x1xf32>
      %248 = arith.addf %245, %247 : vector<8x1xf32>
      %249 = arith.index_cast %c2_i32 : i32 to index
      %c0_111 = arith.constant 0 : index
      %c0_112 = arith.constant 0 : index
      %250 = vector.load %arg21[%249, %c0_111, %c0_112] : memref<4x8x1xf32, #tpu.memory_space<vmem>>, vector<1x8x1xf32>
      %251 = vector.shape_cast %250 : vector<1x8x1xf32> to vector<8x1xf32>
      %252 = vector.shape_cast %248 : vector<8x1xf32> to vector<1x8x1xf32>
      tpu.vector_store %arg21[%249, %c0_111, %c0_112], %252 {strides = array<i32>} : memref<4x8x1xf32, #tpu.memory_space<vmem>>, vector<1x8x1xf32>,
      %253 = arith.index_cast %c2_i32 : i32 to index
      %c0_113 = arith.constant 0 : index
      %c0_114 = arith.constant 0 : index
      %254 = vector.load %arg22[%253, %c0_113, %c0_114] : memref<4x8x8xf32, #tpu.memory_space<vmem>>, vector<1x8x8xf32>
      %255 = vector.shape_cast %254 : vector<1x8x8xf32> to vector<8x8xf32>
      %256 = vector.broadcast %238 : vector<8x1xf32> to vector<8x8xf32>
      %257 = arith.mulf %256, %255 : vector<8x8xf32>
      %258 = arith.truncf %241 : vector<8x8xf32> to vector<8x8xbf16>
      %cst_115 = arith.constant dense<0.000000e+00> : vector<8x8xf32>
      %259 = tpu.matmul %258, %227, %cst_115 {dimension_numbers = #tpu.dot_dimension_numbers<[1], [0], [0], [1], [0, 0, 1, 1], [], []>} : vector<8x8xbf16>, vector<8x8xbf16>, vector<8x8xf32> -> vector<8x8xf32>
      %260 = arith.addf %257, %259 : vector<8x8xf32>
      %261 = arith.index_cast %c2_i32 : i32 to index
      %c0_116 = arith.constant 0 : index
      %c0_117 = arith.constant 0 : index
      %262 = vector.load %arg22[%261, %c0_116, %c0_117] : memref<4x8x8xf32, #tpu.memory_space<vmem>>, vector<1x8x8xf32>
      %263 = vector.shape_cast %262 : vector<1x8x8xf32> to vector<8x8xf32>
      %264 = vector.shape_cast %260 : vector<8x8xf32> to vector<1x8x8xf32>
      tpu.vector_store %arg22[%261, %c0_116, %c0_117], %264 {strides = array<i32>} : memref<4x8x8xf32, #tpu.memory_space<vmem>>, vector<1x8x8xf32>,
      %265 = arith.index_cast %c2_i32 : i32 to index
      %c0_118 = arith.constant 0 : index
      %c0_119 = arith.constant 0 : index
      %266 = vector.load %arg20[%265, %c0_118, %c0_119] : memref<4x8x1xf32, #tpu.memory_space<vmem>>, vector<1x8x1xf32>
      %267 = vector.shape_cast %266 : vector<1x8x1xf32> to vector<8x1xf32>
      %268 = vector.shape_cast %236 : vector<8x1xf32> to vector<1x8x1xf32>
      tpu.vector_store %arg20[%265, %c0_118, %c0_119], %268 {strides = array<i32>} : memref<4x8x1xf32, #tpu.memory_space<vmem>>, vector<1x8x1xf32>,
      %c3_i32 = arith.constant 3 : i32
      %269 = arith.index_cast %c3_i32 : i32 to index
      %c0_120 = arith.constant 0 : index
      %c0_121 = arith.constant 0 : index
      %270 = vector.load %arg17[%269, %c0_120, %c0_121] : memref<4x8x8xf32, #tpu.memory_space<vmem>>, vector<1x8x8xf32>
      %271 = vector.shape_cast %270 : vector<1x8x8xf32> to vector<8x8xf32>
      %272 = arith.truncf %271 : vector<8x8xf32> to vector<8x8xbf16>
      %273 = arith.index_cast %c3_i32 : i32 to index
      %c0_122 = arith.constant 0 : index
      %c0_123 = arith.constant 0 : index
      %274 = vector.load %arg18[%273, %c0_122, %c0_123] : memref<4x8x8xf32, #tpu.memory_space<vmem>>, vector<1x8x8xf32>
      %275 = vector.shape_cast %274 : vector<1x8x8xf32> to vector<8x8xf32>
      %276 = arith.truncf %275 : vector<8x8xf32> to vector<8x8xbf16>
      %277 = arith.index_cast %c3_i32 : i32 to index
      %c0_124 = arith.constant 0 : index
      %c0_125 = arith.constant 0 : index
      %278 = vector.load %arg19[%277, %c0_124, %c0_125] : memref<4x8x8xf32, #tpu.memory_space<vmem>>, vector<1x8x8xf32>
      %279 = vector.shape_cast %278 : vector<1x8x8xf32> to vector<8x8xf32>
      %280 = arith.truncf %279 : vector<8x8xf32> to vector<8x8xbf16>
      %cst_126 = arith.constant dense<0.000000e+00> : vector<8x8xf32>
      %281 = tpu.matmul %272, %276, %cst_126 {dimension_numbers = #tpu.dot_dimension_numbers<[1], [1], [0], [0], [0, 0, 1, 0], [], []>} : vector<8x8xbf16>, vector<8x8xbf16>, vector<8x8xf32> -> vector<8x8xf32>
      %cst_127 = arith.constant -1.000000e+09 : f32
      %282 = vector.broadcast %cst_127 : f32 to vector<8x8xf32>
      %283 = arith.select %109, %281, %282 : vector<8x8xi1>, vector<8x8xf32>
      %284 = arith.index_cast %c3_i32 : i32 to index
      %c0_128 = arith.constant 0 : index
      %c0_129 = arith.constant 0 : index
      %285 = vector.load %arg20[%284, %c0_128, %c0_129] : memref<4x8x1xf32, #tpu.memory_space<vmem>>, vector<1x8x1xf32>
      %286 = vector.shape_cast %285 : vector<1x8x1xf32> to vector<8x1xf32>
      %cst_130 = arith.constant dense<0xFF800000> : vector<8xf32>
      %287 = vector.multi_reduction <maximumf>, %283, %cst_130 [1] : vector<8x8xf32> to vector<8xf32>
      %288 = vector.shape_cast %287 : vector<8xf32> to vector<8x1xf32>
      %289 = arith.maximumf %286, %288 : vector<8x1xf32>
      %290 = arith.subf %286, %289 : vector<8x1xf32>
      %291 = math.exp %290 : vector<8x1xf32>
      %292 = vector.broadcast %289 : vector<8x1xf32> to vector<8x8xf32>
      %293 = arith.subf %283, %292 : vector<8x8xf32>
      %294 = math.exp %293 : vector<8x8xf32>
      %295 = arith.index_cast %c3_i32 : i32 to index
      %c0_131 = arith.constant 0 : index
      %c0_132 = arith.constant 0 : index
      %296 = vector.load %arg21[%295, %c0_131, %c0_132] : memref<4x8x1xf32, #tpu.memory_space<vmem>>, vector<1x8x1xf32>
      %297 = vector.shape_cast %296 : vector<1x8x1xf32> to vector<8x1xf32>
      %298 = arith.mulf %291, %297 : vector<8x1xf32>
      %cst_133 = arith.constant dense<0.000000e+00> : vector<8xf32>
      %299 = vector.multi_reduction <add>, %294, %cst_133 [1] : vector<8x8xf32> to vector<8xf32>
      %300 = vector.shape_cast %299 : vector<8xf32> to vector<8x1xf32>
      %301 = arith.addf %298, %300 : vector<8x1xf32>
      %302 = arith.index_cast %c3_i32 : i32 to index
      %c0_134 = arith.constant 0 : index
      %c0_135 = arith.constant 0 : index
      %303 = vector.load %arg21[%302, %c0_134, %c0_135] : memref<4x8x1xf32, #tpu.memory_space<vmem>>, vector<1x8x1xf32>
      %304 = vector.shape_cast %303 : vector<1x8x1xf32> to vector<8x1xf32>
      %305 = vector.shape_cast %301 : vector<8x1xf32> to vector<1x8x1xf32>
      tpu.vector_store %arg21[%302, %c0_134, %c0_135], %305 {strides = array<i32>} : memref<4x8x1xf32, #tpu.memory_space<vmem>>, vector<1x8x1xf32>,
      %306 = arith.index_cast %c3_i32 : i32 to index
      %c0_136 = arith.constant 0 : index
      %c0_137 = arith.constant 0 : index
      %307 = vector.load %arg22[%306, %c0_136, %c0_137] : memref<4x8x8xf32, #tpu.memory_space<vmem>>, vector<1x8x8xf32>
      %308 = vector.shape_cast %307 : vector<1x8x8xf32> to vector<8x8xf32>
      %309 = vector.broadcast %291 : vector<8x1xf32> to vector<8x8xf32>
      %310 = arith.mulf %309, %308 : vector<8x8xf32>
      %311 = arith.truncf %294 : vector<8x8xf32> to vector<8x8xbf16>
      %cst_138 = arith.constant dense<0.000000e+00> : vector<8x8xf32>
      %312 = tpu.matmul %311, %280, %cst_138 {dimension_numbers = #tpu.dot_dimension_numbers<[1], [0], [0], [1], [0, 0, 1, 1], [], []>} : vector<8x8xbf16>, vector<8x8xbf16>, vector<8x8xf32> -> vector<8x8xf32>
      %313 = arith.addf %310, %312 : vector<8x8xf32>
      %314 = arith.index_cast %c3_i32 : i32 to index
      %c0_139 = arith.constant 0 : index
      %c0_140 = arith.constant 0 : index
      %315 = vector.load %arg22[%314, %c0_139, %c0_140] : memref<4x8x8xf32, #tpu.memory_space<vmem>>, vector<1x8x8xf32>
      %316 = vector.shape_cast %315 : vector<1x8x8xf32> to vector<8x8xf32>
      %317 = vector.shape_cast %313 : vector<8x8xf32> to vector<1x8x8xf32>
      tpu.vector_store %arg22[%314, %c0_139, %c0_140], %317 {strides = array<i32>} : memref<4x8x8xf32, #tpu.memory_space<vmem>>, vector<1x8x8xf32>,
      %318 = arith.index_cast %c3_i32 : i32 to index
      %c0_141 = arith.constant 0 : index
      %c0_142 = arith.constant 0 : index
      %319 = vector.load %arg20[%318, %c0_141, %c0_142] : memref<4x8x1xf32, #tpu.memory_space<vmem>>, vector<1x8x1xf32>
      %320 = vector.shape_cast %319 : vector<1x8x1xf32> to vector<8x1xf32>
      %321 = vector.shape_cast %289 : vector<8x1xf32> to vector<1x8x1xf32>
      tpu.vector_store %arg20[%318, %c0_141, %c0_142], %321 {strides = array<i32>} : memref<4x8x1xf32, #tpu.memory_space<vmem>>, vector<1x8x1xf32>,
      %c4_i32 = arith.constant 4 : i32
    } else {
    }
    %c0_i32_2 = arith.constant 0 : i32
    %6 = arith.cmpi eq, %arg2, %c0_i32_2 : i32
    %7 = arith.extui %6 : i1 to i32
    %c0_i32_3 = arith.constant 0 : i32
    %8 = arith.cmpi ne, %7, %c0_i32_3 : i32
    scf.if %8 {
      %c0 = arith.constant 0 : index
      %c0_4 = arith.constant 0 : index
      %c0_5 = arith.constant 0 : index
      %9 = vector.load %arg3[%c0, %c0_4, %c0_5] : memref<1x8x32xf32, #tpu.memory_space<vmem>>, vector<1x8x32xf32>
      %10 = vector.shape_cast %9 : vector<1x8x32xf32> to vector<8x32xf32>
      %cst = arith.constant 0.000000e+00 : f32
      %11 = vector.broadcast %cst : f32 to vector<8x32xf32>
      %c0_i32_6 = arith.constant 0 : i32
      %12 = arith.index_cast %c0_i32_6 : i32 to index
      %c0_7 = arith.constant 0 : index
      %c0_8 = arith.constant 0 : index
      %13 = vector.load %arg22[%12, %c0_7, %c0_8] : memref<4x8x8xf32, #tpu.memory_space<vmem>>, vector<1x8x8xf32>
      %14 = vector.shape_cast %13 : vector<1x8x8xf32> to vector<8x8xf32>
      %15 = arith.index_cast %c0_i32_6 : i32 to index
      %c0_9 = arith.constant 0 : index
      %c0_10 = arith.constant 0 : index
      %16 = vector.load %arg21[%15, %c0_9, %c0_10] : memref<4x8x1xf32, #tpu.memory_space<vmem>>, vector<1x8x1xf32>
      %17 = vector.shape_cast %16 : vector<1x8x1xf32> to vector<8x1xf32>
      %18 = tpu.reciprocal %17 {approx = true} : vector<8x1xf32> -> vector<8x1xf32>
      %19 = vector.broadcast %18 : vector<8x1xf32> to vector<8x8xf32>
      %20 = arith.mulf %14, %19 : vector<8x8xf32>
      %21 = arith.truncf %20 : vector<8x8xf32> to vector<8x8xbf16>
      %22 = arith.index_cast %c0_i32_6 : i32 to index
      %c0_11 = arith.constant 0 : index
      %c0_12 = arith.constant 0 : index
      %23 = vector.load %arg7[%22, %c0_11, %c0_12] : memref<4x8x32xbf16, #tpu.memory_space<vmem>>, vector<1x8x32xbf16>
      %24 = vector.shape_cast %23 : vector<1x8x32xbf16> to vector<8x32xbf16>
      %cst_13 = arith.constant dense<0.000000e+00> : vector<8x32xf32>
      %25 = tpu.matmul %21, %24, %cst_13 {dimension_numbers = #tpu.dot_dimension_numbers<[1], [0], [0], [1], [0, 0, 1, 1], [], []>} : vector<8x8xbf16>, vector<8x32xbf16>, vector<8x32xf32> -> vector<8x32xf32>
      %26 = arith.addf %11, %25 : vector<8x32xf32>
      %c1_i32 = arith.constant 1 : i32
      %27 = arith.index_cast %c1_i32 : i32 to index
      %c0_14 = arith.constant 0 : index
      %c0_15 = arith.constant 0 : index
      %28 = vector.load %arg22[%27, %c0_14, %c0_15] : memref<4x8x8xf32, #tpu.memory_space<vmem>>, vector<1x8x8xf32>
      %29 = vector.shape_cast %28 : vector<1x8x8xf32> to vector<8x8xf32>
      %30 = arith.index_cast %c1_i32 : i32 to index
      %c0_16 = arith.constant 0 : index
      %c0_17 = arith.constant 0 : index
      %31 = vector.load %arg21[%30, %c0_16, %c0_17] : memref<4x8x1xf32, #tpu.memory_space<vmem>>, vector<1x8x1xf32>
      %32 = vector.shape_cast %31 : vector<1x8x1xf32> to vector<8x1xf32>
      %33 = tpu.reciprocal %32 {approx = true} : vector<8x1xf32> -> vector<8x1xf32>
      %34 = vector.broadcast %33 : vector<8x1xf32> to vector<8x8xf32>
      %35 = arith.mulf %29, %34 : vector<8x8xf32>
      %36 = arith.truncf %35 : vector<8x8xf32> to vector<8x8xbf16>
      %37 = arith.index_cast %c1_i32 : i32 to index
      %c0_18 = arith.constant 0 : index
      %c0_19 = arith.constant 0 : index
      %38 = vector.load %arg7[%37, %c0_18, %c0_19] : memref<4x8x32xbf16, #tpu.memory_space<vmem>>, vector<1x8x32xbf16>
      %39 = vector.shape_cast %38 : vector<1x8x32xbf16> to vector<8x32xbf16>
      %cst_20 = arith.constant dense<0.000000e+00> : vector<8x32xf32>
      %40 = tpu.matmul %36, %39, %cst_20 {dimension_numbers = #tpu.dot_dimension_numbers<[1], [0], [0], [1], [0, 0, 1, 1], [], []>} : vector<8x8xbf16>, vector<8x32xbf16>, vector<8x32xf32> -> vector<8x32xf32>
      %41 = arith.addf %26, %40 : vector<8x32xf32>
      %c2_i32 = arith.constant 2 : i32
      %42 = arith.index_cast %c2_i32 : i32 to index
      %c0_21 = arith.constant 0 : index
      %c0_22 = arith.constant 0 : index
      %43 = vector.load %arg22[%42, %c0_21, %c0_22] : memref<4x8x8xf32, #tpu.memory_space<vmem>>, vector<1x8x8xf32>
      %44 = vector.shape_cast %43 : vector<1x8x8xf32> to vector<8x8xf32>
      %45 = arith.index_cast %c2_i32 : i32 to index
      %c0_23 = arith.constant 0 : index
      %c0_24 = arith.constant 0 : index
      %46 = vector.load %arg21[%45, %c0_23, %c0_24] : memref<4x8x1xf32, #tpu.memory_space<vmem>>, vector<1x8x1xf32>
      %47 = vector.shape_cast %46 : vector<1x8x1xf32> to vector<8x1xf32>
      %48 = tpu.reciprocal %47 {approx = true} : vector<8x1xf32> -> vector<8x1xf32>
      %49 = vector.broadcast %48 : vector<8x1xf32> to vector<8x8xf32>
      %50 = arith.mulf %44, %49 : vector<8x8xf32>
      %51 = arith.truncf %50 : vector<8x8xf32> to vector<8x8xbf16>
      %52 = arith.index_cast %c2_i32 : i32 to index
      %c0_25 = arith.constant 0 : index
      %c0_26 = arith.constant 0 : index
      %53 = vector.load %arg7[%52, %c0_25, %c0_26] : memref<4x8x32xbf16, #tpu.memory_space<vmem>>, vector<1x8x32xbf16>
      %54 = vector.shape_cast %53 : vector<1x8x32xbf16> to vector<8x32xbf16>
      %cst_27 = arith.constant dense<0.000000e+00> : vector<8x32xf32>
      %55 = tpu.matmul %51, %54, %cst_27 {dimension_numbers = #tpu.dot_dimension_numbers<[1], [0], [0], [1], [0, 0, 1, 1], [], []>} : vector<8x8xbf16>, vector<8x32xbf16>, vector<8x32xf32> -> vector<8x32xf32>
      %56 = arith.addf %41, %55 : vector<8x32xf32>
      %c3_i32 = arith.constant 3 : i32
      %57 = arith.index_cast %c3_i32 : i32 to index
      %c0_28 = arith.constant 0 : index
      %c0_29 = arith.constant 0 : index
      %58 = vector.load %arg22[%57, %c0_28, %c0_29] : memref<4x8x8xf32, #tpu.memory_space<vmem>>, vector<1x8x8xf32>
      %59 = vector.shape_cast %58 : vector<1x8x8xf32> to vector<8x8xf32>
      %60 = arith.index_cast %c3_i32 : i32 to index
      %c0_30 = arith.constant 0 : index
      %c0_31 = arith.constant 0 : index
      %61 = vector.load %arg21[%60, %c0_30, %c0_31] : memref<4x8x1xf32, #tpu.memory_space<vmem>>, vector<1x8x1xf32>
      %62 = vector.shape_cast %61 : vector<1x8x1xf32> to vector<8x1xf32>
      %63 = tpu.reciprocal %62 {approx = true} : vector<8x1xf32> -> vector<8x1xf32>
      %64 = vector.broadcast %63 : vector<8x1xf32> to vector<8x8xf32>
      %65 = arith.mulf %59, %64 : vector<8x8xf32>
      %66 = arith.truncf %65 : vector<8x8xf32> to vector<8x8xbf16>
      %67 = arith.index_cast %c3_i32 : i32 to index
      %c0_32 = arith.constant 0 : index
      %c0_33 = arith.constant 0 : index
      %68 = vector.load %arg7[%67, %c0_32, %c0_33] : memref<4x8x32xbf16, #tpu.memory_space<vmem>>, vector<1x8x32xbf16>
      %69 = vector.shape_cast %68 : vector<1x8x32xbf16> to vector<8x32xbf16>
      %cst_34 = arith.constant dense<0.000000e+00> : vector<8x32xf32>
      %70 = tpu.matmul %66, %69, %cst_34 {dimension_numbers = #tpu.dot_dimension_numbers<[1], [0], [0], [1], [0, 0, 1, 1], [], []>} : vector<8x8xbf16>, vector<8x32xbf16>, vector<8x32xf32> -> vector<8x32xf32>
      %71 = arith.addf %56, %70 : vector<8x32xf32>
      %c4_i32 = arith.constant 4 : i32
      %72 = arith.addf %10, %71 : vector<8x32xf32>
      %c0_35 = arith.constant 0 : index
      %c0_36 = arith.constant 0 : index
      %73 = vector.load %arg11[%c0_35, %c0_36] : memref<1x32xf32, #tpu.memory_space<vmem>>, vector<1x32xf32>
      %74 = arith.mulf %72, %72 : vector<8x32xf32>
      %cst_37 = arith.constant dense<0.000000e+00> : vector<8xf32>
      %75 = vector.multi_reduction <add>, %74, %cst_37 [1] : vector<8x32xf32> to vector<8xf32>
      %76 = vector.shape_cast %75 : vector<8xf32> to vector<8x1xf32>
      %cst_38 = arith.constant 3.200000e+01 : f32
      %77 = vector.broadcast %cst_38 : f32 to vector<8x1xf32>
      %78 = arith.divf %76, %77 : vector<8x1xf32>
      %cst_39 = arith.constant 9.99999974E-6 : f32
      %79 = vector.broadcast %cst_39 : f32 to vector<8x1xf32>
      %80 = arith.addf %78, %79 : vector<8x1xf32>
      %81 = math.rsqrt %80 : vector<8x1xf32>
      %82 = vector.broadcast %81 : vector<8x1xf32> to vector<8x32xf32>
      %83 = arith.mulf %72, %82 : vector<8x32xf32>
      %84 = vector.broadcast %73 : vector<1x32xf32> to vector<8x32xf32>
      %85 = arith.mulf %83, %84 : vector<8x32xf32>
      %86 = arith.truncf %85 : vector<8x32xf32> to vector<8x32xbf16>
      %c0_40 = arith.constant 0 : index
      %c0_41 = arith.constant 0 : index
      %87 = vector.load %arg8[%c0_40, %c0_41] : memref<32x128xbf16, #tpu.memory_space<vmem>>, vector<32x128xbf16>
      %cst_42 = arith.constant dense<0.000000e+00> : vector<8x128xf32>
      %88 = tpu.matmul %86, %87, %cst_42 {dimension_numbers = #tpu.dot_dimension_numbers<[1], [0], [0], [1], [0, 0, 1, 1], [], []>} : vector<8x32xbf16>, vector<32x128xbf16>, vector<8x128xf32> -> vector<8x128xf32>
      %89 = vector.extract_strided_slice %88 {offsets = [0, 0], sizes = [8, 64], strides = [1, 1]} : vector<8x128xf32> to vector<8x64xf32>
      %90 = vector.extract_strided_slice %88 {offsets = [0, 64], sizes = [8, 64], strides = [1, 1]} : vector<8x128xf32> to vector<8x64xf32>
      %91 = arith.negf %89 : vector<8x64xf32>
      %92 = math.exp %91 : vector<8x64xf32>
      %cst_43 = arith.constant 1.000000e+00 : f32
      %93 = vector.broadcast %cst_43 : f32 to vector<8x64xf32>
      %94 = arith.addf %93, %92 : vector<8x64xf32>
      %95 = arith.divf %93, %94 : vector<8x64xf32>
      %96 = arith.mulf %95, %89 : vector<8x64xf32>
      %97 = arith.mulf %96, %90 : vector<8x64xf32>
      %98 = arith.truncf %97 : vector<8x64xf32> to vector<8x64xbf16>
      %c0_44 = arith.constant 0 : index
      %c0_45 = arith.constant 0 : index
      %99 = vector.load %arg9[%c0_44, %c0_45] : memref<64x32xbf16, #tpu.memory_space<vmem>>, vector<64x32xbf16>
      %cst_46 = arith.constant dense<0.000000e+00> : vector<8x32xf32>
      %100 = tpu.matmul %98, %99, %cst_46 {dimension_numbers = #tpu.dot_dimension_numbers<[1], [0], [0], [1], [0, 0, 1, 1], [], []>} : vector<8x64xbf16>, vector<64x32xbf16>, vector<8x32xf32> -> vector<8x32xf32>
      %101 = arith.addf %72, %100 : vector<8x32xf32>
      %c0_47 = arith.constant 0 : index
      %c0_48 = arith.constant 0 : index
      %c0_49 = arith.constant 0 : index
      %102 = vector.load %arg16[%c0_47, %c0_48, %c0_49] : memref<1x8x32xf32, #tpu.memory_space<vmem>>, vector<1x8x32xf32>
      %103 = vector.shape_cast %102 : vector<1x8x32xf32> to vector<8x32xf32>
      %104 = vector.shape_cast %101 : vector<8x32xf32> to vector<1x8x32xf32>
      tpu.vector_store %arg16[%c0_47, %c0_48, %c0_49], %104 {strides = array<i32>} : memref<1x8x32xf32, #tpu.memory_space<vmem>>, vector<1x8x32xf32>,
    } else {
    }
    return
  }
  func.func @transform_0(%arg0: i32, %arg1: i32, %arg2: i32) -> (i32, i32, i32) {
    %c0_i32 = arith.constant 0 : i32
    %c0_i32_0 = arith.constant 0 : i32
    return %arg0, %arg1, %c0_i32 : i32, i32, i32
  }
  func.func @transform_1(%arg0: i32, %arg1: i32, %arg2: i32) -> (i32, i32, i32) {
    %c0_i32 = arith.constant 0 : i32
    %c0_i32_0 = arith.constant 0 : i32
    return %arg0, %arg2, %c0_i32 : i32, i32, i32
  }
  func.func @transform_2(%arg0: i32, %arg1: i32, %arg2: i32) -> (i32, i32) {
    %c0_i32 = arith.constant 0 : i32
    %c0_i32_0 = arith.constant 0 : i32
    %c0_i32_1 = arith.constant 0 : i32
    return %c0_i32, %c0_i32_0 : i32, i32
  }
  func.func @transform_3(%arg0: i32, %arg1: i32, %arg2: i32) -> (i32, i32) {
    %c0_i32 = arith.constant 0 : i32
    %c0_i32_0 = arith.constant 0 : i32
    %c0_i32_1 = arith.constant 0 : i32
    return %c0_i32, %c0_i32_0 : i32, i32
  }
  func.func @transform_4(%arg0: i32, %arg1: i32, %arg2: i32) -> (i32, i32, i32) {
    %c0_i32 = arith.constant 0 : i32
    %c0_i32_0 = arith.constant 0 : i32
    %c0_i32_1 = arith.constant 0 : i32
    %c0_i32_2 = arith.constant 0 : i32
    return %c0_i32, %c0_i32_0, %c0_i32_1 : i32, i32, i32
  }
  func.func @transform_5(%arg0: i32, %arg1: i32, %arg2: i32) -> (i32, i32) {
    %c0_i32 = arith.constant 0 : i32
    %c0_i32_0 = arith.constant 0 : i32
    %c0_i32_1 = arith.constant 0 : i32
    return %c0_i32, %c0_i32_0 : i32, i32
  }
  func.func @transform_6(%arg0: i32, %arg1: i32, %arg2: i32) -> (i32, i32) {
    %c0_i32 = arith.constant 0 : i32
    %c0_i32_0 = arith.constant 0 : i32
    %c0_i32_1 = arith.constant 0 : i32
    return %c0_i32, %c0_i32_0 : i32, i32
  }
  func.func @transform_7(%arg0: i32, %arg1: i32, %arg2: i32) -> (i32, i32) {
    %c0_i32 = arith.constant 0 : i32
    %c0_i32_0 = arith.constant 0 : i32
    %c0_i32_1 = arith.constant 0 : i32
    return %c0_i32, %c0_i32_0 : i32, i32
  }
  func.func @transform_8(%arg0: i32, %arg1: i32, %arg2: i32) -> (i32, i32) {
    %c0_i32 = arith.constant 0 : i32
    %c0_i32_0 = arith.constant 0 : i32
    %c0_i32_1 = arith.constant 0 : i32
    return %c0_i32, %c0_i32_0 : i32, i32
  }
  func.func @transform_9(%arg0: i32, %arg1: i32, %arg2: i32) -> (i32, i32) {
    %c0_i32 = arith.constant 0 : i32
    %c0_i32_0 = arith.constant 0 : i32
    return %arg1, %c0_i32 : i32, i32
  }
  func.func @transform_10(%arg0: i32, %arg1: i32, %arg2: i32) -> (i32, i32) {
    %c0_i32 = arith.constant 0 : i32
    %c0_i32_0 = arith.constant 0 : i32
    return %arg1, %c0_i32 : i32, i32
  }
  func.func @transform_11(%arg0: i32, %arg1: i32, %arg2: i32) -> (i32, i32) {
    %c0_i32 = arith.constant 0 : i32
    %c0_i32_0 = arith.constant 0 : i32
    return %arg2, %c0_i32 : i32, i32
  }
  func.func @transform_12(%arg0: i32, %arg1: i32, %arg2: i32) -> (i32, i32) {
    %c0_i32 = arith.constant 0 : i32
    %c0_i32_0 = arith.constant 0 : i32
    return %arg2, %c0_i32 : i32, i32
  }
  func.func @transform_13(%arg0: i32, %arg1: i32, %arg2: i32) -> (i32, i32, i32) {
    %c0_i32 = arith.constant 0 : i32
    %c0_i32_0 = arith.constant 0 : i32
    return %arg0, %arg1, %c0_i32 : i32, i32, i32
  }
}

module attributes {stable_mosaic.version = 11 : i64} {
  func.func @_transformer_block_kernel(%arg0: i32, %arg1: i32, %arg2: i32, %arg3: memref<1x8x32xf32, #tpu.memory_space<vmem>>, %arg4: memref<1x8x32xf32, #tpu.memory_space<vmem>>, %arg5: memref<32x32xbf16, #tpu.memory_space<vmem>>, %arg6: memref<32x64xbf16, #tpu.memory_space<vmem>>, %arg7: memref<4x8x32xbf16, #tpu.memory_space<vmem>>, %arg8: memref<32x128xbf16, #tpu.memory_space<vmem>>, %arg9: memref<64x32xbf16, #tpu.memory_space<vmem>>, %arg10: memref<1x32xf32, #tpu.memory_space<vmem>>, %arg11: memref<1x32xf32, #tpu.memory_space<vmem>>, %arg12: memref<8x4xf32, #tpu.memory_space<vmem>>, %arg13: memref<8x4xf32, #tpu.memory_space<vmem>>, %arg14: memref<8x4xf32, #tpu.memory_space<vmem>>, %arg15: memref<8x4xf32, #tpu.memory_space<vmem>>, %arg16: memref<1x8x32xf32, #tpu.memory_space<vmem>>, %arg17: memref<4x8x8xf32, #tpu.memory_space<vmem>>, %arg18: memref<4x8x8xf32, #tpu.memory_space<vmem>>, %arg19: memref<4x8x8xf32, #tpu.memory_space<vmem>>, %arg20: memref<4x8x1xf32, #tpu.memory_space<vmem>>, %arg21: memref<4x8x1xf32, #tpu.memory_space<vmem>>, %arg22: memref<4x8x8xf32, #tpu.memory_space<vmem>>) attributes {dimension_semantics = [#tpu.dimension_semantics<parallel>, #tpu.dimension_semantics<parallel>, #tpu.dimension_semantics<arbitrary>], iteration_bounds = array<i64: 2, 1, 1>, scalar_prefetch = 0 : i64, scratch_operands = 6 : i64, tpu.core_type = #tpu.core_type<tc>, window_params = [{transform_indices = @transform_0, window_bounds = array<i64: 1, 8, 32>}, {transform_indices = @transform_1, window_bounds = array<i64: 1, 8, 32>}, {pipeline_mode = #tpu.pipeline_mode<synchronous>, transform_indices = @transform_2, window_bounds = array<i64: 32, 32>}, {pipeline_mode = #tpu.pipeline_mode<synchronous>, transform_indices = @transform_3, window_bounds = array<i64: 32, 64>}, {pipeline_mode = #tpu.pipeline_mode<synchronous>, transform_indices = @transform_4, window_bounds = array<i64: 4, 8, 32>}, {pipeline_mode = #tpu.pipeline_mode<synchronous>, transform_indices = @transform_5, window_bounds = array<i64: 32, 128>}, {pipeline_mode = #tpu.pipeline_mode<synchronous>, transform_indices = @transform_6, window_bounds = array<i64: 64, 32>}, {pipeline_mode = #tpu.pipeline_mode<synchronous>, transform_indices = @transform_7, window_bounds = array<i64: 1, 32>}, {pipeline_mode = #tpu.pipeline_mode<synchronous>, transform_indices = @transform_8, window_bounds = array<i64: 1, 32>}, {transform_indices = @transform_9, window_bounds = array<i64: 8, 4>}, {transform_indices = @transform_10, window_bounds = array<i64: 8, 4>}, {transform_indices = @transform_11, window_bounds = array<i64: 8, 4>}, {transform_indices = @transform_12, window_bounds = array<i64: 8, 4>}, {transform_indices = @transform_13, window_bounds = array<i64: 1, 8, 32>}]} {
    %c0_i32 = arith.constant 0 : i32
    %0 = arith.cmpi eq, %arg2, %c0_i32 : i32
    %1 = arith.extui %0 : i1 to i32
    %c0_i32_0 = arith.constant 0 : i32
    %2 = arith.cmpi ne, %1, %c0_i32_0 : i32
    scf.if %2 {
      %c0 = arith.constant 0 : index
      %c0_4 = arith.constant 0 : index
      %c0_5 = arith.constant 0 : index
      %9 = vector.load %arg3[%c0, %c0_4, %c0_5] : memref<1x8x32xf32, #tpu.memory_space<vmem>>, vector<1x8x32xf32>
      %10 = vector.shape_cast %9 : vector<1x8x32xf32> to vector<8x32xf32>
      %c0_6 = arith.constant 0 : index
      %c0_7 = arith.constant 0 : index
      %11 = vector.load %arg10[%c0_6, %c0_7] : memref<1x32xf32, #tpu.memory_space<vmem>>, vector<1x32xf32>
      %12 = arith.mulf %10, %10 : vector<8x32xf32>
      %cst = arith.constant dense<0.000000e+00> : vector<8xf32>
      %13 = vector.multi_reduction <add>, %12, %cst [1] : vector<8x32xf32> to vector<8xf32>
      %14 = vector.shape_cast %13 : vector<8xf32> to vector<8x1xf32>
      %cst_8 = arith.constant 3.200000e+01 : f32
      %15 = vector.broadcast %cst_8 : f32 to vector<8x1xf32>
      %16 = arith.divf %14, %15 : vector<8x1xf32>
      %cst_9 = arith.constant 9.99999974E-6 : f32
      %17 = vector.broadcast %cst_9 : f32 to vector<8x1xf32>
      %18 = arith.addf %16, %17 : vector<8x1xf32>
      %19 = math.rsqrt %18 : vector<8x1xf32>
      %20 = vector.broadcast %19 : vector<8x1xf32> to vector<8x32xf32>
      %21 = arith.mulf %10, %20 : vector<8x32xf32>
      %22 = vector.broadcast %11 : vector<1x32xf32> to vector<8x32xf32>
      %23 = arith.mulf %21, %22 : vector<8x32xf32>
      %24 = arith.truncf %23 : vector<8x32xf32> to vector<8x32xbf16>
      %c0_10 = arith.constant 0 : index
      %c0_11 = arith.constant 0 : index
      %25 = vector.load %arg5[%c0_10, %c0_11] : memref<32x32xbf16, #tpu.memory_space<vmem>>, vector<32x32xbf16>
      %cst_12 = arith.constant dense<0.000000e+00> : vector<8x32xf32>
      %26 = tpu.matmul %24, %25, %cst_12 {dimension_numbers = #tpu.dot_dimension_numbers<[1], [0], [0], [1], [0, 0, 1, 1], [], []>} : vector<8x32xbf16>, vector<32x32xbf16>, vector<8x32xf32> -> vector<8x32xf32>
      %c0_13 = arith.constant 0 : index
      %c0_14 = arith.constant 0 : index
      %27 = vector.load %arg12[%c0_13, %c0_14] : memref<8x4xf32, #tpu.memory_space<vmem>>, vector<8x4xf32>
      %c0_15 = arith.constant 0 : index
      %c0_16 = arith.constant 0 : index
      %28 = vector.load %arg13[%c0_15, %c0_16] : memref<8x4xf32, #tpu.memory_space<vmem>>, vector<8x4xf32>
      %29 = vector.extract_strided_slice %26 {offsets = [0, 0], sizes = [8, 4], strides = [1, 1]} : vector<8x32xf32> to vector<8x4xf32>
      %30 = vector.extract_strided_slice %26 {offsets = [0, 4], sizes = [8, 4], strides = [1, 1]} : vector<8x32xf32> to vector<8x4xf32>
      %31 = arith.mulf %29, %27 : vector<8x4xf32>
      %32 = arith.mulf %30, %28 : vector<8x4xf32>
      %33 = arith.subf %31, %32 : vector<8x4xf32>
      %cst_17 = arith.constant 0.353553385 : f32
      %34 = vector.broadcast %cst_17 : f32 to vector<8x4xf32>
      %35 = arith.mulf %33, %34 : vector<8x4xf32>
      %c0_18 = arith.constant 0 : index
      %c0_19 = arith.constant 0 : index
      %c0_20 = arith.constant 0 : index
      %36 = vector.load %arg17[%c0_18, %c0_19, %c0_20] : memref<4x8x8xf32, #tpu.memory_space<vmem>>, vector<1x8x4xf32>
      %37 = vector.shape_cast %36 : vector<1x8x4xf32> to vector<8x4xf32>
      %38 = vector.shape_cast %35 : vector<8x4xf32> to vector<1x8x4xf32>
      tpu.vector_store %arg17[%c0_18, %c0_19, %c0_20], %38 {strides = array<i32>} : memref<4x8x8xf32, #tpu.memory_space<vmem>>, vector<1x8x4xf32>,
      %39 = arith.mulf %30, %27 : vector<8x4xf32>
      %40 = arith.mulf %29, %28 : vector<8x4xf32>
      %41 = arith.addf %39, %40 : vector<8x4xf32>
      %cst_21 = arith.constant 0.353553385 : f32
      %42 = vector.broadcast %cst_21 : f32 to vector<8x4xf32>
      %43 = arith.mulf %41, %42 : vector<8x4xf32>
      %c0_22 = arith.constant 0 : index
      %c0_23 = arith.constant 0 : index
      %c4 = arith.constant 4 : index
      %44 = vector.load %arg17[%c0_22, %c0_23, %c4] : memref<4x8x8xf32, #tpu.memory_space<vmem>>, vector<1x8x4xf32>
      %45 = vector.shape_cast %44 : vector<1x8x4xf32> to vector<8x4xf32>
      %46 = vector.shape_cast %43 : vector<8x4xf32> to vector<1x8x4xf32>
      tpu.vector_store %arg17[%c0_22, %c0_23, %c4], %46 {strides = array<i32>} : memref<4x8x8xf32, #tpu.memory_space<vmem>>, vector<1x8x4xf32>,
      %47 = vector.extract_strided_slice %26 {offsets = [0, 8], sizes = [8, 4], strides = [1, 1]} : vector<8x32xf32> to vector<8x4xf32>
      %48 = vector.extract_strided_slice %26 {offsets = [0, 12], sizes = [8, 4], strides = [1, 1]} : vector<8x32xf32> to vector<8x4xf32>
      %49 = arith.mulf %47, %27 : vector<8x4xf32>
      %50 = arith.mulf %48, %28 : vector<8x4xf32>
      %51 = arith.subf %49, %50 : vector<8x4xf32>
      %cst_24 = arith.constant 0.353553385 : f32
      %52 = vector.broadcast %cst_24 : f32 to vector<8x4xf32>
      %53 = arith.mulf %51, %52 : vector<8x4xf32>
      %c1 = arith.constant 1 : index
      %c0_25 = arith.constant 0 : index
      %c0_26 = arith.constant 0 : index
      %54 = vector.load %arg17[%c1, %c0_25, %c0_26] : memref<4x8x8xf32, #tpu.memory_space<vmem>>, vector<1x8x4xf32>
      %55 = vector.shape_cast %54 : vector<1x8x4xf32> to vector<8x4xf32>
      %56 = vector.shape_cast %53 : vector<8x4xf32> to vector<1x8x4xf32>
      tpu.vector_store %arg17[%c1, %c0_25, %c0_26], %56 {strides = array<i32>} : memref<4x8x8xf32, #tpu.memory_space<vmem>>, vector<1x8x4xf32>,
      %57 = arith.mulf %48, %27 : vector<8x4xf32>
      %58 = arith.mulf %47, %28 : vector<8x4xf32>
      %59 = arith.addf %57, %58 : vector<8x4xf32>
      %cst_27 = arith.constant 0.353553385 : f32
      %60 = vector.broadcast %cst_27 : f32 to vector<8x4xf32>
      %61 = arith.mulf %59, %60 : vector<8x4xf32>
      %c1_28 = arith.constant 1 : index
      %c0_29 = arith.constant 0 : index
      %c4_30 = arith.constant 4 : index
      %62 = vector.load %arg17[%c1_28, %c0_29, %c4_30] : memref<4x8x8xf32, #tpu.memory_space<vmem>>, vector<1x8x4xf32>
      %63 = vector.shape_cast %62 : vector<1x8x4xf32> to vector<8x4xf32>
      %64 = vector.shape_cast %61 : vector<8x4xf32> to vector<1x8x4xf32>
      tpu.vector_store %arg17[%c1_28, %c0_29, %c4_30], %64 {strides = array<i32>} : memref<4x8x8xf32, #tpu.memory_space<vmem>>, vector<1x8x4xf32>,
      %65 = vector.extract_strided_slice %26 {offsets = [0, 16], sizes = [8, 4], strides = [1, 1]} : vector<8x32xf32> to vector<8x4xf32>
      %66 = vector.extract_strided_slice %26 {offsets = [0, 20], sizes = [8, 4], strides = [1, 1]} : vector<8x32xf32> to vector<8x4xf32>
      %67 = arith.mulf %65, %27 : vector<8x4xf32>
      %68 = arith.mulf %66, %28 : vector<8x4xf32>
      %69 = arith.subf %67, %68 : vector<8x4xf32>
      %cst_31 = arith.constant 0.353553385 : f32
      %70 = vector.broadcast %cst_31 : f32 to vector<8x4xf32>
      %71 = arith.mulf %69, %70 : vector<8x4xf32>
      %c2 = arith.constant 2 : index
      %c0_32 = arith.constant 0 : index
      %c0_33 = arith.constant 0 : index
      %72 = vector.load %arg17[%c2, %c0_32, %c0_33] : memref<4x8x8xf32, #tpu.memory_space<vmem>>, vector<1x8x4xf32>
      %73 = vector.shape_cast %72 : vector<1x8x4xf32> to vector<8x4xf32>
      %74 = vector.shape_cast %71 : vector<8x4xf32> to vector<1x8x4xf32>
      tpu.vector_store %arg17[%c2, %c0_32, %c0_33], %74 {strides = array<i32>} : memref<4x8x8xf32, #tpu.memory_space<vmem>>, vector<1x8x4xf32>,
      %75 = arith.mulf %66, %27 : vector<8x4xf32>
      %76 = arith.mulf %65, %28 : vector<8x4xf32>
      %77 = arith.addf %75, %76 : vector<8x4xf32>
      %cst_34 = arith.constant 0.353553385 : f32
      %78 = vector.broadcast %cst_34 : f32 to vector<8x4xf32>
      %79 = arith.mulf %77, %78 : vector<8x4xf32>
      %c2_35 = arith.constant 2 : index
      %c0_36 = arith.constant 0 : index
      %c4_37 = arith.constant 4 : index
      %80 = vector.load %arg17[%c2_35, %c0_36, %c4_37] : memref<4x8x8xf32, #tpu.memory_space<vmem>>, vector<1x8x4xf32>
      %81 = vector.shape_cast %80 : vector<1x8x4xf32> to vector<8x4xf32>
      %82 = vector.shape_cast %79 : vector<8x4xf32> to vector<1x8x4xf32>
      tpu.vector_store %arg17[%c2_35, %c0_36, %c4_37], %82 {strides = array<i32>} : memref<4x8x8xf32, #tpu.memory_space<vmem>>, vector<1x8x4xf32>,
      %83 = vector.extract_strided_slice %26 {offsets = [0, 24], sizes = [8, 4], strides = [1, 1]} : vector<8x32xf32> to vector<8x4xf32>
      %84 = vector.extract_strided_slice %26 {offsets = [0, 28], sizes = [8, 4], strides = [1, 1]} : vector<8x32xf32> to vector<8x4xf32>
      %85 = arith.mulf %83, %27 : vector<8x4xf32>
      %86 = arith.mulf %84, %28 : vector<8x4xf32>
      %87 = arith.subf %85, %86 : vector<8x4xf32>
      %cst_38 = arith.constant 0.353553385 : f32
      %88 = vector.broadcast %cst_38 : f32 to vector<8x4xf32>
      %89 = arith.mulf %87, %88 : vector<8x4xf32>
      %c3 = arith.constant 3 : index
      %c0_39 = arith.constant 0 : index
      %c0_40 = arith.constant 0 : index
      %90 = vector.load %arg17[%c3, %c0_39, %c0_40] : memref<4x8x8xf32, #tpu.memory_space<vmem>>, vector<1x8x4xf32>
      %91 = vector.shape_cast %90 : vector<1x8x4xf32> to vector<8x4xf32>
      %92 = vector.shape_cast %89 : vector<8x4xf32> to vector<1x8x4xf32>
      tpu.vector_store %arg17[%c3, %c0_39, %c0_40], %92 {strides = array<i32>} : memref<4x8x8xf32, #tpu.memory_space<vmem>>, vector<1x8x4xf32>,
      %93 = arith.mulf %84, %27 : vector<8x4xf32>
      %94 = arith.mulf %83, %28 : vector<8x4xf32>
      %95 = arith.addf %93, %94 : vector<8x4xf32>
      %cst_41 = arith.constant 0.353553385 : f32
      %96 = vector.broadcast %cst_41 : f32 to vector<8x4xf32>
      %97 = arith.mulf %95, %96 : vector<8x4xf32>
      %c3_42 = arith.constant 3 : index
      %c0_43 = arith.constant 0 : index
      %c4_44 = arith.constant 4 : index
      %98 = vector.load %arg17[%c3_42, %c0_43, %c4_44] : memref<4x8x8xf32, #tpu.memory_space<vmem>>, vector<1x8x4xf32>
      %99 = vector.shape_cast %98 : vector<1x8x4xf32> to vector<8x4xf32>
      %100 = vector.shape_cast %97 : vector<8x4xf32> to vector<1x8x4xf32>
      tpu.vector_store %arg17[%c3_42, %c0_43, %c4_44], %100 {strides = array<i32>} : memref<4x8x8xf32, #tpu.memory_space<vmem>>, vector<1x8x4xf32>,
      %cst_45 = arith.constant 0xFF800000 : f32
      %101 = vector.broadcast %cst_45 : f32 to vector<4x8x1xf32>
      %c0_46 = arith.constant 0 : index
      %c0_47 = arith.constant 0 : index
      %c0_48 = arith.constant 0 : index
      %102 = vector.load %arg20[%c0_46, %c0_47, %c0_48] : memref<4x8x1xf32, #tpu.memory_space<vmem>>, vector<4x8x1xf32>
      tpu.vector_store %arg20[%c0_46, %c0_47, %c0_48], %101 {strides = array<i32>} : memref<4x8x1xf32, #tpu.memory_space<vmem>>, vector<4x8x1xf32>,
      %cst_49 = arith.constant 0.000000e+00 : f32
      %103 = vector.broadcast %cst_49 : f32 to vector<4x8x1xf32>
      %c0_50 = arith.constant 0 : index
      %c0_51 = arith.constant 0 : index
      %c0_52 = arith.constant 0 : index
      %104 = vector.load %arg21[%c0_50, %c0_51, %c0_52] : memref<4x8x1xf32, #tpu.memory_space<vmem>>, vector<4x8x1xf32>
      tpu.vector_store %arg21[%c0_50, %c0_51, %c0_52], %103 {strides = array<i32>} : memref<4x8x1xf32, #tpu.memory_space<vmem>>, vector<4x8x1xf32>,
      %cst_53 = arith.constant 0.000000e+00 : f32
      %105 = vector.broadcast %cst_53 : f32 to vector<4x8x8xf32>
      %c0_54 = arith.constant 0 : index
      %c0_55 = arith.constant 0 : index
      %c0_56 = arith.constant 0 : index
      %106 = vector.load %arg22[%c0_54, %c0_55, %c0_56] : memref<4x8x8xf32, #tpu.memory_space<vmem>>, vector<4x8x8xf32>
      tpu.vector_store %arg22[%c0_54, %c0_55, %c0_56], %105 {strides = array<i32>} : memref<4x8x8xf32, #tpu.memory_space<vmem>>, vector<4x8x8xf32>,
    } else {
    }
    %3 = arith.cmpi sle, %arg2, %arg1 : i32
    %4 = arith.extui %3 : i1 to i32
    %c0_i32_1 = arith.constant 0 : i32
    %5 = arith.cmpi ne, %4, %c0_i32_1 : i32
    scf.if %5 {
      %c0 = arith.constant 0 : index
      %c0_4 = arith.constant 0 : index
      %c0_5 = arith.constant 0 : index
      %9 = vector.load %arg4[%c0, %c0_4, %c0_5] : memref<1x8x32xf32, #tpu.memory_space<vmem>>, vector<1x8x32xf32>
      %10 = vector.shape_cast %9 : vector<1x8x32xf32> to vector<8x32xf32>
      %c0_6 = arith.constant 0 : index
      %c0_7 = arith.constant 0 : index
      %11 = vector.load %arg10[%c0_6, %c0_7] : memref<1x32xf32, #tpu.memory_space<vmem>>, vector<1x32xf32>
      %12 = arith.mulf %10, %10 : vector<8x32xf32>
      %cst = arith.constant dense<0.000000e+00> : vector<8xf32>
      %13 = vector.multi_reduction <add>, %12, %cst [1] : vector<8x32xf32> to vector<8xf32>
      %14 = vector.shape_cast %13 : vector<8xf32> to vector<8x1xf32>
      %cst_8 = arith.constant 3.200000e+01 : f32
      %15 = vector.broadcast %cst_8 : f32 to vector<8x1xf32>
      %16 = arith.divf %14, %15 : vector<8x1xf32>
      %cst_9 = arith.constant 9.99999974E-6 : f32
      %17 = vector.broadcast %cst_9 : f32 to vector<8x1xf32>
      %18 = arith.addf %16, %17 : vector<8x1xf32>
      %19 = math.rsqrt %18 : vector<8x1xf32>
      %20 = vector.broadcast %19 : vector<8x1xf32> to vector<8x32xf32>
      %21 = arith.mulf %10, %20 : vector<8x32xf32>
      %22 = vector.broadcast %11 : vector<1x32xf32> to vector<8x32xf32>
      %23 = arith.mulf %21, %22 : vector<8x32xf32>
      %24 = arith.truncf %23 : vector<8x32xf32> to vector<8x32xbf16>
      %c0_10 = arith.constant 0 : index
      %c0_11 = arith.constant 0 : index
      %25 = vector.load %arg6[%c0_10, %c0_11] : memref<32x64xbf16, #tpu.memory_space<vmem>>, vector<32x64xbf16>
      %cst_12 = arith.constant dense<0.000000e+00> : vector<8x64xf32>
      %26 = tpu.matmul %24, %25, %cst_12 {dimension_numbers = #tpu.dot_dimension_numbers<[1], [0], [0], [1], [0, 0, 1, 1], [], []>} : vector<8x32xbf16>, vector<32x64xbf16>, vector<8x64xf32> -> vector<8x64xf32>
      %c0_13 = arith.constant 0 : index
      %c0_14 = arith.constant 0 : index
      %27 = vector.load %arg14[%c0_13, %c0_14] : memref<8x4xf32, #tpu.memory_space<vmem>>, vector<8x4xf32>
      %c0_15 = arith.constant 0 : index
      %c0_16 = arith.constant 0 : index
      %28 = vector.load %arg15[%c0_15, %c0_16] : memref<8x4xf32, #tpu.memory_space<vmem>>, vector<8x4xf32>
      %29 = vector.extract_strided_slice %26 {offsets = [0, 0], sizes = [8, 4], strides = [1, 1]} : vector<8x64xf32> to vector<8x4xf32>
      %30 = vector.extract_strided_slice %26 {offsets = [0, 4], sizes = [8, 4], strides = [1, 1]} : vector<8x64xf32> to vector<8x4xf32>
      %31 = arith.mulf %29, %27 : vector<8x4xf32>
      %32 = arith.mulf %30, %28 : vector<8x4xf32>
      %33 = arith.subf %31, %32 : vector<8x4xf32>
      %c0_17 = arith.constant 0 : index
      %c0_18 = arith.constant 0 : index
      %c0_19 = arith.constant 0 : index
      %34 = vector.load %arg18[%c0_17, %c0_18, %c0_19] : memref<4x8x8xf32, #tpu.memory_space<vmem>>, vector<1x8x4xf32>
      %35 = vector.shape_cast %34 : vector<1x8x4xf32> to vector<8x4xf32>
      %36 = vector.shape_cast %33 : vector<8x4xf32> to vector<1x8x4xf32>
      tpu.vector_store %arg18[%c0_17, %c0_18, %c0_19], %36 {strides = array<i32>} : memref<4x8x8xf32, #tpu.memory_space<vmem>>, vector<1x8x4xf32>,
      %37 = arith.mulf %30, %27 : vector<8x4xf32>
      %38 = arith.mulf %29, %28 : vector<8x4xf32>
      %39 = arith.addf %37, %38 : vector<8x4xf32>
      %c0_20 = arith.constant 0 : index
      %c0_21 = arith.constant 0 : index
      %c4 = arith.constant 4 : index
      %40 = vector.load %arg18[%c0_20, %c0_21, %c4] : memref<4x8x8xf32, #tpu.memory_space<vmem>>, vector<1x8x4xf32>
      %41 = vector.shape_cast %40 : vector<1x8x4xf32> to vector<8x4xf32>
      %42 = vector.shape_cast %39 : vector<8x4xf32> to vector<1x8x4xf32>
      tpu.vector_store %arg18[%c0_20, %c0_21, %c4], %42 {strides = array<i32>} : memref<4x8x8xf32, #tpu.memory_space<vmem>>, vector<1x8x4xf32>,
      %43 = vector.extract_strided_slice %26 {offsets = [0, 32], sizes = [8, 8], strides = [1, 1]} : vector<8x64xf32> to vector<8x8xf32>
      %c0_22 = arith.constant 0 : index
      %c0_23 = arith.constant 0 : index
      %c0_24 = arith.constant 0 : index
      %44 = vector.load %arg19[%c0_22, %c0_23, %c0_24] : memref<4x8x8xf32, #tpu.memory_space<vmem>>, vector<1x8x8xf32>
      %45 = vector.shape_cast %44 : vector<1x8x8xf32> to vector<8x8xf32>
      %46 = vector.shape_cast %43 : vector<8x8xf32> to vector<1x8x8xf32>
      tpu.vector_store %arg19[%c0_22, %c0_23, %c0_24], %46 {strides = array<i32>} : memref<4x8x8xf32, #tpu.memory_space<vmem>>, vector<1x8x8xf32>,
      %47 = vector.extract_strided_slice %26 {offsets = [0, 8], sizes = [8, 4], strides = [1, 1]} : vector<8x64xf32> to vector<8x4xf32>
      %48 = vector.extract_strided_slice %26 {offsets = [0, 12], sizes = [8, 4], strides = [1, 1]} : vector<8x64xf32> to vector<8x4xf32>
      %49 = arith.mulf %47, %27 : vector<8x4xf32>
      %50 = arith.mulf %48, %28 : vector<8x4xf32>
      %51 = arith.subf %49, %50 : vector<8x4xf32>
      %c1 = arith.constant 1 : index
      %c0_25 = arith.constant 0 : index
      %c0_26 = arith.constant 0 : index
      %52 = vector.load %arg18[%c1, %c0_25, %c0_26] : memref<4x8x8xf32, #tpu.memory_space<vmem>>, vector<1x8x4xf32>
      %53 = vector.shape_cast %52 : vector<1x8x4xf32> to vector<8x4xf32>
      %54 = vector.shape_cast %51 : vector<8x4xf32> to vector<1x8x4xf32>
      tpu.vector_store %arg18[%c1, %c0_25, %c0_26], %54 {strides = array<i32>} : memref<4x8x8xf32, #tpu.memory_space<vmem>>, vector<1x8x4xf32>,
      %55 = arith.mulf %48, %27 : vector<8x4xf32>
      %56 = arith.mulf %47, %28 : vector<8x4xf32>
      %57 = arith.addf %55, %56 : vector<8x4xf32>
      %c1_27 = arith.constant 1 : index
      %c0_28 = arith.constant 0 : index
      %c4_29 = arith.constant 4 : index
      %58 = vector.load %arg18[%c1_27, %c0_28, %c4_29] : memref<4x8x8xf32, #tpu.memory_space<vmem>>, vector<1x8x4xf32>
      %59 = vector.shape_cast %58 : vector<1x8x4xf32> to vector<8x4xf32>
      %60 = vector.shape_cast %57 : vector<8x4xf32> to vector<1x8x4xf32>
      tpu.vector_store %arg18[%c1_27, %c0_28, %c4_29], %60 {strides = array<i32>} : memref<4x8x8xf32, #tpu.memory_space<vmem>>, vector<1x8x4xf32>,
      %61 = vector.extract_strided_slice %26 {offsets = [0, 40], sizes = [8, 8], strides = [1, 1]} : vector<8x64xf32> to vector<8x8xf32>
      %c1_30 = arith.constant 1 : index
      %c0_31 = arith.constant 0 : index
      %c0_32 = arith.constant 0 : index
      %62 = vector.load %arg19[%c1_30, %c0_31, %c0_32] : memref<4x8x8xf32, #tpu.memory_space<vmem>>, vector<1x8x8xf32>
      %63 = vector.shape_cast %62 : vector<1x8x8xf32> to vector<8x8xf32>
      %64 = vector.shape_cast %61 : vector<8x8xf32> to vector<1x8x8xf32>
      tpu.vector_store %arg19[%c1_30, %c0_31, %c0_32], %64 {strides = array<i32>} : memref<4x8x8xf32, #tpu.memory_space<vmem>>, vector<1x8x8xf32>,
      %65 = vector.extract_strided_slice %26 {offsets = [0, 16], sizes = [8, 4], strides = [1, 1]} : vector<8x64xf32> to vector<8x4xf32>
      %66 = vector.extract_strided_slice %26 {offsets = [0, 20], sizes = [8, 4], strides = [1, 1]} : vector<8x64xf32> to vector<8x4xf32>
      %67 = arith.mulf %65, %27 : vector<8x4xf32>
      %68 = arith.mulf %66, %28 : vector<8x4xf32>
      %69 = arith.subf %67, %68 : vector<8x4xf32>
      %c2 = arith.constant 2 : index
      %c0_33 = arith.constant 0 : index
      %c0_34 = arith.constant 0 : index
      %70 = vector.load %arg18[%c2, %c0_33, %c0_34] : memref<4x8x8xf32, #tpu.memory_space<vmem>>, vector<1x8x4xf32>
      %71 = vector.shape_cast %70 : vector<1x8x4xf32> to vector<8x4xf32>
      %72 = vector.shape_cast %69 : vector<8x4xf32> to vector<1x8x4xf32>
      tpu.vector_store %arg18[%c2, %c0_33, %c0_34], %72 {strides = array<i32>} : memref<4x8x8xf32, #tpu.memory_space<vmem>>, vector<1x8x4xf32>,
      %73 = arith.mulf %66, %27 : vector<8x4xf32>
      %74 = arith.mulf %65, %28 : vector<8x4xf32>
      %75 = arith.addf %73, %74 : vector<8x4xf32>
      %c2_35 = arith.constant 2 : index
      %c0_36 = arith.constant 0 : index
      %c4_37 = arith.constant 4 : index
      %76 = vector.load %arg18[%c2_35, %c0_36, %c4_37] : memref<4x8x8xf32, #tpu.memory_space<vmem>>, vector<1x8x4xf32>
      %77 = vector.shape_cast %76 : vector<1x8x4xf32> to vector<8x4xf32>
      %78 = vector.shape_cast %75 : vector<8x4xf32> to vector<1x8x4xf32>
      tpu.vector_store %arg18[%c2_35, %c0_36, %c4_37], %78 {strides = array<i32>} : memref<4x8x8xf32, #tpu.memory_space<vmem>>, vector<1x8x4xf32>,
      %79 = vector.extract_strided_slice %26 {offsets = [0, 48], sizes = [8, 8], strides = [1, 1]} : vector<8x64xf32> to vector<8x8xf32>
      %c2_38 = arith.constant 2 : index
      %c0_39 = arith.constant 0 : index
      %c0_40 = arith.constant 0 : index
      %80 = vector.load %arg19[%c2_38, %c0_39, %c0_40] : memref<4x8x8xf32, #tpu.memory_space<vmem>>, vector<1x8x8xf32>
      %81 = vector.shape_cast %80 : vector<1x8x8xf32> to vector<8x8xf32>
      %82 = vector.shape_cast %79 : vector<8x8xf32> to vector<1x8x8xf32>
      tpu.vector_store %arg19[%c2_38, %c0_39, %c0_40], %82 {strides = array<i32>} : memref<4x8x8xf32, #tpu.memory_space<vmem>>, vector<1x8x8xf32>,
      %83 = vector.extract_strided_slice %26 {offsets = [0, 24], sizes = [8, 4], strides = [1, 1]} : vector<8x64xf32> to vector<8x4xf32>
      %84 = vector.extract_strided_slice %26 {offsets = [0, 28], sizes = [8, 4], strides = [1, 1]} : vector<8x64xf32> to vector<8x4xf32>
      %85 = arith.mulf %83, %27 : vector<8x4xf32>
      %86 = arith.mulf %84, %28 : vector<8x4xf32>
      %87 = arith.subf %85, %86 : vector<8x4xf32>
      %c3 = arith.constant 3 : index
      %c0_41 = arith.constant 0 : index
      %c0_42 = arith.constant 0 : index
      %88 = vector.load %arg18[%c3, %c0_41, %c0_42] : memref<4x8x8xf32, #tpu.memory_space<vmem>>, vector<1x8x4xf32>
      %89 = vector.shape_cast %88 : vector<1x8x4xf32> to vector<8x4xf32>
      %90 = vector.shape_cast %87 : vector<8x4xf32> to vector<1x8x4xf32>
      tpu.vector_store %arg18[%c3, %c0_41, %c0_42], %90 {strides = array<i32>} : memref<4x8x8xf32, #tpu.memory_space<vmem>>, vector<1x8x4xf32>,
      %91 = arith.mulf %84, %27 : vector<8x4xf32>
      %92 = arith.mulf %83, %28 : vector<8x4xf32>
      %93 = arith.addf %91, %92 : vector<8x4xf32>
      %c3_43 = arith.constant 3 : index
      %c0_44 = arith.constant 0 : index
      %c4_45 = arith.constant 4 : index
      %94 = vector.load %arg18[%c3_43, %c0_44, %c4_45] : memref<4x8x8xf32, #tpu.memory_space<vmem>>, vector<1x8x4xf32>
      %95 = vector.shape_cast %94 : vector<1x8x4xf32> to vector<8x4xf32>
      %96 = vector.shape_cast %93 : vector<8x4xf32> to vector<1x8x4xf32>
      tpu.vector_store %arg18[%c3_43, %c0_44, %c4_45], %96 {strides = array<i32>} : memref<4x8x8xf32, #tpu.memory_space<vmem>>, vector<1x8x4xf32>,
      %97 = vector.extract_strided_slice %26 {offsets = [0, 56], sizes = [8, 8], strides = [1, 1]} : vector<8x64xf32> to vector<8x8xf32>
      %c3_46 = arith.constant 3 : index
      %c0_47 = arith.constant 0 : index
      %c0_48 = arith.constant 0 : index
      %98 = vector.load %arg19[%c3_46, %c0_47, %c0_48] : memref<4x8x8xf32, #tpu.memory_space<vmem>>, vector<1x8x8xf32>
      %99 = vector.shape_cast %98 : vector<1x8x8xf32> to vector<8x8xf32>
      %100 = vector.shape_cast %97 : vector<8x8xf32> to vector<1x8x8xf32>
      tpu.vector_store %arg19[%c3_46, %c0_47, %c0_48], %100 {strides = array<i32>} : memref<4x8x8xf32, #tpu.memory_space<vmem>>, vector<1x8x8xf32>,
      %101 = tpu.iota {dimensions = array<i32: 0>} : vector<8x8xi32>
      %c8_i32 = arith.constant 8 : i32
      %102 = arith.muli %arg1, %c8_i32 : i32
      %103 = vector.broadcast %102 : i32 to vector<8x8xi32>
      %104 = arith.addi %101, %103 : vector<8x8xi32>
      %105 = tpu.iota {dimensions = array<i32: 1>} : vector<8x8xi32>
      %c8_i32_49 = arith.constant 8 : i32
      %106 = arith.muli %arg2, %c8_i32_49 : i32
      %107 = vector.broadcast %106 : i32 to vector<8x8xi32>
      %108 = arith.addi %105, %107 : vector<8x8xi32>
      %109 = arith.cmpi sge, %104, %108 : vector<8x8xi32>
      %c0_i32_50 = arith.constant 0 : i32
      %110 = arith.index_cast %c0_i32_50 : i32 to index
      %c0_51 = arith.constant 0 : index
      %c0_52 = arith.constant 0 : index
      %111 = vector.load %arg17[%110, %c0_51, %c0_52] : memref<4x8x8xf32, #tpu.memory_space<vmem>>, vector<1x8x8xf32>
      %112 = vector.shape_cast %111 : vector<1x8x8xf32> to vector<8x8xf32>
      %113 = arith.truncf %112 : vector<8x8xf32> to vector<8x8xbf16>
      %114 = arith.index_cast %c0_i32_50 : i32 to index
      %c0_53 = arith.constant 0 : index
      %c0_54 = arith.constant 0 : index
      %115 = vector.load %arg18[%114, %c0_53, %c0_54] : memref<4x8x8xf32, #tpu.memory_space<vmem>>, vector<1x8x8xf32>
      %116 = vector.shape_cast %115 : vector<1x8x8xf32> to vector<8x8xf32>
      %117 = arith.truncf %116 : vector<8x8xf32> to vector<8x8xbf16>
      %118 = arith.index_cast %c0_i32_50 : i32 to index
      %c0_55 = arith.constant 0 : index
      %c0_56 = arith.constant 0 : index
      %119 = vector.load %arg19[%118, %c0_55, %c0_56] : memref<4x8x8xf32, #tpu.memory_space<vmem>>, vector<1x8x8xf32>
      %120 = vector.shape_cast %119 : vector<1x8x8xf32> to vector<8x8xf32>
      %121 = arith.truncf %120 : vector<8x8xf32> to vector<8x8xbf16>
      %cst_57 = arith.constant dense<0.000000e+00> : vector<8x8xf32>
      %122 = tpu.matmul %113, %117, %cst_57 {dimension_numbers = #tpu.dot_dimension_numbers<[1], [1], [0], [0], [0, 0, 1, 0], [], []>} : vector<8x8xbf16>, vector<8x8xbf16>, vector<8x8xf32> -> vector<8x8xf32>
      %cst_58 = arith.constant -1.000000e+09 : f32
      %123 = vector.broadcast %cst_58 : f32 to vector<8x8xf32>
      %124 = arith.select %109, %122, %123 : vector<8x8xi1>, vector<8x8xf32>
      %125 = arith.index_cast %c0_i32_50 : i32 to index
      %c0_59 = arith.constant 0 : index
      %c0_60 = arith.constant 0 : index
      %126 = vector.load %arg20[%125, %c0_59, %c0_60] : memref<4x8x1xf32, #tpu.memory_space<vmem>>, vector<1x8x1xf32>
      %127 = vector.shape_cast %126 : vector<1x8x1xf32> to vector<8x1xf32>
      %cst_61 = arith.constant dense<0xFF800000> : vector<8xf32>
      %128 = vector.multi_reduction <maximumf>, %124, %cst_61 [1] : vector<8x8xf32> to vector<8xf32>
      %129 = vector.shape_cast %128 : vector<8xf32> to vector<8x1xf32>
      %130 = arith.maximumf %127, %129 : vector<8x1xf32>
      %131 = arith.subf %127, %130 : vector<8x1xf32>
      %132 = math.exp %131 : vector<8x1xf32>
      %133 = vector.broadcast %130 : vector<8x1xf32> to vector<8x8xf32>
      %134 = arith.subf %124, %133 : vector<8x8xf32>
      %135 = math.exp %134 : vector<8x8xf32>
      %136 = arith.index_cast %c0_i32_50 : i32 to index
      %c0_62 = arith.constant 0 : index
      %c0_63 = arith.constant 0 : index
      %137 = vector.load %arg21[%136, %c0_62, %c0_63] : memref<4x8x1xf32, #tpu.memory_space<vmem>>, vector<1x8x1xf32>
      %138 = vector.shape_cast %137 : vector<1x8x1xf32> to vector<8x1xf32>
      %139 = arith.mulf %132, %138 : vector<8x1xf32>
      %cst_64 = arith.constant dense<0.000000e+00> : vector<8xf32>
      %140 = vector.multi_reduction <add>, %135, %cst_64 [1] : vector<8x8xf32> to vector<8xf32>
      %141 = vector.shape_cast %140 : vector<8xf32> to vector<8x1xf32>
      %142 = arith.addf %139, %141 : vector<8x1xf32>
      %143 = arith.index_cast %c0_i32_50 : i32 to index
      %c0_65 = arith.constant 0 : index
      %c0_66 = arith.constant 0 : index
      %144 = vector.load %arg21[%143, %c0_65, %c0_66] : memref<4x8x1xf32, #tpu.memory_space<vmem>>, vector<1x8x1xf32>
      %145 = vector.shape_cast %144 : vector<1x8x1xf32> to vector<8x1xf32>
      %146 = vector.shape_cast %142 : vector<8x1xf32> to vector<1x8x1xf32>
      tpu.vector_store %arg21[%143, %c0_65, %c0_66], %146 {strides = array<i32>} : memref<4x8x1xf32, #tpu.memory_space<vmem>>, vector<1x8x1xf32>,
      %147 = arith.index_cast %c0_i32_50 : i32 to index
      %c0_67 = arith.constant 0 : index
      %c0_68 = arith.constant 0 : index
      %148 = vector.load %arg22[%147, %c0_67, %c0_68] : memref<4x8x8xf32, #tpu.memory_space<vmem>>, vector<1x8x8xf32>
      %149 = vector.shape_cast %148 : vector<1x8x8xf32> to vector<8x8xf32>
      %150 = vector.broadcast %132 : vector<8x1xf32> to vector<8x8xf32>
      %151 = arith.mulf %150, %149 : vector<8x8xf32>
      %152 = arith.truncf %135 : vector<8x8xf32> to vector<8x8xbf16>
      %cst_69 = arith.constant dense<0.000000e+00> : vector<8x8xf32>
      %153 = tpu.matmul %152, %121, %cst_69 {dimension_numbers = #tpu.dot_dimension_numbers<[1], [0], [0], [1], [0, 0, 1, 1], [], []>} : vector<8x8xbf16>, vector<8x8xbf16>, vector<8x8xf32> -> vector<8x8xf32>
      %154 = arith.addf %151, %153 : vector<8x8xf32>
      %155 = arith.index_cast %c0_i32_50 : i32 to index
      %c0_70 = arith.constant 0 : index
      %c0_71 = arith.constant 0 : index
      %156 = vector.load %arg22[%155, %c0_70, %c0_71] : memref<4x8x8xf32, #tpu.memory_space<vmem>>, vector<1x8x8xf32>
      %157 = vector.shape_cast %156 : vector<1x8x8xf32> to vector<8x8xf32>
      %158 = vector.shape_cast %154 : vector<8x8xf32> to vector<1x8x8xf32>
      tpu.vector_store %arg22[%155, %c0_70, %c0_71], %158 {strides = array<i32>} : memref<4x8x8xf32, #tpu.memory_space<vmem>>, vector<1x8x8xf32>,
      %159 = arith.index_cast %c0_i32_50 : i32 to index
      %c0_72 = arith.constant 0 : index
      %c0_73 = arith.constant 0 : index
      %160 = vector.load %arg20[%159, %c0_72, %c0_73] : memref<4x8x1xf32, #tpu.memory_space<vmem>>, vector<1x8x1xf32>
      %161 = vector.shape_cast %160 : vector<1x8x1xf32> to vector<8x1xf32>
      %162 = vector.shape_cast %130 : vector<8x1xf32> to vector<1x8x1xf32>
      tpu.vector_store %arg20[%159, %c0_72, %c0_73], %162 {strides = array<i32>} : memref<4x8x1xf32, #tpu.memory_space<vmem>>, vector<1x8x1xf32>,
      %c1_i32 = arith.constant 1 : i32
      %163 = arith.index_cast %c1_i32 : i32 to index
      %c0_74 = arith.constant 0 : index
      %c0_75 = arith.constant 0 : index
      %164 = vector.load %arg17[%163, %c0_74, %c0_75] : memref<4x8x8xf32, #tpu.memory_space<vmem>>, vector<1x8x8xf32>
      %165 = vector.shape_cast %164 : vector<1x8x8xf32> to vector<8x8xf32>
      %166 = arith.truncf %165 : vector<8x8xf32> to vector<8x8xbf16>
      %167 = arith.index_cast %c1_i32 : i32 to index
      %c0_76 = arith.constant 0 : index
      %c0_77 = arith.constant 0 : index
      %168 = vector.load %arg18[%167, %c0_76, %c0_77] : memref<4x8x8xf32, #tpu.memory_space<vmem>>, vector<1x8x8xf32>
      %169 = vector.shape_cast %168 : vector<1x8x8xf32> to vector<8x8xf32>
      %170 = arith.truncf %169 : vector<8x8xf32> to vector<8x8xbf16>
      %171 = arith.index_cast %c1_i32 : i32 to index
      %c0_78 = arith.constant 0 : index
      %c0_79 = arith.constant 0 : index
      %172 = vector.load %arg19[%171, %c0_78, %c0_79] : memref<4x8x8xf32, #tpu.memory_space<vmem>>, vector<1x8x8xf32>
      %173 = vector.shape_cast %172 : vector<1x8x8xf32> to vector<8x8xf32>
      %174 = arith.truncf %173 : vector<8x8xf32> to vector<8x8xbf16>
      %cst_80 = arith.constant dense<0.000000e+00> : vector<8x8xf32>
      %175 = tpu.matmul %166, %170, %cst_80 {dimension_numbers = #tpu.dot_dimension_numbers<[1], [1], [0], [0], [0, 0, 1, 0], [], []>} : vector<8x8xbf16>, vector<8x8xbf16>, vector<8x8xf32> -> vector<8x8xf32>
      %cst_81 = arith.constant -1.000000e+09 : f32
      %176 = vector.broadcast %cst_81 : f32 to vector<8x8xf32>
      %177 = arith.select %109, %175, %176 : vector<8x8xi1>, vector<8x8xf32>
      %178 = arith.index_cast %c1_i32 : i32 to index
      %c0_82 = arith.constant 0 : index
      %c0_83 = arith.constant 0 : index
      %179 = vector.load %arg20[%178, %c0_82, %c0_83] : memref<4x8x1xf32, #tpu.memory_space<vmem>>, vector<1x8x1xf32>
      %180 = vector.shape_cast %179 : vector<1x8x1xf32> to vector<8x1xf32>
      %cst_84 = arith.constant dense<0xFF800000> : vector<8xf32>
      %181 = vector.multi_reduction <maximumf>, %177, %cst_84 [1] : vector<8x8xf32> to vector<8xf32>
      %182 = vector.shape_cast %181 : vector<8xf32> to vector<8x1xf32>
      %183 = arith.maximumf %180, %182 : vector<8x1xf32>
      %184 = arith.subf %180, %183 : vector<8x1xf32>
      %185 = math.exp %184 : vector<8x1xf32>
      %186 = vector.broadcast %183 : vector<8x1xf32> to vector<8x8xf32>
      %187 = arith.subf %177, %186 : vector<8x8xf32>
      %188 = math.exp %187 : vector<8x8xf32>
      %189 = arith.index_cast %c1_i32 : i32 to index
      %c0_85 = arith.constant 0 : index
      %c0_86 = arith.constant 0 : index
      %190 = vector.load %arg21[%189, %c0_85, %c0_86] : memref<4x8x1xf32, #tpu.memory_space<vmem>>, vector<1x8x1xf32>
      %191 = vector.shape_cast %190 : vector<1x8x1xf32> to vector<8x1xf32>
      %192 = arith.mulf %185, %191 : vector<8x1xf32>
      %cst_87 = arith.constant dense<0.000000e+00> : vector<8xf32>
      %193 = vector.multi_reduction <add>, %188, %cst_87 [1] : vector<8x8xf32> to vector<8xf32>
      %194 = vector.shape_cast %193 : vector<8xf32> to vector<8x1xf32>
      %195 = arith.addf %192, %194 : vector<8x1xf32>
      %196 = arith.index_cast %c1_i32 : i32 to index
      %c0_88 = arith.constant 0 : index
      %c0_89 = arith.constant 0 : index
      %197 = vector.load %arg21[%196, %c0_88, %c0_89] : memref<4x8x1xf32, #tpu.memory_space<vmem>>, vector<1x8x1xf32>
      %198 = vector.shape_cast %197 : vector<1x8x1xf32> to vector<8x1xf32>
      %199 = vector.shape_cast %195 : vector<8x1xf32> to vector<1x8x1xf32>
      tpu.vector_store %arg21[%196, %c0_88, %c0_89], %199 {strides = array<i32>} : memref<4x8x1xf32, #tpu.memory_space<vmem>>, vector<1x8x1xf32>,
      %200 = arith.index_cast %c1_i32 : i32 to index
      %c0_90 = arith.constant 0 : index
      %c0_91 = arith.constant 0 : index
      %201 = vector.load %arg22[%200, %c0_90, %c0_91] : memref<4x8x8xf32, #tpu.memory_space<vmem>>, vector<1x8x8xf32>
      %202 = vector.shape_cast %201 : vector<1x8x8xf32> to vector<8x8xf32>
      %203 = vector.broadcast %185 : vector<8x1xf32> to vector<8x8xf32>
      %204 = arith.mulf %203, %202 : vector<8x8xf32>
      %205 = arith.truncf %188 : vector<8x8xf32> to vector<8x8xbf16>
      %cst_92 = arith.constant dense<0.000000e+00> : vector<8x8xf32>
      %206 = tpu.matmul %205, %174, %cst_92 {dimension_numbers = #tpu.dot_dimension_numbers<[1], [0], [0], [1], [0, 0, 1, 1], [], []>} : vector<8x8xbf16>, vector<8x8xbf16>, vector<8x8xf32> -> vector<8x8xf32>
      %207 = arith.addf %204, %206 : vector<8x8xf32>
      %208 = arith.index_cast %c1_i32 : i32 to index
      %c0_93 = arith.constant 0 : index
      %c0_94 = arith.constant 0 : index
      %209 = vector.load %arg22[%208, %c0_93, %c0_94] : memref<4x8x8xf32, #tpu.memory_space<vmem>>, vector<1x8x8xf32>
      %210 = vector.shape_cast %209 : vector<1x8x8xf32> to vector<8x8xf32>
      %211 = vector.shape_cast %207 : vector<8x8xf32> to vector<1x8x8xf32>
      tpu.vector_store %arg22[%208, %c0_93, %c0_94], %211 {strides = array<i32>} : memref<4x8x8xf32, #tpu.memory_space<vmem>>, vector<1x8x8xf32>,
      %212 = arith.index_cast %c1_i32 : i32 to index
      %c0_95 = arith.constant 0 : index
      %c0_96 = arith.constant 0 : index
      %213 = vector.load %arg20[%212, %c0_95, %c0_96] : memref<4x8x1xf32, #tpu.memory_space<vmem>>, vector<1x8x1xf32>
      %214 = vector.shape_cast %213 : vector<1x8x1xf32> to vector<8x1xf32>
      %215 = vector.shape_cast %183 : vector<8x1xf32> to vector<1x8x1xf32>
      tpu.vector_store %arg20[%212, %c0_95, %c0_96], %215 {strides = array<i32>} : memref<4x8x1xf32, #tpu.memory_space<vmem>>, vector<1x8x1xf32>,
      %c2_i32 = arith.constant 2 : i32
      %216 = arith.index_cast %c2_i32 : i32 to index
      %c0_97 = arith.constant 0 : index
      %c0_98 = arith.constant 0 : index
      %217 = vector.load %arg17[%216, %c0_97, %c0_98] : memref<4x8x8xf32, #tpu.memory_space<vmem>>, vector<1x8x8xf32>
      %218 = vector.shape_cast %217 : vector<1x8x8xf32> to vector<8x8xf32>
      %219 = arith.truncf %218 : vector<8x8xf32> to vector<8x8xbf16>
      %220 = arith.index_cast %c2_i32 : i32 to index
      %c0_99 = arith.constant 0 : index
      %c0_100 = arith.constant 0 : index
      %221 = vector.load %arg18[%220, %c0_99, %c0_100] : memref<4x8x8xf32, #tpu.memory_space<vmem>>, vector<1x8x8xf32>
      %222 = vector.shape_cast %221 : vector<1x8x8xf32> to vector<8x8xf32>
      %223 = arith.truncf %222 : vector<8x8xf32> to vector<8x8xbf16>
      %224 = arith.index_cast %c2_i32 : i32 to index
      %c0_101 = arith.constant 0 : index
      %c0_102 = arith.constant 0 : index
      %225 = vector.load %arg19[%224, %c0_101, %c0_102] : memref<4x8x8xf32, #tpu.memory_space<vmem>>, vector<1x8x8xf32>
      %226 = vector.shape_cast %225 : vector<1x8x8xf32> to vector<8x8xf32>
      %227 = arith.truncf %226 : vector<8x8xf32> to vector<8x8xbf16>
      %cst_103 = arith.constant dense<0.000000e+00> : vector<8x8xf32>
      %228 = tpu.matmul %219, %223, %cst_103 {dimension_numbers = #tpu.dot_dimension_numbers<[1], [1], [0], [0], [0, 0, 1, 0], [], []>} : vector<8x8xbf16>, vector<8x8xbf16>, vector<8x8xf32> -> vector<8x8xf32>
      %cst_104 = arith.constant -1.000000e+09 : f32
      %229 = vector.broadcast %cst_104 : f32 to vector<8x8xf32>
      %230 = arith.select %109, %228, %229 : vector<8x8xi1>, vector<8x8xf32>
      %231 = arith.index_cast %c2_i32 : i32 to index
      %c0_105 = arith.constant 0 : index
      %c0_106 = arith.constant 0 : index
      %232 = vector.load %arg20[%231, %c0_105, %c0_106] : memref<4x8x1xf32, #tpu.memory_space<vmem>>, vector<1x8x1xf32>
      %233 = vector.shape_cast %232 : vector<1x8x1xf32> to vector<8x1xf32>
      %cst_107 = arith.constant dense<0xFF800000> : vector<8xf32>
      %234 = vector.multi_reduction <maximumf>, %230, %cst_107 [1] : vector<8x8xf32> to vector<8xf32>
      %235 = vector.shape_cast %234 : vector<8xf32> to vector<8x1xf32>
      %236 = arith.maximumf %233, %235 : vector<8x1xf32>
      %237 = arith.subf %233, %236 : vector<8x1xf32>
      %238 = math.exp %237 : vector<8x1xf32>
      %239 = vector.broadcast %236 : vector<8x1xf32> to vector<8x8xf32>
      %240 = arith.subf %230, %239 : vector<8x8xf32>
      %241 = math.exp %240 : vector<8x8xf32>
      %242 = arith.index_cast %c2_i32 : i32 to index
      %c0_108 = arith.constant 0 : index
      %c0_109 = arith.constant 0 : index
      %243 = vector.load %arg21[%242, %c0_108, %c0_109] : memref<4x8x1xf32, #tpu.memory_space<vmem>>, vector<1x8x1xf32>
      %244 = vector.shape_cast %243 : vector<1x8x1xf32> to vector<8x1xf32>
      %245 = arith.mulf %238, %244 : vector<8x1xf32>
      %cst_110 = arith.constant dense<0.000000e+00> : vector<8xf32>
      %246 = vector.multi_reduction <add>, %241, %cst_110 [1] : vector<8x8xf32> to vector<8xf32>
      %247 = vector.shape_cast %246 : vector<8xf32> to vector<8x1xf32>
      %248 = arith.addf %245, %247 : vector<8x1xf32>
      %249 = arith.index_cast %c2_i32 : i32 to index
      %c0_111 = arith.constant 0 : index
      %c0_112 = arith.constant 0 : index
      %250 = vector.load %arg21[%249, %c0_111, %c0_112] : memref<4x8x1xf32, #tpu.memory_space<vmem>>, vector<1x8x1xf32>
      %251 = vector.shape_cast %250 : vector<1x8x1xf32> to vector<8x1xf32>
      %252 = vector.shape_cast %248 : vector<8x1xf32> to vector<1x8x1xf32>
      tpu.vector_store %arg21[%249, %c0_111, %c0_112], %252 {strides = array<i32>} : memref<4x8x1xf32, #tpu.memory_space<vmem>>, vector<1x8x1xf32>,
      %253 = arith.index_cast %c2_i32 : i32 to index
      %c0_113 = arith.constant 0 : index
      %c0_114 = arith.constant 0 : index
      %254 = vector.load %arg22[%253, %c0_113, %c0_114] : memref<4x8x8xf32, #tpu.memory_space<vmem>>, vector<1x8x8xf32>
      %255 = vector.shape_cast %254 : vector<1x8x8xf32> to vector<8x8xf32>
      %256 = vector.broadcast %238 : vector<8x1xf32> to vector<8x8xf32>
      %257 = arith.mulf %256, %255 : vector<8x8xf32>
      %258 = arith.truncf %241 : vector<8x8xf32> to vector<8x8xbf16>
      %cst_115 = arith.constant dense<0.000000e+00> : vector<8x8xf32>
      %259 = tpu.matmul %258, %227, %cst_115 {dimension_numbers = #tpu.dot_dimension_numbers<[1], [0], [0], [1], [0, 0, 1, 1], [], []>} : vector<8x8xbf16>, vector<8x8xbf16>, vector<8x8xf32> -> vector<8x8xf32>
      %260 = arith.addf %257, %259 : vector<8x8xf32>
      %261 = arith.index_cast %c2_i32 : i32 to index
      %c0_116 = arith.constant 0 : index
      %c0_117 = arith.constant 0 : index
      %262 = vector.load %arg22[%261, %c0_116, %c0_117] : memref<4x8x8xf32, #tpu.memory_space<vmem>>, vector<1x8x8xf32>
      %263 = vector.shape_cast %262 : vector<1x8x8xf32> to vector<8x8xf32>
      %264 = vector.shape_cast %260 : vector<8x8xf32> to vector<1x8x8xf32>
      tpu.vector_store %arg22[%261, %c0_116, %c0_117], %264 {strides = array<i32>} : memref<4x8x8xf32, #tpu.memory_space<vmem>>, vector<1x8x8xf32>,
      %265 = arith.index_cast %c2_i32 : i32 to index
      %c0_118 = arith.constant 0 : index
      %c0_119 = arith.constant 0 : index
      %266 = vector.load %arg20[%265, %c0_118, %c0_119] : memref<4x8x1xf32, #tpu.memory_space<vmem>>, vector<1x8x1xf32>
      %267 = vector.shape_cast %266 : vector<1x8x1xf32> to vector<8x1xf32>
      %268 = vector.shape_cast %236 : vector<8x1xf32> to vector<1x8x1xf32>
      tpu.vector_store %arg20[%265, %c0_118, %c0_119], %268 {strides = array<i32>} : memref<4x8x1xf32, #tpu.memory_space<vmem>>, vector<1x8x1xf32>,
      %c3_i32 = arith.constant 3 : i32
      %269 = arith.index_cast %c3_i32 : i32 to index
      %c0_120 = arith.constant 0 : index
      %c0_121 = arith.constant 0 : index
      %270 = vector.load %arg17[%269, %c0_120, %c0_121] : memref<4x8x8xf32, #tpu.memory_space<vmem>>, vector<1x8x8xf32>
      %271 = vector.shape_cast %270 : vector<1x8x8xf32> to vector<8x8xf32>
      %272 = arith.truncf %271 : vector<8x8xf32> to vector<8x8xbf16>
      %273 = arith.index_cast %c3_i32 : i32 to index
      %c0_122 = arith.constant 0 : index
      %c0_123 = arith.constant 0 : index
      %274 = vector.load %arg18[%273, %c0_122, %c0_123] : memref<4x8x8xf32, #tpu.memory_space<vmem>>, vector<1x8x8xf32>
      %275 = vector.shape_cast %274 : vector<1x8x8xf32> to vector<8x8xf32>
      %276 = arith.truncf %275 : vector<8x8xf32> to vector<8x8xbf16>
      %277 = arith.index_cast %c3_i32 : i32 to index
      %c0_124 = arith.constant 0 : index
      %c0_125 = arith.constant 0 : index
      %278 = vector.load %arg19[%277, %c0_124, %c0_125] : memref<4x8x8xf32, #tpu.memory_space<vmem>>, vector<1x8x8xf32>
      %279 = vector.shape_cast %278 : vector<1x8x8xf32> to vector<8x8xf32>
      %280 = arith.truncf %279 : vector<8x8xf32> to vector<8x8xbf16>
      %cst_126 = arith.constant dense<0.000000e+00> : vector<8x8xf32>
      %281 = tpu.matmul %272, %276, %cst_126 {dimension_numbers = #tpu.dot_dimension_numbers<[1], [1], [0], [0], [0, 0, 1, 0], [], []>} : vector<8x8xbf16>, vector<8x8xbf16>, vector<8x8xf32> -> vector<8x8xf32>
      %cst_127 = arith.constant -1.000000e+09 : f32
      %282 = vector.broadcast %cst_127 : f32 to vector<8x8xf32>
      %283 = arith.select %109, %281, %282 : vector<8x8xi1>, vector<8x8xf32>
      %284 = arith.index_cast %c3_i32 : i32 to index
      %c0_128 = arith.constant 0 : index
      %c0_129 = arith.constant 0 : index
      %285 = vector.load %arg20[%284, %c0_128, %c0_129] : memref<4x8x1xf32, #tpu.memory_space<vmem>>, vector<1x8x1xf32>
      %286 = vector.shape_cast %285 : vector<1x8x1xf32> to vector<8x1xf32>
      %cst_130 = arith.constant dense<0xFF800000> : vector<8xf32>
      %287 = vector.multi_reduction <maximumf>, %283, %cst_130 [1] : vector<8x8xf32> to vector<8xf32>
      %288 = vector.shape_cast %287 : vector<8xf32> to vector<8x1xf32>
      %289 = arith.maximumf %286, %288 : vector<8x1xf32>
      %290 = arith.subf %286, %289 : vector<8x1xf32>
      %291 = math.exp %290 : vector<8x1xf32>
      %292 = vector.broadcast %289 : vector<8x1xf32> to vector<8x8xf32>
      %293 = arith.subf %283, %292 : vector<8x8xf32>
      %294 = math.exp %293 : vector<8x8xf32>
      %295 = arith.index_cast %c3_i32 : i32 to index
      %c0_131 = arith.constant 0 : index
      %c0_132 = arith.constant 0 : index
      %296 = vector.load %arg21[%295, %c0_131, %c0_132] : memref<4x8x1xf32, #tpu.memory_space<vmem>>, vector<1x8x1xf32>
      %297 = vector.shape_cast %296 : vector<1x8x1xf32> to vector<8x1xf32>
      %298 = arith.mulf %291, %297 : vector<8x1xf32>
      %cst_133 = arith.constant dense<0.000000e+00> : vector<8xf32>
      %299 = vector.multi_reduction <add>, %294, %cst_133 [1] : vector<8x8xf32> to vector<8xf32>
      %300 = vector.shape_cast %299 : vector<8xf32> to vector<8x1xf32>
      %301 = arith.addf %298, %300 : vector<8x1xf32>
      %302 = arith.index_cast %c3_i32 : i32 to index
      %c0_134 = arith.constant 0 : index
      %c0_135 = arith.constant 0 : index
      %303 = vector.load %arg21[%302, %c0_134, %c0_135] : memref<4x8x1xf32, #tpu.memory_space<vmem>>, vector<1x8x1xf32>
      %304 = vector.shape_cast %303 : vector<1x8x1xf32> to vector<8x1xf32>
      %305 = vector.shape_cast %301 : vector<8x1xf32> to vector<1x8x1xf32>
      tpu.vector_store %arg21[%302, %c0_134, %c0_135], %305 {strides = array<i32>} : memref<4x8x1xf32, #tpu.memory_space<vmem>>, vector<1x8x1xf32>,
      %306 = arith.index_cast %c3_i32 : i32 to index
      %c0_136 = arith.constant 0 : index
      %c0_137 = arith.constant 0 : index
      %307 = vector.load %arg22[%306, %c0_136, %c0_137] : memref<4x8x8xf32, #tpu.memory_space<vmem>>, vector<1x8x8xf32>
      %308 = vector.shape_cast %307 : vector<1x8x8xf32> to vector<8x8xf32>
      %309 = vector.broadcast %291 : vector<8x1xf32> to vector<8x8xf32>
      %310 = arith.mulf %309, %308 : vector<8x8xf32>
      %311 = arith.truncf %294 : vector<8x8xf32> to vector<8x8xbf16>
      %cst_138 = arith.constant dense<0.000000e+00> : vector<8x8xf32>
      %312 = tpu.matmul %311, %280, %cst_138 {dimension_numbers = #tpu.dot_dimension_numbers<[1], [0], [0], [1], [0, 0, 1, 1], [], []>} : vector<8x8xbf16>, vector<8x8xbf16>, vector<8x8xf32> -> vector<8x8xf32>
      %313 = arith.addf %310, %312 : vector<8x8xf32>
      %314 = arith.index_cast %c3_i32 : i32 to index
      %c0_139 = arith.constant 0 : index
      %c0_140 = arith.constant 0 : index
      %315 = vector.load %arg22[%314, %c0_139, %c0_140] : memref<4x8x8xf32, #tpu.memory_space<vmem>>, vector<1x8x8xf32>
      %316 = vector.shape_cast %315 : vector<1x8x8xf32> to vector<8x8xf32>
      %317 = vector.shape_cast %313 : vector<8x8xf32> to vector<1x8x8xf32>
      tpu.vector_store %arg22[%314, %c0_139, %c0_140], %317 {strides = array<i32>} : memref<4x8x8xf32, #tpu.memory_space<vmem>>, vector<1x8x8xf32>,
      %318 = arith.index_cast %c3_i32 : i32 to index
      %c0_141 = arith.constant 0 : index
      %c0_142 = arith.constant 0 : index
      %319 = vector.load %arg20[%318, %c0_141, %c0_142] : memref<4x8x1xf32, #tpu.memory_space<vmem>>, vector<1x8x1xf32>
      %320 = vector.shape_cast %319 : vector<1x8x1xf32> to vector<8x1xf32>
      %321 = vector.shape_cast %289 : vector<8x1xf32> to vector<1x8x1xf32>
      tpu.vector_store %arg20[%318, %c0_141, %c0_142], %321 {strides = array<i32>} : memref<4x8x1xf32, #tpu.memory_space<vmem>>, vector<1x8x1xf32>,
      %c4_i32 = arith.constant 4 : i32
    } else {
    }
    %c0_i32_2 = arith.constant 0 : i32
    %6 = arith.cmpi eq, %arg2, %c0_i32_2 : i32
    %7 = arith.extui %6 : i1 to i32
    %c0_i32_3 = arith.constant 0 : i32
    %8 = arith.cmpi ne, %7, %c0_i32_3 : i32
    scf.if %8 {
      %c0 = arith.constant 0 : index
      %c0_4 = arith.constant 0 : index
      %c0_5 = arith.constant 0 : index
      %9 = vector.load %arg3[%c0, %c0_4, %c0_5] : memref<1x8x32xf32, #tpu.memory_space<vmem>>, vector<1x8x32xf32>
      %10 = vector.shape_cast %9 : vector<1x8x32xf32> to vector<8x32xf32>
      %cst = arith.constant 0.000000e+00 : f32
      %11 = vector.broadcast %cst : f32 to vector<8x32xf32>
      %c0_i32_6 = arith.constant 0 : i32
      %12 = arith.index_cast %c0_i32_6 : i32 to index
      %c0_7 = arith.constant 0 : index
      %c0_8 = arith.constant 0 : index
      %13 = vector.load %arg22[%12, %c0_7, %c0_8] : memref<4x8x8xf32, #tpu.memory_space<vmem>>, vector<1x8x8xf32>
      %14 = vector.shape_cast %13 : vector<1x8x8xf32> to vector<8x8xf32>
      %15 = arith.index_cast %c0_i32_6 : i32 to index
      %c0_9 = arith.constant 0 : index
      %c0_10 = arith.constant 0 : index
      %16 = vector.load %arg21[%15, %c0_9, %c0_10] : memref<4x8x1xf32, #tpu.memory_space<vmem>>, vector<1x8x1xf32>
      %17 = vector.shape_cast %16 : vector<1x8x1xf32> to vector<8x1xf32>
      %18 = tpu.reciprocal %17 {approx = true} : vector<8x1xf32> -> vector<8x1xf32>
      %19 = vector.broadcast %18 : vector<8x1xf32> to vector<8x8xf32>
      %20 = arith.mulf %14, %19 : vector<8x8xf32>
      %21 = arith.truncf %20 : vector<8x8xf32> to vector<8x8xbf16>
      %22 = arith.index_cast %c0_i32_6 : i32 to index
      %c0_11 = arith.constant 0 : index
      %c0_12 = arith.constant 0 : index
      %23 = vector.load %arg7[%22, %c0_11, %c0_12] : memref<4x8x32xbf16, #tpu.memory_space<vmem>>, vector<1x8x32xbf16>
      %24 = vector.shape_cast %23 : vector<1x8x32xbf16> to vector<8x32xbf16>
      %cst_13 = arith.constant dense<0.000000e+00> : vector<8x32xf32>
      %25 = tpu.matmul %21, %24, %cst_13 {dimension_numbers = #tpu.dot_dimension_numbers<[1], [0], [0], [1], [0, 0, 1, 1], [], []>} : vector<8x8xbf16>, vector<8x32xbf16>, vector<8x32xf32> -> vector<8x32xf32>
      %26 = arith.addf %11, %25 : vector<8x32xf32>
      %c1_i32 = arith.constant 1 : i32
      %27 = arith.index_cast %c1_i32 : i32 to index
      %c0_14 = arith.constant 0 : index
      %c0_15 = arith.constant 0 : index
      %28 = vector.load %arg22[%27, %c0_14, %c0_15] : memref<4x8x8xf32, #tpu.memory_space<vmem>>, vector<1x8x8xf32>
      %29 = vector.shape_cast %28 : vector<1x8x8xf32> to vector<8x8xf32>
      %30 = arith.index_cast %c1_i32 : i32 to index
      %c0_16 = arith.constant 0 : index
      %c0_17 = arith.constant 0 : index
      %31 = vector.load %arg21[%30, %c0_16, %c0_17] : memref<4x8x1xf32, #tpu.memory_space<vmem>>, vector<1x8x1xf32>
      %32 = vector.shape_cast %31 : vector<1x8x1xf32> to vector<8x1xf32>
      %33 = tpu.reciprocal %32 {approx = true} : vector<8x1xf32> -> vector<8x1xf32>
      %34 = vector.broadcast %33 : vector<8x1xf32> to vector<8x8xf32>
      %35 = arith.mulf %29, %34 : vector<8x8xf32>
      %36 = arith.truncf %35 : vector<8x8xf32> to vector<8x8xbf16>
      %37 = arith.index_cast %c1_i32 : i32 to index
      %c0_18 = arith.constant 0 : index
      %c0_19 = arith.constant 0 : index
      %38 = vector.load %arg7[%37, %c0_18, %c0_19] : memref<4x8x32xbf16, #tpu.memory_space<vmem>>, vector<1x8x32xbf16>
      %39 = vector.shape_cast %38 : vector<1x8x32xbf16> to vector<8x32xbf16>
      %cst_20 = arith.constant dense<0.000000e+00> : vector<8x32xf32>
      %40 = tpu.matmul %36, %39, %cst_20 {dimension_numbers = #tpu.dot_dimension_numbers<[1], [0], [0], [1], [0, 0, 1, 1], [], []>} : vector<8x8xbf16>, vector<8x32xbf16>, vector<8x32xf32> -> vector<8x32xf32>
      %41 = arith.addf %26, %40 : vector<8x32xf32>
      %c2_i32 = arith.constant 2 : i32
      %42 = arith.index_cast %c2_i32 : i32 to index
      %c0_21 = arith.constant 0 : index
      %c0_22 = arith.constant 0 : index
      %43 = vector.load %arg22[%42, %c0_21, %c0_22] : memref<4x8x8xf32, #tpu.memory_space<vmem>>, vector<1x8x8xf32>
      %44 = vector.shape_cast %43 : vector<1x8x8xf32> to vector<8x8xf32>
      %45 = arith.index_cast %c2_i32 : i32 to index
      %c0_23 = arith.constant 0 : index
      %c0_24 = arith.constant 0 : index
      %46 = vector.load %arg21[%45, %c0_23, %c0_24] : memref<4x8x1xf32, #tpu.memory_space<vmem>>, vector<1x8x1xf32>
      %47 = vector.shape_cast %46 : vector<1x8x1xf32> to vector<8x1xf32>
      %48 = tpu.reciprocal %47 {approx = true} : vector<8x1xf32> -> vector<8x1xf32>
      %49 = vector.broadcast %48 : vector<8x1xf32> to vector<8x8xf32>
      %50 = arith.mulf %44, %49 : vector<8x8xf32>
      %51 = arith.truncf %50 : vector<8x8xf32> to vector<8x8xbf16>
      %52 = arith.index_cast %c2_i32 : i32 to index
      %c0_25 = arith.constant 0 : index
      %c0_26 = arith.constant 0 : index
      %53 = vector.load %arg7[%52, %c0_25, %c0_26] : memref<4x8x32xbf16, #tpu.memory_space<vmem>>, vector<1x8x32xbf16>
      %54 = vector.shape_cast %53 : vector<1x8x32xbf16> to vector<8x32xbf16>
      %cst_27 = arith.constant dense<0.000000e+00> : vector<8x32xf32>
      %55 = tpu.matmul %51, %54, %cst_27 {dimension_numbers = #tpu.dot_dimension_numbers<[1], [0], [0], [1], [0, 0, 1, 1], [], []>} : vector<8x8xbf16>, vector<8x32xbf16>, vector<8x32xf32> -> vector<8x32xf32>
      %56 = arith.addf %41, %55 : vector<8x32xf32>
      %c3_i32 = arith.constant 3 : i32
      %57 = arith.index_cast %c3_i32 : i32 to index
      %c0_28 = arith.constant 0 : index
      %c0_29 = arith.constant 0 : index
      %58 = vector.load %arg22[%57, %c0_28, %c0_29] : memref<4x8x8xf32, #tpu.memory_space<vmem>>, vector<1x8x8xf32>
      %59 = vector.shape_cast %58 : vector<1x8x8xf32> to vector<8x8xf32>
      %60 = arith.index_cast %c3_i32 : i32 to index
      %c0_30 = arith.constant 0 : index
      %c0_31 = arith.constant 0 : index
      %61 = vector.load %arg21[%60, %c0_30, %c0_31] : memref<4x8x1xf32, #tpu.memory_space<vmem>>, vector<1x8x1xf32>
      %62 = vector.shape_cast %61 : vector<1x8x1xf32> to vector<8x1xf32>
      %63 = tpu.reciprocal %62 {approx = true} : vector<8x1xf32> -> vector<8x1xf32>
      %64 = vector.broadcast %63 : vector<8x1xf32> to vector<8x8xf32>
      %65 = arith.mulf %59, %64 : vector<8x8xf32>
      %66 = arith.truncf %65 : vector<8x8xf32> to vector<8x8xbf16>
      %67 = arith.index_cast %c3_i32 : i32 to index
      %c0_32 = arith.constant 0 : index
      %c0_33 = arith.constant 0 : index
      %68 = vector.load %arg7[%67, %c0_32, %c0_33] : memref<4x8x32xbf16, #tpu.memory_space<vmem>>, vector<1x8x32xbf16>
      %69 = vector.shape_cast %68 : vector<1x8x32xbf16> to vector<8x32xbf16>
      %cst_34 = arith.constant dense<0.000000e+00> : vector<8x32xf32>
      %70 = tpu.matmul %66, %69, %cst_34 {dimension_numbers = #tpu.dot_dimension_numbers<[1], [0], [0], [1], [0, 0, 1, 1], [], []>} : vector<8x8xbf16>, vector<8x32xbf16>, vector<8x32xf32> -> vector<8x32xf32>
      %71 = arith.addf %56, %70 : vector<8x32xf32>
      %c4_i32 = arith.constant 4 : i32
      %72 = arith.addf %10, %71 : vector<8x32xf32>
      %c0_35 = arith.constant 0 : index
      %c0_36 = arith.constant 0 : index
      %73 = vector.load %arg11[%c0_35, %c0_36] : memref<1x32xf32, #tpu.memory_space<vmem>>, vector<1x32xf32>
      %74 = arith.mulf %72, %72 : vector<8x32xf32>
      %cst_37 = arith.constant dense<0.000000e+00> : vector<8xf32>
      %75 = vector.multi_reduction <add>, %74, %cst_37 [1] : vector<8x32xf32> to vector<8xf32>
      %76 = vector.shape_cast %75 : vector<8xf32> to vector<8x1xf32>
      %cst_38 = arith.constant 3.200000e+01 : f32
      %77 = vector.broadcast %cst_38 : f32 to vector<8x1xf32>
      %78 = arith.divf %76, %77 : vector<8x1xf32>
      %cst_39 = arith.constant 9.99999974E-6 : f32
      %79 = vector.broadcast %cst_39 : f32 to vector<8x1xf32>
      %80 = arith.addf %78, %79 : vector<8x1xf32>
      %81 = math.rsqrt %80 : vector<8x1xf32>
      %82 = vector.broadcast %81 : vector<8x1xf32> to vector<8x32xf32>
      %83 = arith.mulf %72, %82 : vector<8x32xf32>
      %84 = vector.broadcast %73 : vector<1x32xf32> to vector<8x32xf32>
      %85 = arith.mulf %83, %84 : vector<8x32xf32>
      %86 = arith.truncf %85 : vector<8x32xf32> to vector<8x32xbf16>
      %c0_40 = arith.constant 0 : index
      %c0_41 = arith.constant 0 : index
      %87 = vector.load %arg8[%c0_40, %c0_41] : memref<32x128xbf16, #tpu.memory_space<vmem>>, vector<32x128xbf16>
      %cst_42 = arith.constant dense<0.000000e+00> : vector<8x128xf32>
      %88 = tpu.matmul %86, %87, %cst_42 {dimension_numbers = #tpu.dot_dimension_numbers<[1], [0], [0], [1], [0, 0, 1, 1], [], []>} : vector<8x32xbf16>, vector<32x128xbf16>, vector<8x128xf32> -> vector<8x128xf32>
      %89 = vector.extract_strided_slice %88 {offsets = [0, 0], sizes = [8, 64], strides = [1, 1]} : vector<8x128xf32> to vector<8x64xf32>
      %90 = vector.extract_strided_slice %88 {offsets = [0, 64], sizes = [8, 64], strides = [1, 1]} : vector<8x128xf32> to vector<8x64xf32>
      %91 = arith.negf %89 : vector<8x64xf32>
      %92 = math.exp %91 : vector<8x64xf32>
      %cst_43 = arith.constant 1.000000e+00 : f32
      %93 = vector.broadcast %cst_43 : f32 to vector<8x64xf32>
      %94 = arith.addf %93, %92 : vector<8x64xf32>
      %95 = arith.divf %93, %94 : vector<8x64xf32>
      %96 = arith.mulf %95, %89 : vector<8x64xf32>
      %97 = arith.mulf %96, %90 : vector<8x64xf32>
      %98 = arith.truncf %97 : vector<8x64xf32> to vector<8x64xbf16>
      %c0_44 = arith.constant 0 : index
      %c0_45 = arith.constant 0 : index
      %99 = vector.load %arg9[%c0_44, %c0_45] : memref<64x32xbf16, #tpu.memory_space<vmem>>, vector<64x32xbf16>
      %cst_46 = arith.constant dense<0.000000e+00> : vector<8x32xf32>
      %100 = tpu.matmul %98, %99, %cst_46 {dimension_numbers = #tpu.dot_dimension_numbers<[1], [0], [0], [1], [0, 0, 1, 1], [], []>} : vector<8x64xbf16>, vector<64x32xbf16>, vector<8x32xf32> -> vector<8x32xf32>
      %101 = arith.addf %72, %100 : vector<8x32xf32>
      %c0_47 = arith.constant 0 : index
      %c0_48 = arith.constant 0 : index
      %c0_49 = arith.constant 0 : index
      %102 = vector.load %arg16[%c0_47, %c0_48, %c0_49] : memref<1x8x32xf32, #tpu.memory_space<vmem>>, vector<1x8x32xf32>
      %103 = vector.shape_cast %102 : vector<1x8x32xf32> to vector<8x32xf32>
      %104 = vector.shape_cast %101 : vector<8x32xf32> to vector<1x8x32xf32>
      tpu.vector_store %arg16[%c0_47, %c0_48, %c0_49], %104 {strides = array<i32>} : memref<1x8x32xf32, #tpu.memory_space<vmem>>, vector<1x8x32xf32>,
    } else {
    }
    return
  }
  func.func @transform_0(%arg0: i32, %arg1: i32, %arg2: i32) -> (i32, i32, i32) {
    %c0_i32 = arith.constant 0 : i32
    %c0_i32_0 = arith.constant 0 : i32
    return %arg0, %arg1, %c0_i32 : i32, i32, i32
  }
  func.func @transform_1(%arg0: i32, %arg1: i32, %arg2: i32) -> (i32, i32, i32) {
    %c0_i32 = arith.constant 0 : i32
    %c0_i32_0 = arith.constant 0 : i32
    return %arg0, %arg2, %c0_i32 : i32, i32, i32
  }
  func.func @transform_2(%arg0: i32, %arg1: i32, %arg2: i32) -> (i32, i32) {
    %c0_i32 = arith.constant 0 : i32
    %c0_i32_0 = arith.constant 0 : i32
    %c0_i32_1 = arith.constant 0 : i32
    return %c0_i32, %c0_i32_0 : i32, i32
  }
  func.func @transform_3(%arg0: i32, %arg1: i32, %arg2: i32) -> (i32, i32) {
    %c0_i32 = arith.constant 0 : i32
    %c0_i32_0 = arith.constant 0 : i32
    %c0_i32_1 = arith.constant 0 : i32
    return %c0_i32, %c0_i32_0 : i32, i32
  }
  func.func @transform_4(%arg0: i32, %arg1: i32, %arg2: i32) -> (i32, i32, i32) {
    %c0_i32 = arith.constant 0 : i32
    %c0_i32_0 = arith.constant 0 : i32
    %c0_i32_1 = arith.constant 0 : i32
    %c0_i32_2 = arith.constant 0 : i32
    return %c0_i32, %c0_i32_0, %c0_i32_1 : i32, i32, i32
  }
  func.func @transform_5(%arg0: i32, %arg1: i32, %arg2: i32) -> (i32, i32) {
    %c0_i32 = arith.constant 0 : i32
    %c0_i32_0 = arith.constant 0 : i32
    %c0_i32_1 = arith.constant 0 : i32
    return %c0_i32, %c0_i32_0 : i32, i32
  }
  func.func @transform_6(%arg0: i32, %arg1: i32, %arg2: i32) -> (i32, i32) {
    %c0_i32 = arith.constant 0 : i32
    %c0_i32_0 = arith.constant 0 : i32
    %c0_i32_1 = arith.constant 0 : i32
    return %c0_i32, %c0_i32_0 : i32, i32
  }
  func.func @transform_7(%arg0: i32, %arg1: i32, %arg2: i32) -> (i32, i32) {
    %c0_i32 = arith.constant 0 : i32
    %c0_i32_0 = arith.constant 0 : i32
    %c0_i32_1 = arith.constant 0 : i32
    return %c0_i32, %c0_i32_0 : i32, i32
  }
  func.func @transform_8(%arg0: i32, %arg1: i32, %arg2: i32) -> (i32, i32) {
    %c0_i32 = arith.constant 0 : i32
    %c0_i32_0 = arith.constant 0 : i32
    %c0_i32_1 = arith.constant 0 : i32
    return %c0_i32, %c0_i32_0 : i32, i32
  }
  func.func @transform_9(%arg0: i32, %arg1: i32, %arg2: i32) -> (i32, i32) {
    %c0_i32 = arith.constant 0 : i32
    %c0_i32_0 = arith.constant 0 : i32
    return %arg1, %c0_i32 : i32, i32
  }
  func.func @transform_10(%arg0: i32, %arg1: i32, %arg2: i32) -> (i32, i32) {
    %c0_i32 = arith.constant 0 : i32
    %c0_i32_0 = arith.constant 0 : i32
    return %arg1, %c0_i32 : i32, i32
  }
  func.func @transform_11(%arg0: i32, %arg1: i32, %arg2: i32) -> (i32, i32) {
    %c0_i32 = arith.constant 0 : i32
    %c0_i32_0 = arith.constant 0 : i32
    return %arg2, %c0_i32 : i32, i32
  }
  func.func @transform_12(%arg0: i32, %arg1: i32, %arg2: i32) -> (i32, i32) {
    %c0_i32 = arith.constant 0 : i32
    %c0_i32_0 = arith.constant 0 : i32
    return %arg2, %c0_i32 : i32, i32
  }
  func.func @transform_13(%arg0: i32, %arg1: i32, %arg2: i32) -> (i32, i32, i32) {
    %c0_i32 = arith.constant 0 : i32
    %c0_i32_0 = arith.constant 0 : i32
    return %arg0, %arg1, %c0_i32 : i32, i32, i32
  }
}

</mosaic_0001>

<bundles_post_ra>
// kernel: tpu_custom_call.1
= control target key start
LH: loop header
LB: loop body
LE: loop exit
PB: predicated region body
PF: predicated region fallthrough
CT: control target
= control target key end

     0   :  { %s4231_s0 = inlined_call_operand.hbm [shape: f32[2,8,32], index: 0, kind: input, shape index: {}]   ;;  %s4232_s1 = inlined_call_operand.hbm [shape: f32[2,8,32], index: 1, kind: input, shape index: {}]   ;;  %s4233_s2 = inlined_call_operand.hbm [shape: bf16[32,32], index: 2, kind: input, shape index: {}]   ;;  %s4234_s3 = inlined_call_operand.hbm [shape: bf16[32,64], index: 3, kind: input, shape index: {}]   ;;  %s4235_s4 = inlined_call_operand.hbm [shape: bf16[4,8,32], index: 4, kind: input, shape index: {}]   ;;  %s4236_s5 = inlined_call_operand.hbm [shape: bf16[32,128], index: 5, kind: input, shape index: {}]   ;;  %s4237_s6 = inlined_call_operand.hbm [shape: bf16[64,32], index: 6, kind: input, shape index: {}]   ;;  %s4238_s7 = inlined_call_operand.hbm [shape: f32[1,32], index: 7, kind: input, shape index: {}]   ;;  %s4239_s8 = inlined_call_operand.hbm [shape: f32[1,32], index: 8, kind: input, shape index: {}]   ;;  %s4240_s9 = inlined_call_operand.hbm [shape: f32[8,4], index: 9, kind: input, shape index: {}]   ;;  %s4241_s10 = inlined_call_operand.hbm [shape: f32[8,4], index: 10, kind: input, shape index: {}]   ;;  %s4242_s11 = inlined_call_operand.hbm [shape: f32[8,4], index: 11, kind: input, shape index: {}]   ;;  %s4243_s12 = inlined_call_operand.hbm [shape: f32[8,4], index: 12, kind: input, shape index: {}]   ;;  %s4244_s13 = inlined_call_operand.hbm [shape: f32[2,8,32], index: 13, kind: output, shape index: {}]  }
   0x1   :  { %4256 = sst [smem:[#allocation43_spill]] %s4231_s0 }
   0x2   :  { %4257 = sst [smem:[#allocation44_spill]] %s4232_s1 }
   0x3   :  { %4258 = sst [smem:[#allocation45_spill]] %s4233_s2 }
   0x4   :  { %4259 = sst [smem:[#allocation46_spill]] %s4234_s3 }
   0x5   :  { %4260 = sst [smem:[#allocation47_spill]] %s4235_s4 }
   0x6   :  { %4261 = sst [smem:[#allocation48_spill]] %s4236_s5 }
   0x7   :  { %4262 = sst [smem:[#allocation49_spill]] %s4237_s6 }
   0x8   :  { %4263 = sst [smem:[#allocation50_spill]] %s4238_s7 }
   0x9   :  { %4264 = sst [smem:[#allocation51_spill]] %s4239_s8 }
   0xa   :  { %4265 = sst [smem:[#allocation52_spill]] %s4244_s13 }
   0xb   :  { %18 = vsyncpa [#allocation9], 0 }
   0xc   :  { %20 = vsyncpa [#allocation9 + $0x1], 0 }
   0xd   :  { %21 = vsyncpa [#allocation12], 0 }
   0xe   :  { %23 = vsyncpa [#allocation12 + $0x1], 0 }
   0xf   :  { %24 = vsyncpa [#allocation15], 0 }
  0x10   :  { %25 = vsyncpa [#allocation18], 0 }
  0x11   :  { %26 = vsyncpa [#allocation21], 0 }
  0x12   :  { %27 = vsyncpa [#allocation24], 0 }
  0x13   :  { %28 = vsyncpa [#allocation27], 0 }
  0x14   :  { %29 = vsyncpa [#allocation10], 0 }
  0x15   :  { %31 = vsyncpa [#allocation10 + $0x1], 0  ;;  %s3435_s25 = smov 0   ;;  %s3437_s26 = smov 0  }
  0x16   :  { %s3439_s27 = smov 0   ;;  %s3441_s28 = smov 0  }
  0x17   :  { %s3443_s29 = smov 0   ;;  %s3445_s30 = smov 0  }
  0x18 LB: > { %4266 = sst [smem:[#allocation39_spill]] %s3307_s25  ;;  %s3466_s14 = sadd.s32 4294967295, %s3327_s30   ;;  %s3327_s30 = sphi %s3445_s30, %s37_s30   ;;  %s3323_s29 = sphi %s3443_s29, %s4318_s29   ;;  %s3319_s28 = sphi %s3441_s28, %s4317_s28   ;;  %s3315_s27 = sphi %s3439_s27, %s4316_s27   ;;  %s3311_s26 = sphi %s3437_s26, %s4315_s26   ;;  %s3307_s25 = sphi %s3435_s25, %s4314_s25  }
  0x19   : > { %4267 = sst [smem:[#allocation40_spill]] %s3319_s28  ;;  %p2391_p0 = scmp.ge.s32.totalorder %s3327_s30, 1 }
  0x1a   : > { %4268 = sst [smem:[#allocation41_spill]] %s3466_s14  ;;  %p4252_p1 = scmp.eq.s32.totalorder %s3466_s14, 0 }
  0x1b   : > { %p396_p2 = scmp.lt.s32.totalorder %s3327_s30, 3  ;;  %s3329_s16 = smov [#allocation13]  }
  0x1c   : > { %s408_s17 = sshll.u32 %s3329_s16, 4  ;;  %s3330_s19 = smov [#allocation14]   ;;  %s3475_s17 = int_to_ptr.vmem [resolvable:$true] %s408_s17 }
  0x1d   : > { %p3471_p3 = pnand %p2391_p0, %p396_p2  ;;  %s421_s20 = sshll.u32 %s3330_s19, 4  ;;  %s3486_s20 = int_to_ptr.vmem [resolvable:$true] %s421_s20 }
  0x1e   : > { %s3331_s21 = smov [#allocation17]   ;;  %s4272_s2 = sld [smem:[#allocation45_spill]] }
  0x1f   : > { %s4269_s15 = scalar_select %p3471_p3, 1, 0 }
  0x20   : > { %p2653_p4 = pneg %p3471_p3  ;;  %s3488_s22 = sshll.u32 %s3331_s21, 4  ;;  %s448_s22 = int_to_ptr.vmem [resolvable:$true] %s3488_s22 }
  0x21   : > { %4270 = sst [smem:[#allocation42_spill]] %s4269_s15 }
  0x22   : > { %p3482_p6 = pnand %p2653_p4, %p4252_p1 }
  0x24   : > { %s2849_s16 = scalar_lea.hbm %s4272_s2, 256  ;;  %p3498_p8 = pneg %p3482_p6 }
  0x25   : > { %p2850_p7 = scmp.ne.s32.totalorder %s4272_s2, %s2849_s16  ;;  %p2856_p11 = scmp.lt.u32.totalorder %s2849_s16, %s4272_s2 }
  0x27   : > { %p2852_p9 = pnand %p3498_p8, %p2850_p7 }
  0x29   : > { %p2853_p10 = pneg %p2852_p9 }
  0x2b   : > { %p2858_p12 = pnand %p2856_p11, %p2853_p10 }
  0x2d   : > { %2861 = shalt.err (!%p2858_p12)
}
  0x2e   : > { %s2862_s13 = scalar_lea.vmem %s3475_s17, 256  ;;  %p2870_p4 = scmp.lt.s32.totalorder %s3475_s17, %s3475_s17 }
  0x2f   : > { %p2863_p13 = scmp.ne.s32.totalorder %s3475_s17, %s2862_s13  ;;  %p2871_p5 = scmp.lt.s32.totalorder %s2862_s13, %s2862_s13 }
  0x31   : > { %p2865_p0 = pnand %p2863_p13, %p3498_p8  ;;  %p2872_p7 = por %p2871_p5, %p2870_p4 }
  0x33   : > { %p2866_p2 = pneg %p2865_p0 }
  0x35   : > { %p2873_p9 = pnand %p2872_p7, %p2866_p2 }
  0x37   : > { %2876 = shalt.err (!%p2873_p9)
}
  0x38   : > { %s3332_s28 = smov 64   ;;  %s3333_s23 = smov 4  }
  0x39   : > { %2656 = dma.hbm_to_vmem [thread:$0]  (!%p3482_p6), %s4272_s2, 256, %s3475_s17, [#allocation12], %s3332_s28, %s3332_s28, %s3333_s23  }
  0x3a   : > { %s4274_s3 = sld [smem:[#allocation46_spill]] }
  0x40   : > { %s2877_s13 = scalar_lea.hbm %s4274_s3, 256 }
  0x41   : > { %p2878_p5 = scmp.ne.s32.totalorder %s4274_s3, %s2877_s13  ;;  %p2884_p12 = scmp.lt.u32.totalorder %s2877_s13, %s4274_s3 }
  0x43   : > { %p2880_p10 = pnand %p2878_p5, %p3498_p8 }
  0x45   : > { %p2881_p11 = pneg %p2880_p10 }
  0x47   : > { %p2886_p13 = pnand %p2884_p12, %p2881_p11 }
  0x49   : > { %2889 = shalt.err (!%p2886_p13)
}
  0x4a   : > { %s2890_s17 = scalar_lea.vmem %s3486_s20, 256  ;;  %p2898_p7 = scmp.lt.s32.totalorder %s3486_s20, %s3486_s20 }
  0x4b   : > { %p2891_p0 = scmp.ne.s32.totalorder %s3486_s20, %s2890_s17  ;;  %p2899_p9 = scmp.lt.s32.totalorder %s2890_s17, %s2890_s17 }
  0x4d   : > { %p2893_p2 = pnand %p2891_p0, %p3498_p8  ;;  %p2900_p5 = por %p2899_p9, %p2898_p7 }
  0x4f   : > { %p2894_p4 = pneg %p2893_p2 }
  0x51   : > { %p2901_p10 = pnand %p2900_p5, %p2894_p4 }
  0x53   : > { %2904 = shalt.err (!%p2901_p10)
}
  0x54   : > { %2659 = dma.hbm_to_vmem [thread:$0]  (!%p3482_p6), %s4274_s3, 256, %s3486_s20, [#allocation15], %s3332_s28, %s3332_s28, %s3333_s23  }
  0x55   : > { %s4275_s5 = sld [smem:[#allocation48_spill]] }
  0x5b   : > { %s2905_s24 = scalar_lea.hbm %s4275_s5, 256 }
  0x5c   : > { %p2906_p11 = scmp.ne.s32.totalorder %s4275_s5, %s2905_s24  ;;  %p2912_p0 = scmp.lt.u32.totalorder %s2905_s24, %s4275_s5 }
  0x5e   : > { %p2908_p12 = pnand %p2906_p11, %p3498_p8 }
  0x60   : > { %p2909_p13 = pneg %p2908_p12 }
  0x62   : > { %p2914_p2 = pnand %p2912_p0, %p2909_p13 }
  0x64   : > { %2917 = shalt.err (!%p2914_p2)
}
  0x65   : > { %s2918_s17 = scalar_lea.vmem %s448_s22, 256  ;;  %p2926_p5 = scmp.lt.s32.totalorder %s448_s22, %s448_s22 }
  0x66   : > { %p2919_p4 = scmp.ne.s32.totalorder %s448_s22, %s2918_s17  ;;  %p2927_p10 = scmp.lt.s32.totalorder %s2918_s17, %s2918_s17 }
  0x68   : > { %p2921_p7 = pnand %p2919_p4, %p3498_p8  ;;  %p2928_p1 = por %p2927_p10, %p2926_p5 }
  0x6a   : > { %p2922_p9 = pneg %p2921_p7 }
  0x6c   : > { %p2929_p3 = pnand %p2928_p1, %p2922_p9 }
  0x6e   : > { %2932 = shalt.err (!%p2929_p3)
}
  0x6f   : > { %2665 = dma.hbm_to_vmem [thread:$0]  (!%p3482_p6), %s4275_s5, 256, %s448_s22, [#allocation18], %s3332_s28, %s3332_s28, %s3333_s23  }
  0x70   : > { %s3334_s1 = smov [#allocation20]   ;;  %s3335_s14 = smov [#allocation23]  }
  0x71   : > { %s474_s25 = sshll.u32 %s3334_s1, 4  ;;  %s498_s24 = sshll.u32 %s3335_s14, 4  ;;  %s475_s25 = int_to_ptr.vmem [resolvable:$true] %s474_s25  ;;  %s499_s24 = int_to_ptr.vmem [resolvable:$true] %s498_s24 }
  0x72   : > { %s4276_s7 = sld [smem:[#allocation50_spill]] }
  0x78   : > { %s2933_s21 = scalar_lea.hbm %s4276_s7, 16 }
  0x79   : > { %p2934_p1 = scmp.ne.s32.totalorder %s4276_s7, %s2933_s21  ;;  %p2940_p12 = scmp.lt.u32.totalorder %s2933_s21, %s4276_s7 }
  0x7b   : > { %p2936_p3 = pnand %p2934_p1, %p3498_p8 }
  0x7d   : > { %p2937_p11 = pneg %p2936_p3 }
  0x7f   : > { %p2942_p13 = pnand %p2940_p12, %p2937_p11 }
  0x81   : > { %2945 = shalt.err (!%p2942_p13)
}
  0x82   : > { %s2946_s22 = scalar_lea.vmem %s475_s25, 16  ;;  %s2953_s0 = scalar_lea.vmem %s475_s25, 32 }
  0x83   : > { %p2947_p0 = scmp.ne.s32.totalorder %s475_s25, %s2946_s22  ;;  %p2954_p7 = scmp.lt.s32.totalorder %s475_s25, %s475_s25 }
  0x84   : > { %p2955_p9 = scmp.lt.s32.totalorder %s2953_s0, %s2946_s22 }
  0x85   : > { %p2949_p2 = pnand %p2947_p0, %p3498_p8 }
  0x86   : > { %p2956_p5 = por %p2955_p9, %p2954_p7 }
  0x87   : > { %p2950_p4 = pneg %p2949_p2 }
  0x89   : > { %p2957_p10 = pnand %p2956_p5, %p2950_p4 }
  0x8b   : > { %2960 = shalt.err (!%p2957_p10)
}
  0x8c   : > { %2671 = dma.hbm_to_vmem [thread:$0]  (!%p3482_p6), %s4276_s7, 16, %s475_s25, [#allocation21]  }
  0x8d   : > { %s2961_s19 = scalar_lea.hbm %s4240_s9, 128 }
  0x8e   : > { %p2962_p1 = scmp.ne.s32.totalorder %s4240_s9, %s2961_s19  ;;  %p2968_p12 = scmp.lt.u32.totalorder %s2961_s19, %s4240_s9 }
  0x90   : > { %p2964_p3 = pnand %p2962_p1, %p3498_p8 }
  0x92   : > { %p2965_p11 = pneg %p2964_p3 }
  0x94   : > { %p2970_p13 = pnand %p2968_p12, %p2965_p11 }
  0x96   : > { %2973 = shalt.err (!%p2970_p13)
}
  0x97   : > { %s2974_s22 = scalar_lea.vmem %s499_s24, 128  ;;  %p2982_p7 = scmp.lt.s32.totalorder %s499_s24, %s499_s24 }
  0x98   : > { %p2975_p0 = scmp.ne.s32.totalorder %s499_s24, %s2974_s22  ;;  %p2983_p9 = scmp.lt.s32.totalorder %s2974_s22, %s2974_s22 }
  0x9a   : > { %p2977_p2 = pnand %p2975_p0, %p3498_p8  ;;  %p2984_p5 = por %p2983_p9, %p2982_p7 }
  0x9c   : > { %p2978_p4 = pneg %p2977_p2 }
  0x9e   : > { %p2985_p10 = pnand %p2984_p5, %p2978_p4 }
  0xa0   : > { %2988 = shalt.err (!%p2985_p10)
}
  0xa1   : > { %2677 = dma.hbm_to_vmem [thread:$0]  (!%p3482_p6), %s4240_s9, 128, %s499_s24, [#allocation24]  }
  0xa2   : > { %s3336_s1 = smov [#allocation26]   ;;  %s3337_s2 = smov [#allocation16]  }
  0xa3   : > { %s524_s14 = sshll.u32 %s3336_s1, 4  ;;  %s434_s16 = sshll.u32 %s3337_s2, 4  ;;  %s525_s14 = int_to_ptr.vmem [resolvable:$true] %s524_s14  ;;  %s435_s16 = int_to_ptr.vmem [resolvable:$true] %s434_s16 }
  0xa4   : > { %s2989_s13 = scalar_lea.hbm %s4242_s11, 128 }
  0xa5   : > { %p2990_p1 = scmp.ne.s32.totalorder %s4242_s11, %s2989_s13  ;;  %p2996_p12 = scmp.lt.u32.totalorder %s2989_s13, %s4242_s11 }
  0xa7   : > { %p2992_p3 = pnand %p2990_p1, %p3498_p8 }
  0xa9   : > { %p2993_p11 = pneg %p2992_p3 }
  0xab   : > { %p2998_p13 = pnand %p2996_p12, %p2993_p11 }
  0xad   : > { %3001 = shalt.err (!%p2998_p13)
}
  0xae   : > { %s3002_s24 = scalar_lea.vmem %s525_s14, 128  ;;  %p3010_p7 = scmp.lt.s32.totalorder %s525_s14, %s525_s14 }
  0xaf   : > { %p3003_p0 = scmp.ne.s32.totalorder %s525_s14, %s3002_s24  ;;  %p3011_p9 = scmp.lt.s32.totalorder %s3002_s24, %s3002_s24 }
  0xb1   : > { %p3005_p2 = pnand %p3003_p0, %p3498_p8  ;;  %p3012_p5 = por %p3011_p9, %p3010_p7 }
  0xb3   : > { %p3006_p4 = pneg %p3005_p2 }
  0xb5   : > { %p3013_p10 = pnand %p3012_p5, %p3006_p4 }
  0xb7   : > { %3016 = shalt.err (!%p3013_p10)
}
  0xb8   : > { %2683 = dma.hbm_to_vmem [thread:$0]  (!%p3482_p6), %s4242_s11, 128, %s525_s14, [#allocation27]  }
  0xb9   : > { %s4277_s4 = sld [smem:[#allocation47_spill]] }
  0xbf   : > { %s3017_s21 = scalar_lea.hbm %s4277_s4, 256 }
  0xc0   : > { %p3018_p1 = scmp.ne.s32.totalorder %s4277_s4, %s3017_s21  ;;  %p3024_p12 = scmp.lt.u32.totalorder %s3017_s21, %s4277_s4 }
  0xc2   : > { %p3020_p3 = pnand %p3018_p1, %p3498_p8 }
  0xc4   : > { %p3021_p11 = pneg %p3020_p3 }
  0xc6   : > { %p3026_p13 = pnand %p3024_p12, %p3021_p11 }
  0xc8   : > { %3029 = shalt.err (!%p3026_p13)
}
  0xc9   : > { %s3030_s25 = scalar_lea.vmem %s435_s16, 256  ;;  %p3038_p7 = scmp.lt.s32.totalorder %s435_s16, %s435_s16 }
  0xca   : > { %p3031_p0 = scmp.ne.s32.totalorder %s435_s16, %s3030_s25  ;;  %p3039_p9 = scmp.lt.s32.totalorder %s3030_s25, %s3030_s25 }
  0xcc   : > { %p3033_p2 = pnand %p3031_p0, %p3498_p8  ;;  %p3040_p5 = por %p3039_p9, %p3038_p7 }
  0xce   : > { %p3034_p4 = pneg %p3033_p2 }
  0xd0   : > { %p3041_p10 = pnand %p3040_p5, %p3034_p4 }
  0xd2   : > { %3044 = shalt.err (!%p3041_p10)
}
  0xd3   : > { %2662 = dma.hbm_to_vmem [thread:$0]  (!%p3482_p6), %s4277_s4, 256, %s435_s16, [#allocation15], %s3332_s28, %s3332_s28, %s3333_s23  }
  0xd4   : > { %s3338_s0 = smov [#allocation19]   ;;  %s3339_s2 = smov [#allocation22]  }
  0xd5   : > { %s460_s1 = sshll.u32 %s3338_s0, 4  ;;  %s485_s19 = sshll.u32 %s3339_s2, 4  ;;  %s461_s1 = int_to_ptr.vmem [resolvable:$true] %s460_s1  ;;  %s486_s19 = int_to_ptr.vmem [resolvable:$true] %s485_s19 }
  0xd6   : > { %s4278_s6 = sld [smem:[#allocation49_spill]] }
  0xdc   : > { %s3045_s17 = scalar_lea.hbm %s4278_s6, 512 }
  0xdd   : > { %p3046_p1 = scmp.ne.s32.totalorder %s4278_s6, %s3045_s17  ;;  %p3052_p12 = scmp.lt.u32.totalorder %s3045_s17, %s4278_s6 }
  0xdf   : > { %p3048_p3 = pnand %p3046_p1, %p3498_p8 }
  0xe1   : > { %p3049_p11 = pneg %p3048_p3 }
  0xe3   : > { %p3054_p13 = pnand %p3052_p12, %p3049_p11 }
  0xe5   : > { %3057 = shalt.err (!%p3054_p13)
}
  0xe6   : > { %s3058_s16 = scalar_lea.vmem %s461_s1, 512  ;;  %p3066_p7 = scmp.lt.s32.totalorder %s461_s1, %s461_s1 }
  0xe7   : > { %p3059_p0 = scmp.ne.s32.totalorder %s461_s1, %s3058_s16  ;;  %p3067_p9 = scmp.lt.s32.totalorder %s3058_s16, %s3058_s16 }
  0xe9   : > { %p3061_p2 = pnand %p3059_p0, %p3498_p8  ;;  %p3068_p5 = por %p3067_p9, %p3066_p7 }
  0xeb   : > { %p3062_p4 = pneg %p3061_p2 }
  0xed   : > { %p3069_p10 = pnand %p3068_p5, %p3062_p4 }
  0xef   : > { %3072 = shalt.err (!%p3069_p10)
}
  0xf0   : > { %2668 = dma.hbm_to_vmem [thread:$0]  (!%p3482_p6), %s4278_s6, 512, %s461_s1, [#allocation18], %s3332_s28, %s3332_s28, %s3333_s23  }
  0xf1   : > { %s4279_s8 = sld [smem:[#allocation51_spill]] }
  0xf7   : > { %s3073_s13 = scalar_lea.hbm %s4279_s8, 16 }
  0xf8   : > { %p3074_p1 = scmp.ne.s32.totalorder %s4279_s8, %s3073_s13  ;;  %p3080_p12 = scmp.lt.u32.totalorder %s3073_s13, %s4279_s8 }
  0xfa   : > { %p3076_p3 = pnand %p3074_p1, %p3498_p8 }
  0xfc   : > { %p3077_p11 = pneg %p3076_p3 }
  0xfe   : > { %p3082_p13 = pnand %p3080_p12, %p3077_p11 }
 0x100   : > { %3085 = shalt.err (!%p3082_p13)
}
 0x101   : > { %s3086_s14 = scalar_lea.vmem %s486_s19, 16  ;;  %s3093_s28 = scalar_lea.vmem %s486_s19, 32 }
 0x102   : > { %p3087_p0 = scmp.ne.s32.totalorder %s486_s19, %s3086_s14  ;;  %p3094_p7 = scmp.lt.s32.totalorder %s486_s19, %s486_s19 }
 0x103   : > { %p3095_p9 = scmp.lt.s32.totalorder %s3093_s28, %s3086_s14 }
 0x104   : > { %p3089_p2 = pnand %p3087_p0, %p3498_p8 }
 0x105   : > { %p3096_p5 = por %p3095_p9, %p3094_p7 }
 0x106   : > { %p3090_p4 = pneg %p3089_p2 }
 0x108   : > { %p3097_p10 = pnand %p3096_p5, %p3090_p4 }
 0x10a   : > { %3100 = shalt.err (!%p3097_p10)
}
 0x10b   : > { %2674 = dma.hbm_to_vmem [thread:$0]  (!%p3482_p6), %s4279_s8, 16, %s486_s19, [#allocation21]  }
 0x10c   : > { %s3340_s16 = smov [#allocation25]   ;;  %s3341_s0 = smov [#allocation28]  }
 0x10d   : > { %s511_s24 = sshll.u32 %s3340_s16, 4  ;;  %s537_s2 = sshll.u32 %s3341_s0, 4  ;;  %s512_s24 = int_to_ptr.vmem [resolvable:$true] %s511_s24  ;;  %s538_s2 = int_to_ptr.vmem [resolvable:$true] %s537_s2 }
 0x10e   : > { %s3101_s17 = scalar_lea.hbm %s4241_s10, 128 }
 0x10f   : > { %p3102_p1 = scmp.ne.s32.totalorder %s4241_s10, %s3101_s17  ;;  %p3108_p12 = scmp.lt.u32.totalorder %s3101_s17, %s4241_s10 }
 0x111   : > { %p3104_p3 = pnand %p3102_p1, %p3498_p8 }
 0x113   : > { %p3105_p11 = pneg %p3104_p3 }
 0x115   : > { %p3110_p13 = pnand %p3108_p12, %p3105_p11 }
 0x117   : > { %3113 = shalt.err (!%p3110_p13)
}
 0x118   : > { %s3114_s19 = scalar_lea.vmem %s512_s24, 128  ;;  %p3122_p7 = scmp.lt.s32.totalorder %s512_s24, %s512_s24 }
 0x119   : > { %p3115_p0 = scmp.ne.s32.totalorder %s512_s24, %s3114_s19  ;;  %p3123_p9 = scmp.lt.s32.totalorder %s3114_s19, %s3114_s19 }
 0x11b   : > { %p3117_p2 = pnand %p3115_p0, %p3498_p8  ;;  %p3124_p5 = por %p3123_p9, %p3122_p7 }
 0x11d   : > { %p3118_p4 = pneg %p3117_p2 }
 0x11f   : > { %p3125_p10 = pnand %p3124_p5, %p3118_p4 }
 0x121   : > { %3128 = shalt.err (!%p3125_p10)
}
 0x122   : > { %2680 = dma.hbm_to_vmem [thread:$0]  (!%p3482_p6), %s4241_s10, 128, %s512_s24, [#allocation24]  }
 0x123   : > { %s3129_s0 = scalar_lea.hbm %s4243_s12, 128 }
 0x124   : > { %p3130_p1 = scmp.ne.s32.totalorder %s4243_s12, %s3129_s0  ;;  %p3136_p12 = scmp.lt.u32.totalorder %s3129_s0, %s4243_s12 }
 0x126   : > { %p3132_p3 = pnand %p3130_p1, %p3498_p8 }
 0x128   : > { %p3133_p11 = pneg %p3132_p3 }
 0x12a   : > { %p3138_p13 = pnand %p3136_p12, %p3133_p11 }
 0x12c   : > { %3141 = shalt.err (!%p3138_p13)
}
 0x12d   : > { %s3142_s22 = scalar_lea.vmem %s538_s2, 128  ;;  %p3150_p7 = scmp.lt.s32.totalorder %s538_s2, %s538_s2 }
 0x12e   : > { %p3143_p0 = scmp.ne.s32.totalorder %s538_s2, %s3142_s22  ;;  %p3151_p9 = scmp.lt.s32.totalorder %s3142_s22, %s3142_s22 }
 0x130   : > { %p3145_p2 = pnand %p3143_p0, %p3498_p8  ;;  %p3152_p5 = por %p3151_p9, %p3150_p7 }
 0x132   : > { %p3146_p4 = pneg %p3145_p2 }
 0x134   : > { %p3153_p10 = pnand %p3152_p5, %p3146_p4 }
 0x136   : > { %3156 = shalt.err (!%p3153_p10)
}
 0x137   : > { %s4280_s14 = sld [smem:[#allocation39_spill]]  ;;  %s4281_s15 = sld [smem:[#allocation41_spill]] }
 0x138   : > { %2686 = dma.hbm_to_vmem [thread:$0]  (!%p3482_p6), %s4243_s12, 128, %s538_s2, [#allocation27]  }
 0x139   : > { %s2390_s19 = sadd.s32 4294967294, %s3327_s30   ;;  %s56_s28 = sadd.s32 1, %s3323_s29 }
 0x13a   : > { %s65_s18 = sadd.s32 1, %s3315_s27  ;;  %p58_p8 = scmp.ge.s32.totalorder %s56_s28, 2 }
 0x13b   : > { %p72_p1 = scmp.ne.s32.totalorder %s3315_s27, %s3311_s26  ;;  %p73_p3 = scmp.eq.s32.totalorder %s3327_s30, 0 }
 0x13c   : > { %s4320_s28 = smov (%p58_p8, %s56_s28), 0  ;;  %p389_p4 = scmp.eq.s32.totalorder %s2390_s19, 1 }
 0x13d   : > { %p78_p11 = scmp.ne.s32.totalorder %s3311_s26, %s4280_s14  ;;  %p3730_p12 = por %p73_p3, %p72_p1 }
 0x13e   : > { %p4283_p13 = scmp.eq.s32.totalorder %s4281_s15, 0  ;;  %s60_s1 = ssub.s32 %s3323_s29, %s4320_s28 }
 0x13f   : > { %p383_p0 = scmp.eq.s32.totalorder %s4281_s15, 1  ;;  %p63_p2 = scmp.eq.s32.totalorder %s60_s1, 0 }
 0x140   : > { %p3736_p6 = por %p4283_p13, %p78_p11  ;;  %p2709_p9 = scmp.lt.s32.totalorder %s3327_s30, 2 }
 0x141   : > { %p3743_p7 = por %p383_p0, %p72_p1  ;;  %p3751_p5 = por %p389_p4, %p78_p11 }
 0x142   : > { %s4284_s2 = scalar_select %p3736_p6, 1, 0 }
 0x143   : > { %s4285_s16 = scalar_select %p3743_p7, 1, 0 }
 0x144   : > { %s3749_s0 = scalar_select %p63_p2, %s3315_s27, %s65_s18  }
 0x145   : > { %s4286_s21 = scalar_select %p3751_p5, 1, 0 }
 0x146   : > { %s548_s13 = sand.u32 1, %s3315_s27   ;;  %s2405_s20 = sshll.u32 %s3323_s29, 7 }
 0x147   : > { %s3756_s17 = sshll.u32 %s548_s13, 3  ;;  %s4287_s25 = sld [smem:[#allocation43_spill]] }
 0x148   : > { %s552_s19 = scalar_lea.vmem [#allocation8], %s3756_s17  ;;  %p3769_p10 = pnand %p2709_p9, %p3730_p12 }
 0x149   : > { %s560_s18 = sshll.u32 %s552_s19, 4  ;;  %s4290_s5 = sld [smem:[#allocation44_spill]]  ;;  %s3765_s18 = int_to_ptr.vmem [resolvable:$true] %s560_s18 }
 0x14a   : > { %s567_s24 = sand.u32 1, %s3327_s30   ;;  %p3159_p1 = pneg %p3769_p10 }
 0x14d   : > { %s4288_s14 = smov %s4287_s25  ;;  %s3762_s15 = scalar_lea.hbm %s4287_s25, %s2405_s20 }
 0x14e   : > { %s549_s25 = scalar_lea.sflag [#allocation9], %s548_s13  ;;  %s3157_s6 = scalar_lea.hbm %s3762_s15, 128 }
 0x14f   : > { %s3776_s22 = scalar_lea.hbm %s4290_s5, %s2405_s20  ;;  %p3158_p8 = scmp.ne.s32.totalorder %s3762_s15, %s3157_s6 }
 0x150   : > { %s3162_s7 = scalar_lea.hbm %s4288_s14, 256  ;;  %p3163_p12 = scmp.lt.u32.totalorder %s3762_s15, %s4288_s14 }
 0x151   : > { %p3160_p3 = pnand %p3159_p1, %p3158_p8  ;;  %p3164_p13 = scmp.lt.u32.totalorder %s3162_s7, %s3157_s6 }
 0x152   : > { %p3166_p2 = scmp.lt.u32.totalorder %s3157_s6, %s3762_s15 }
 0x153   : > { %p3161_p11 = pneg %p3160_p3  ;;  %p3165_p0 = por %p3164_p13, %p3163_p12 }
 0x155   : > { %p3167_p4 = por %p3166_p2, %p3165_p0 }
 0x157   : > { %p3168_p9 = pnand %p3167_p4, %p3161_p11 }
 0x159   : > { %3171 = shalt.err (!%p3168_p9)
}
 0x15a   : > { %s3172_s4 = scalar_lea.vmem %s3765_s18, 128  ;;  %s3342_s13 = smov [#allocation8]  }
 0x15b   : > { %p3173_p8 = scmp.ne.s32.totalorder %s3765_s18, %s3172_s4  ;;  %s3177_s20 = sshll.u32 %s3342_s13, 4  ;;  %s3178_s20 = int_to_ptr.vmem [resolvable:$false] %s3177_s20 }
 0x15c   : > { %s3179_s8 = scalar_lea.vmem %s3178_s20, 256  ;;  %p3180_p7 = scmp.lt.s32.totalorder %s3765_s18, %s3178_s20 }
 0x15d   : > { %p3175_p3 = pnand %p3173_p8, %p3159_p1  ;;  %p3181_p12 = scmp.lt.s32.totalorder %s3179_s8, %s3172_s4 }
 0x15f   : > { %p3176_p5 = pneg %p3175_p3  ;;  %p3182_p13 = por %p3181_p12, %p3180_p7 }
 0x161   : > { %p3183_p0 = pnand %p3182_p13, %p3176_p5 }
 0x163   : > { %3186 = shalt.err (!%p3183_p0)
}
 0x164   : > { %2690 = dma.hbm_to_vmem [thread:$0]  (!%p3769_p10), %s3762_s15, 128, %s3765_s18, %s549_s25  }
 0x165   : > { %s571_s6 = scalar_lea.vmem [#allocation11], %s3756_s17  ;;  %s568_s23 = scalar_lea.sflag [#allocation12], %s567_s24 }
 0x166   : > { %s579_s7 = sshll.u32 %s571_s6, 4  ;;  %s3187_s19 = scalar_lea.hbm %s3776_s22, 128  ;;  %s580_s7 = int_to_ptr.vmem [resolvable:$true] %s579_s7 }
 0x167   : > { %p3188_p7 = scmp.ne.s32.totalorder %s3776_s22, %s3187_s19  ;;  %s3192_s13 = scalar_lea.hbm %s4290_s5, 256 }
 0x168   : > { %p3193_p2 = scmp.lt.u32.totalorder %s3776_s22, %s4290_s5  ;;  %p3194_p4 = scmp.lt.u32.totalorder %s3192_s13, %s3187_s19 }
 0x169   : > { %p3190_p5 = pnand %p3188_p7, %p3159_p1  ;;  %p3196_p8 = scmp.lt.u32.totalorder %s3187_s19, %s3776_s22 }
 0x16a   : > { %p3195_p9 = por %p3194_p4, %p3193_p2 }
 0x16b   : > { %p3191_p11 = pneg %p3190_p5 }
 0x16c   : > { %p3197_p3 = por %p3196_p8, %p3195_p9 }
 0x16e   : > { %p3198_p12 = pnand %p3197_p3, %p3191_p11 }
 0x170   : > { %3201 = shalt.err (!%p3198_p12)
}
 0x171   : > { %s3202_s17 = scalar_lea.vmem %s580_s7, 128  ;;  %s3343_s15 = smov [#allocation11]  }
 0x172   : > { %p3203_p13 = scmp.ne.s32.totalorder %s580_s7, %s3202_s17  ;;  %s3207_s18 = sshll.u32 %s3343_s15, 4  ;;  %s3208_s18 = int_to_ptr.vmem [resolvable:$false] %s3207_s18 }
 0x173   : > { %s3209_s24 = scalar_lea.vmem %s3208_s18, 256  ;;  %p3210_p5 = scmp.lt.s32.totalorder %s580_s7, %s3208_s18 }
 0x174   : > { %p3205_p0 = pnand %p3203_p13, %p3159_p1  ;;  %p3211_p6 = scmp.lt.s32.totalorder %s3209_s24, %s3202_s17 }
 0x176   : > { %p3206_p7 = pneg %p3205_p0  ;;  %p3212_p2 = por %p3211_p6, %p3210_p5 }
 0x178   : > { %p3213_p4 = pnand %p3212_p2, %p3206_p7 }
 0x17a   : > { %3216 = shalt.err (!%p3213_p4)
}
 0x17b   : > { %2693 = dma.hbm_to_vmem [thread:$0]  (!%p3769_p10), %s3776_s22, 128, %s580_s7, %s568_s23  }
 0x17c   : > { %s4291_s25 = sld [smem:[#allocation42_spill]] }
 0x182   : > { %p4292_p11 = scmp.ne.s32.totalorder %s4291_s25, 0 }
 0x183   : > { %s3829_s6 = sand.u32 (!%p4292_p11), 1, %s3311_s26   ;;  %p4293_p6 = scmp.ne.s32.totalorder (!%p4292_p11), %s4284_s2, 0 }
 0x184   : > { %588 = sbr.rel (%p4292_p11) target bundleno = 2821 (0xb05), region = 72  ;;  %s3832_s19 = sshll.u32 (!%p4292_p11), %s3829_s6, 3 }
 0x185   : > { %s591_s3 = scalar_lea.sflag (!%p4292_p11), [#allocation9], %s3829_s6  ;;  %s594_s4 = scalar_lea.vmem (!%p4292_p11), [#allocation8], %s3832_s19 }
 0x18b   : > { %3270 = dma.done.wait (%p4293_p6), %s591_s3, 128  }
 0x18c   : > { %3272 = vsyncadd (%p4293_p6), %s591_s3, 4294967168  ;;  %s4294_s1 = sld [smem:[#allocation41_spill]]  ;;  %s603_s23 = scalar_lea.vmem [#allocation11], %s3832_s19 }
 0x192   : > { %s599_s22 = sand.u32 1, %s4294_s1  }
 0x193   : > { %s600_s7 = scalar_lea.sflag [#allocation12], %s599_s22 }
 0x194   : > { %3274 = dma.done.wait (%p4293_p6), %s600_s7, 128  }
 0x195   : > { %3276 = vsyncadd (%p4293_p6), %s600_s7, 4294967168  ;;  %p4295_p10 = scmp.eq.s32.totalorder %s4294_s1, 0 }
 0x197   : > { %3278 = dma.done.wait (%p4295_p10), [#allocation12], 256   ;;  %p4296_p1 = pmov %p4295_p10 }
 0x199   : > { %3280 = vsyncadd (%p4296_p1), [#allocation12], 4294967040  ;;  %p4297_p9 = pmov %p4296_p1 }
 0x19a   : > { %p4298_p8 = pmov %p4296_p1 }
 0x19b   : > { %3282 = dma.done.wait (%p4297_p9), [#allocation15], 512  }
 0x19c   : > { %3284 = vsyncadd (%p4298_p8), [#allocation15], 4294966784  ;;  %p4299_p3 = pmov %p4296_p1 }
 0x19d   : > { %p4300_p12 = pmov %p4296_p1 }
 0x19e   : > { %3286 = dma.done.wait (%p4299_p3), [#allocation18], 768  }
 0x19f   : > { %3288 = vsyncadd (%p4300_p12), [#allocation18], 4294966528  ;;  %p4301_p13 = pmov %p4296_p1 }
 0x1a0   : > { %p4302_p0 = pmov %p4296_p1 }
 0x1a1   : > { %3290 = dma.done.wait (%p4301_p13), [#allocation21], 32  }
 0x1a2   : > { %3292 = vsyncadd (%p4302_p0), [#allocation21], 4294967264  ;;  %p4303_p7 = pmov %p4302_p0 }
 0x1a3   : > { %p4304_p5 = pmov %p4302_p0 }
 0x1a4   : > { %3294 = dma.done.wait (%p4303_p7), [#allocation24], 256  }
 0x1a5   : > { %3296 = vsyncadd (%p4304_p5), [#allocation24], 4294967040  ;;  %p4305_p2 = pmov %p4302_p0 }
 0x1a6   : > { %p4306_p4 = pmov %p4302_p0 }
 0x1a7   : > { %3298 = dma.done.wait (%p4305_p2), [#allocation27], 256  }
 0x1a8   : > { %3300 = vsyncadd (%p4306_p4), [#allocation27], 4294967040  ;;  %vm703_vm0 = vcmask 261120   ;;  %v3870_v0 = vld [vmem:[%s603_s23] sm:$0xff]  ;;  %v3874_v1 = vld [vmem:[%s594_s4] sm:$0xff]  ;;  %v3344_v8 = vmov 0.0  }
 0x1a9   : > { %v946_v2 = vmul.f32 %v3870_v0, %v3870_v0  ;;  %v702_v3 = vmul.f32 %v3874_v1, %v3874_v1  ;;  %v2805_v6 = vld [vmem:[#allocation14] sm:$0xff]   ;;  %v2806_v7 = vld [vmem:[#allocation13] sm:$0xff]   ;;  %2503 = vmatprep.subr.bf16.mxu1 %v3344_v8  ;;  %2495 = vmatprep.subr.bf16.mxu0 %v3344_v8  ;;  %v2807_v9 = vld [vmem:[#allocation14 + $0x8] sm:$0xff]   ;;  %vm3345_vm1 = vmmov 0   ;;  %s3346_s2 = smov 12   ;;  %s3347_s13 = smov 8  }
 0x1aa   : > { %2504 = vmatpush3.bf16.msra.mxu1 %v2805_v6  ;;  %2496 = vmatpush3.bf16.msra.mxu0 %v2806_v7  ;;  %v2808_v10 = vld [vmem:[#allocation13 + $0x8] sm:$0xff]   ;;  %v3892_v11 = vld [vmem:[#allocation28] sm:$0xff]  ;;  %s3348_s20 = smov 24   ;;  %s3349_s8 = smov 20   ;;  %v3907_v13 = vld [vmem:[#allocation26] sm:$0xff]  ;;  %vm935_vm2 = vcmask 64512  }
 0x1ab   : > { %v948_v4 = vsel %vm703_vm0, %v946_v2, 0.0  ;;  %v704_v5 = vsel %vm703_vm0, %v702_v3, 0.0  ;;  %2505 = vmatprep.subr.bf16.mxu1 %v3344_v8  ;;  %2507 = vmatprep.mubr.msk.bf16.mxu1 %vm3345_vm1, %v3344_v8  ;;  %v3894_v12 = vld [vmem:[#allocation25] sm:$0xff]  ;;  %s3350_s17 = smov 4   ;;  %s3351_s15 = smov 16   ;;  %v3911_v14 = vld [vmem:[#allocation23] sm:$0xff] }
 0x1ac   : > { %949 = vadd.xlane.f32.xlu0 %v948_v4  ;;  %2497 = vmatprep.subr.bf16.mxu0 %v3344_v8  ;;  %s3352_s18 = smov 28   ;;  %v2427_v22 = vld [vmem:[#allocation20] ss:$0 sm:$0xff]  ;;  %s3353_s24 = smov 124   ;;  %936 = vst.msk [vmem:[#allocation7] sm:$0xff] %vm935_vm2, %v3344_v8  ;;  %937 = vst.msk [vmem:[#allocation7 + $0x8] sm:$0xff] %vm935_vm2, %v3344_v8 }
 0x1ad   : > { %2499 = vmatprep.mubr.msk.bf16.mxu0 %vm3345_vm1, %v3344_v8  ;;  %1061 = vrot.lane.b32.xlu1 %v3892_v11, %s3346_s2  ;;  %938 = vst.msk [vmem:[#allocation7 + $0x10] sm:$0xff] %vm935_vm2, %v3344_v8  ;;  %939 = vst.msk [vmem:[#allocation7 + $0x18] sm:$0xff] %vm935_vm2, %v3344_v8  ;;  %s3354_s25 = smov 120   ;;  %s3355_s3 = smov 112   ;;  %vm793_vm3 = vcmask 31744   ;;  %vm807_vm4 = vcmask 64544  }
 0x1ae   : > { %2506 = vmatpush3.bf16.msra.mxu1 %v2807_v9  ;;  %2498 = vmatpush3.bf16.msra.mxu0 %v2808_v10  ;;  %s3356_s1 = smov 104   ;;  %vm926_vm5 = vcmask 7168   ;;  %s3359_s22 = smov 96   ;;  %vm1282_vm7 = vcmask 1043456   ;;  %vm2109_vm8 = vcmask 523264  }
 0x1af   : > { %2517 = vmatprep.subr.bf16.mxu1 %v3344_v8  ;;  %2511 = vmatprep.subr.bf16.mxu0 %v3344_v8  ;;  %931 = vst.msk [vmem:[#allocation6] sm:$0xff] %vm926_vm5, %v3344_v8  ;;  %932 = vst.msk [vmem:[#allocation6 + $0x8] sm:$0xff] %vm926_vm5, %v3344_v8  ;;  %s3360_s7 = smov 88   ;;  %s3361_s23 = smov 80  }
 0x1b0   : > { %705 = vadd.xlane.f32.xlu0 %v704_v5  ;;  %933 = vst.msk [vmem:[#allocation6 + $0x10] sm:$0xff] %vm926_vm5, %v3344_v8  ;;  %934 = vst.msk [vmem:[#allocation6 + $0x18] sm:$0xff] %vm926_vm5, %v3344_v8  ;;  %p4309_p6 = scmp.ne.s32.totalorder %s4285_s16, 0 }
 0x1b1   : > { %1080 = vrot.lane.b32.xlu1 %v3892_v11, %s3347_s13 }
 0x1b5   : > { %833 = vrot.lane.b32.xlu1 %v3894_v12, %s3347_s13 }
 0x1b9   : > { %1103 = vrot.lane.b32.xlu1 %v3892_v11, %s3349_s8 }
 0x1bd   : > { %1122 = vrot.lane.b32.xlu1 %v3892_v11, %s3351_s15 }
 0x1c1   : > { %852 = vrot.lane.b32.xlu1 %v3894_v12, %s3349_s8 }
 0x1c5   : > { %872 = vrot.lane.b32.xlu1 %v3894_v12, %s3351_s15 }
 0x1c6   : > { %813 = vrot.lane.b32.xlu0 %v3894_v12, %s3346_s2 }
 0x1c9   : > { %1145 = vrot.lane.b32.xlu1 %v3892_v11, %s3352_s18 }
 0x1ca   : > { %1164 = vrot.lane.b32.xlu0 %v3892_v11, %s3348_s20 }
 0x1cd   : > { %891 = vrot.lane.b32.xlu1 %v3894_v12, %s3352_s18 }
 0x1ce   : > { %911 = vrot.lane.b32.xlu0 %v3894_v12, %s3348_s20 }
 0x1d1   : > { %1027 = vrot.lane.b32.xlu1 %v3892_v11, %s3350_s17 }
 0x1d2   : > { %783 = vrot.lane.b32.xlu0 %v3894_v12, %s3350_s17 }
 0x1d5   : > { %1057 = vrot.lane.b32.xlu1 %v3907_v13, %s3347_s13 }
 0x1d6   : > { %1076 = vrot.lane.b32.xlu0 %v3907_v13, %s3346_s2 }
 0x1d9   : > { %809 = vrot.lane.b32.xlu1 %v3911_v14, %s3347_s13  ;;  %s4307_s13 = sld [smem:[#allocation40_spill]] }
 0x1da   : > { %829 = vrot.lane.b32.xlu0 %v3911_v14, %s3346_s2  ;;  %s3362_s2 = smov 72  }
 0x1dd   : > { %848 = vrot.lane.b32.xlu1 %v3911_v14, %s3351_s15 }
 0x1de   : > { %1099 = vrot.lane.b32.xlu0 %v3907_v13, %s3351_s15 }
 0x1e2   : > { %1118 = vrot.lane.b32.xlu0 %v3907_v13, %s3349_s8 }
 0x1e6   : > { %868 = vrot.lane.b32.xlu0 %v3911_v14, %s3349_s8  ;;  %s694_s8 = scalar_lea.vmem [#allocation29], %s3832_s19 }
 0x21f   : > { %v1062_v30 = vpop.permute.xlu1 %1061 }
 0x223   : > { %v1081_v31 = vpop.permute.xlu1 %1080 }
 0x227   : > { %v834_v32 = vpop.permute.xlu1 %833 }
 0x22b   : > { %v1104_v33 = vpop.permute.xlu1 %1103 }
 0x22f   : > { %v1123_v34 = vpop.permute.xlu1 %1122 }
 0x233   : > { %v853_v42 = vpop.permute.xlu1 %852 }
 0x237   : > { %v873_v50 = vpop.permute.xlu1 %872 }
 0x239   : > { %v950_v15 = vpop.xlane.xlu0 %949 }
 0x23a   : > { %v952_v16 = vmul.f32 0.03125, %v950_v15 }
 0x23b   : > { %v1146_v53 = vpop.permute.xlu1 %1145 }
 0x23c   : > { %v953_v17 = vadd.f32 1e-05, %v952_v16 }
 0x23d   : > { %v706_v18 = vpop.xlane.xlu0 %705 }
 0x23e   : > { %2815 = vrsqrt.f32 %v953_v17  ;;  %v708_v19 = vmul.f32 0.03125, %v706_v18 }
 0x23f   : > { %v892_v57 = vpop.permute.xlu1 %891 }
 0x240   : > { %v709_v20 = vadd.f32 1e-05, %v708_v19 }
 0x241   : > { %v814_v40 = vpop.permute.xlu0 %813 }
 0x242   : > { %2817 = vrsqrt.f32 %v709_v20 }
 0x243   : > { %v1028_v61 = vpop.permute.xlu1 %1027 }
 0x245   : > { %v1165_v52 = vpop.permute.xlu0 %1164 }
 0x247   : > { %v1058_v6 = vpop.permute.xlu1 %1057 }
 0x248   : > { %v2816_v21 = vpop.eup %2815 }
 0x249   : > { %v955_v23 = vmul.f32 %v2816_v21, %v3870_v0  ;;  %v912_v58 = vpop.permute.xlu0 %911 }
 0x24b   : > { %v962_v24 = vmul.f32 %v2427_v22, %v955_v23  ;;  %v810_v9 = vpop.permute.xlu1 %809 }
 0x24c   : > { %v2818_v25 = vpop.eup %2817 }
 0x24d   : > { %v963_v26 = vpack.c.bf16 %v962_v24, %v962_v24  ;;  %v711_v27 = vmul.f32 %v2818_v25, %v3874_v1  ;;  %v784_v2 = vpop.permute.xlu0 %783 }
 0x24f   : > { %2508 = vmatmul.mubr.msk.bf16.vlgmr.msra.gmra.mrb[0].mxu1 %vm703_vm0, %v963_v26  ;;  %v718_v28 = vmul.f32 %v2427_v22, %v711_v27 }
 0x250   : > { %2519 = vmatprep.mubr.msk.bf16.mxu1 %vm3345_vm1, %v3344_v8 }
 0x251   : > { %v719_v29 = vpack.c.bf16 %v718_v28, %v718_v28  ;;  %v1077_v4 = vpop.permute.xlu0 %1076 }
 0x253   : > { %2500 = vmatmul.mubr.msk.bf16.vlgmr.msra.gmra.mrb[0].mxu0 %vm703_vm0, %v719_v29 }
 0x254   : > { %2513 = vmatprep.mubr.msk.bf16.mxu0 %vm3345_vm1, %v3344_v8 }
 0x255   : > { %v830_v5 = vpop.permute.xlu0 %829 }
 0x259   : > { %v1100_v7 = vpop.permute.xlu0 %1099 }
 0x25d   : > { %v1119_v10 = vpop.permute.xlu0 %1118 }
 0x261   : > { %v869_v15 = vpop.permute.xlu0 %868 }
 0x322   : > { %v3936_v35 = vpop.f32.mrb[0].mxu1 }
 0x323   : > { %v2509_v36 = vpop.f32.mrb[1].mxu1  ;;  %v1064_v37 = vmul.f32 %v1062_v30, %v3936_v35  ;;  %v1083_v38 = vmul.f32 %v1081_v31, %v3936_v35  ;;  %v1125_v48 = vmul.f32 %v1123_v34, %v3936_v35  ;;  %v1106_v51 = vmul.f32 %v1104_v33, %v3936_v35 }
 0x324   : > { %v1020_v39 = vpop.f32.mrb[2].mxu1  ;;  %v1167_v55 = vmul.f32 %v1165_v52, %v3936_v35  ;;  %v1148_v59 = vmul.f32 %v1146_v53, %v3936_v35  ;;  %v1030_v62 = vmul.f32 %v1028_v61, %v3936_v35  ;;  %v1043_v1 = vmul.f32 %v3892_v11, %v3936_v35 }
 0x325   : > { %v2510_v41 = vpop.f32.mrb[3].mxu1  ;;  %1066 = vrot.lane.b32.xlu1 %v1064_v37, %s3353_s24  ;;  %1085 = vrot.lane.b32.xlu0 %v1083_v38, %s3350_s17  ;;  %v1060_v16 = vmul.f32 %v1058_v6, %v3936_v35  ;;  %v1079_v17 = vmul.f32 %v1077_v4, %v3936_v35  ;;  %v1102_v31 = vmul.f32 %v1100_v7, %v3936_v35 }
 0x326   : > { %v3942_v43 = vpop.f32.mrb[0].mxu0  ;;  %v1121_v36 = vmul.f32 %v1119_v10, %v3936_v35 }
 0x327   : > { %v2501_v44 = vpop.f32.mrb[1].mxu0  ;;  %v816_v45 = vmul.f32 %v814_v40, %v3942_v43  ;;  %v836_v49 = vmul.f32 %v834_v32, %v3942_v43  ;;  %v855_v54 = vmul.f32 %v853_v42, %v3942_v43  ;;  %v875_v56 = vmul.f32 %v873_v50, %v3942_v43 }
 0x328   : > { %v776_v46 = vpop.f32.mrb[2].mxu0  ;;  %v914_v60 = vmul.f32 %v912_v58, %v3942_v43  ;;  %v894_v63 = vmul.f32 %v892_v57, %v3942_v43  ;;  %v800_v0 = vmul.f32 %v3894_v12, %v3942_v43  ;;  %v786_v3 = vmul.f32 %v784_v2, %v3942_v43  ;;  %v849_v12 = vpop.permute.xlu1 %848 }
 0x329   : > { %1141 = vrot.lane.b32.xlu0 %v3907_v13, %s3348_s20  ;;  %v2502_v47 = vpop.f32.mrb[3].mxu0  ;;  %818 = vrot.lane.b32.xlu1 %v816_v45, %s3353_s24  ;;  %v812_v21 = vmul.f32 %v810_v9, %v3942_v43  ;;  %v832_v26 = vmul.f32 %v830_v5, %v3942_v43  ;;  %v851_v37 = vmul.f32 %v849_v12, %v3942_v43 }
 0x32a   : > { %v871_v42 = vmul.f32 %v869_v15, %v3942_v43  ;;  %v781_v9 = vmul.f32 %v3911_v14, %v3942_v43 }
 0x32d   : > { %1127 = vrot.lane.b32.xlu0 %v1125_v48, %s3350_s17  ;;  %838 = vrot.lane.b32.xlu1 %v836_v49, %s3350_s17 }
 0x331   : > { %1160 = vrot.lane.b32.xlu0 %v3907_v13, %s3352_s18  ;;  %1108 = vrot.lane.b32.xlu1 %v1106_v51, %s3353_s24 }
 0x335   : > { %857 = vrot.lane.b32.xlu1 %v855_v54, %s3353_s24  ;;  %1169 = vrot.lane.b32.xlu0 %v1167_v55, %s3350_s17  ;;  %v1025_v55 = vmul.f32 %v3907_v13, %v3936_v35 }
 0x339   : > { %877 = vrot.lane.b32.xlu1 %v875_v56, %s3350_s17  ;;  %907 = vrot.lane.b32.xlu0 %v3911_v14, %s3352_s18 }
 0x33d   : > { %1150 = vrot.lane.b32.xlu1 %v1148_v59, %s3353_s24  ;;  %916 = vrot.lane.b32.xlu0 %v914_v60, %s3350_s17 }
 0x341   : > { %887 = vrot.lane.b32.xlu1 %v3911_v14, %s3348_s20  ;;  %1032 = vrot.lane.b32.xlu0 %v1030_v62, %s3353_s24  ;;  %s2454_s20 = sshll.u32 %s4307_s13, 7 }
 0x345   : > { %896 = vrot.lane.b32.xlu1 %v894_v63, %s3353_s24  ;;  %796 = vrot.lane.b32.xlu0 %v3911_v14, %s3350_s17 }
 0x349   : > { %1039 = vrot.lane.b32.xlu1 %v3907_v13, %s3350_s17  ;;  %802 = vrot.lane.b32.xlu0 %v800_v0, %s3350_s17 }
 0x34d   : > { %1045 = vrot.lane.b32.xlu1 %v1043_v1, %s3350_s17  ;;  %s2170_s17 = sshll.u32 %s694_s8, 4  ;;  %s4183_s17 = int_to_ptr.vmem [resolvable:$true] %s2170_s17 }
 0x34e   : > { %s3217_s19 = scalar_lea.vmem %s4183_s17, 128 }
 0x34f   : > { %p3218_p11 = scmp.ne.s32.totalorder %s4183_s17, %s3217_s19 }
 0x351   : > { %788 = vrot.lane.b32.xlu1 %v786_v3, %s3353_s24  ;;  %s4308_s24 = sld [smem:[#allocation52_spill]]  ;;  %p3219_p10 = pnand %p3218_p11, %p4309_p6 }
 0x353   : > { %p3220_p1 = pneg %p3219_p10 }
 0x397   : > { %v1067_v11 = vpop.permute.xlu1 %1066  ;;  %v1086_v18 = vpop.permute.xlu0 %1085 }
 0x398   : > { %v1069_v19 = vsub.f32 %v1060_v16, %v1067_v11  ;;  %v1088_v20 = vadd.f32 %v1086_v18, %v1079_v17 }
 0x39a   : > { %1071 = vrot.lane.b32.xlu1 %v1069_v19, %s3354_s25  ;;  %1090 = vrot.lane.b32.xlu0 %v1088_v20, %s3354_s25 }
 0x39b   : > { %v819_v22 = vpop.permute.xlu1 %818  ;;  %v1142_v23 = vpop.permute.xlu0 %1141 }
 0x39c   : > { %v821_v24 = vsub.f32 %v812_v21, %v819_v22  ;;  %v1144_v48 = vmul.f32 %v1142_v23, %v3936_v35 }
 0x39e   : > { %v822_v25 = vmul.f32 0.35355338, %v821_v24 }
 0x39f   : > { %v839_v27 = vpop.permute.xlu1 %838  ;;  %v1128_v28 = vpop.permute.xlu0 %1127 }
 0x3a0   : > { %v841_v29 = vadd.f32 %v839_v27, %v832_v26  ;;  %824 = vrot.lane.b32.xlu1 %v822_v25, %s3354_s25  ;;  %v1130_v40 = vadd.f32 %v1128_v28, %v1121_v36 }
 0x3a2   : > { %v842_v30 = vmul.f32 0.35355338, %v841_v29 }
 0x3a3   : > { %v1109_v32 = vpop.permute.xlu1 %1108  ;;  %v1161_v33 = vpop.permute.xlu0 %1160 }
 0x3a4   : > { %v1111_v34 = vsub.f32 %v1102_v31, %v1109_v32  ;;  %844 = vrot.lane.b32.xlu1 %v842_v30, %s3354_s25  ;;  %v1163_v53 = vmul.f32 %v1161_v33, %v3936_v35  ;;  %s4181_s25 = scalar_lea.hbm %s4308_s24, %s2454_s20 }
 0x3a6   : > { %1113 = vrot.lane.b32.xlu0 %v1111_v34, %s3355_s3 }
 0x3a7   : > { %v858_v38 = vpop.permute.xlu1 %857  ;;  %v1170_v39 = vpop.permute.xlu0 %1169 }
 0x3a8   : > { %v860_v41 = vsub.f32 %v851_v37, %v858_v38  ;;  %v1172_v58 = vadd.f32 %v1170_v39, %v1163_v53 }
 0x3aa   : > { %v861_v44 = vmul.f32 0.35355338, %v860_v41  ;;  %1132 = vrot.lane.b32.xlu0 %v1130_v40, %s3355_s3 }
 0x3ab   : > { %v878_v45 = vpop.permute.xlu1 %877  ;;  %v908_v46 = vpop.permute.xlu0 %907 }
 0x3ac   : > { %v880_v47 = vadd.f32 %v878_v45, %v871_v42  ;;  %863 = vrot.lane.b32.xlu1 %v861_v44, %s3355_s3  ;;  %v910_v54 = vmul.f32 %v908_v46, %v3942_v43 }
 0x3ae   : > { %v881_v49 = vmul.f32 0.35355338, %v880_v47 }
 0x3af   : > { %v1151_v50 = vpop.permute.xlu1 %1150  ;;  %v917_v51 = vpop.permute.xlu0 %916 }
 0x3b0   : > { %v1153_v52 = vsub.f32 %v1144_v48, %v1151_v50  ;;  %883 = vrot.lane.b32.xlu1 %v881_v49, %s3355_s3  ;;  %v919_v59 = vadd.f32 %v917_v51, %v910_v54  ;;  %v3357_v49 = vmov -inf   ;;  %v1183_v50 = vlaneseq  ;;  %s2156_s3 = scalar_lea.sflag [#allocation10], %s3829_s6 }
 0x3b1   : > { %927 = vst.msk [vmem:[#allocation5] sm:$0xff] %vm926_vm5, %v3357_v49  ;;  %928 = vst.msk [vmem:[#allocation5 + $0x8] sm:$0xff] %vm926_vm5, %v3357_v49 }
 0x3b2   : > { %1155 = vrot.lane.b32.xlu0 %v1153_v52, %s3356_s1  ;;  %v920_v63 = vmul.f32 0.35355338, %v919_v59  ;;  %929 = vst.msk [vmem:[#allocation5 + $0x10] sm:$0xff] %vm926_vm5, %v3357_v49  ;;  %930 = vst.msk [vmem:[#allocation5 + $0x18] sm:$0xff] %vm926_vm5, %v3357_v49  ;;  %v1184_v51 = vshrl.u32 %v1183_v50, 7  ;;  %v1189_v52 = vand.u32 127, %v1183_v50 }
 0x3b3   : > { %v888_v56 = vpop.permute.xlu1 %887  ;;  %v1033_v57 = vpop.permute.xlu0 %1032  ;;  %v3358_v59 = vmov 0  }
 0x3b4   : > { %v1035_v60 = vsub.f32 %v1025_v55, %v1033_v57  ;;  %v890_v61 = vmul.f32 %v888_v56, %v3942_v43  ;;  %vm1193_vm6 = vcmp.ge.s32.totalorder %v1184_v51, %v1189_v52  ;;  %2803 = vset.pattern.permute.xlu0 %v3358_v59  ;;  %2804 = vset.pattern.permute.xlu1 %v3358_v59 }
 0x3b6   : > { %1037 = vst.msk [vmem:[#allocation3] sm:$0xff] %vm793_vm3, %v1035_v60  ;;  %1174 = vrot.lane.b32.xlu0 %v1172_v58, %s3356_s1 }
 0x3b7   : > { %v897_v62 = vpop.permute.xlu1 %896  ;;  %v797_v2 = vpop.permute.xlu0 %796 }
 0x3b8   : > { %v899_v0 = vsub.f32 %v890_v61, %v897_v62  ;;  %v799_v7 = vmul.f32 %v797_v2, %v3942_v43 }
 0x3ba   : > { %v900_v1 = vmul.f32 0.35355338, %v899_v0  ;;  %922 = vrot.lane.b32.xlu0 %v920_v63, %s3356_s1 }
 0x3bb   : > { %v1040_v3 = vpop.permute.xlu1 %1039  ;;  %v803_v5 = vpop.permute.xlu0 %802 }
 0x3bc   : > { %902 = vrot.lane.b32.xlu1 %v900_v1, %s3356_s1  ;;  %v1042_v13 = vmul.f32 %v1040_v3, %v3936_v35  ;;  %v805_v10 = vadd.f32 %v803_v5, %v799_v7  ;;  %s3364_s1 = smov [#allocation29]  }
 0x3be   : > { %v806_v17 = vmul.f32 0.35355338, %v805_v10 }
 0x3bf   : > { %v1046_v4 = vpop.permute.xlu1 %1045 }
 0x3c0   : > { %v1048_v6 = vadd.f32 %v1046_v4, %v1042_v13 }
 0x3c2   : > { %1050 = vst.msk [vmem:[#allocation3] sm:$0xff] %vm807_vm4, %v1048_v6 }
 0x3c3   : > { %v789_v12 = vpop.permute.xlu1 %788 }
 0x3c4   : > { %v791_v15 = vsub.f32 %v781_v9, %v789_v12 }
 0x3c6   : > { %v792_v16 = vmul.f32 0.35355338, %v791_v15 }
 0x3c8   : > { %794 = vst.msk [vmem:[#allocation2] sm:$0xff] %vm793_vm3, %v792_v16 }
 0x3c9   : > { %808 = vst.msk [vmem:[#allocation2] sm:$0xff] %vm807_vm4, %v806_v17  ;;  %v1196_v11 = vld [vmem:[#allocation3] sm:$0xff] }
 0x3ca   : > { %v1197_v18 = vpack.c.bf16 %v1196_v11, %v1196_v11  ;;  %v4077_v17 = vld [vmem:[#allocation5] sm:$0xff] }
 0x3cc   : > { %v1204_v19 = vsel %vm935_vm2, %v1197_v18, 0 }
 0x3cd   : > { %2512 = vmatpush3.bf16.xpose.msra.mxu0 %v1204_v19 }
 0x3ce   : > { %2523 = vmatprep.subr.bf16.mxu0 %v3344_v8 }
 0x3d0   : > { %v1194_v20 = vld [vmem:[#allocation2] sm:$0xff] }
 0x3d1   : > { %v1195_v21 = vpack.c.bf16 %v1194_v20, %v1194_v20  ;;  %v1384_v20 = vld [vmem:[#allocation5 + $0x8] sm:$0xff] }
 0x3d4   : > { %2514 = vmatmul.mubr.msk.bf16.vlgmr.msra.gmra.mrb[4].mxu0 %vm935_vm2, %v1195_v21 }
 0x3d5   : > { %2525 = vmatprep.mubr.msk.bf16.mxu0 %vm3345_vm1, %v3344_v8 }
 0x40c   : > { %v1072_v14 = vpop.permute.xlu1 %1071  ;;  %v1091_v43 = vpop.permute.xlu0 %1090 }
 0x40d   : > { %1075 = vst.msk [vmem:[#allocation3 + $0x8] sm:$0xff] %vm793_vm3, %v1072_v14 }
 0x40e   : > { %1093 = vst.msk [vmem:[#allocation3 + $0x8] sm:$0xff] %vm807_vm4, %v1091_v43 }
 0x412   : > { %v825_v22 = vpop.permute.xlu1 %824 }
 0x413   : > { %828 = vst.msk [vmem:[#allocation2 + $0x8] sm:$0xff] %vm793_vm3, %v825_v22  ;;  %v1521_v22 = vld [vmem:[#allocation5 + $0x10] sm:$0xff] }
 0x415   : > { %v1332_v23 = vld [vmem:[#allocation3 + $0x8] sm:$0xff] }
 0x416   : > { %v845_v24 = vpop.permute.xlu1 %844  ;;  %v1333_v25 = vpack.c.bf16 %v1332_v23, %v1332_v23 }
 0x417   : > { %847 = vst.msk [vmem:[#allocation2 + $0x8] sm:$0xff] %vm807_vm4, %v845_v24 }
 0x418   : > { %v1114_v26 = vpop.permute.xlu0 %1113  ;;  %v1340_v27 = vsel %vm935_vm2, %v1333_v25, 0  ;;  %v1658_v25 = vld [vmem:[#allocation5 + $0x18] sm:$0xff] }
 0x419   : > { %1117 = vst.msk [vmem:[#allocation3 + $0x10] sm:$0xff] %vm793_vm3, %v1114_v26  ;;  %2524 = vmatpush3.bf16.xpose.msra.mxu0 %v1340_v27 }
 0x41a   : > { %2535 = vmatprep.subr.bf16.mxu0 %v3344_v8 }
 0x41c   : > { %v1133_v28 = vpop.permute.xlu0 %1132 }
 0x41d   : > { %1135 = vst.msk [vmem:[#allocation3 + $0x10] sm:$0xff] %vm807_vm4, %v1133_v28 }
 0x41e   : > { %v864_v29 = vpop.permute.xlu1 %863  ;;  %v1330_v30 = vld [vmem:[#allocation2 + $0x8] sm:$0xff] }
 0x41f   : > { %867 = vst.msk [vmem:[#allocation2 + $0x10] sm:$0xff] %vm793_vm3, %v864_v29  ;;  %v1331_v31 = vpack.c.bf16 %v1330_v30, %v1330_v30 }
 0x421   : > { %2526 = vmatmul.mubr.msk.bf16.vlgmr.msra.gmra.mrb[8].mxu0 %vm935_vm2, %v1331_v31 }
 0x422   : > { %v884_v32 = vpop.permute.xlu1 %883  ;;  %2537 = vmatprep.mubr.msk.bf16.mxu0 %vm3345_vm1, %v3344_v8 }
 0x423   : > { %886 = vst.msk [vmem:[#allocation2 + $0x10] sm:$0xff] %vm807_vm4, %v884_v32 }
 0x424   : > { %v1156_v33 = vpop.permute.xlu0 %1155  ;;  %v1469_v34 = vld [vmem:[#allocation3 + $0x10] sm:$0xff] }
 0x425   : > { %1159 = vst.msk [vmem:[#allocation3 + $0x18] sm:$0xff] %vm793_vm3, %v1156_v33  ;;  %v1470_v36 = vpack.c.bf16 %v1469_v34, %v1469_v34 }
 0x427   : > { %v1477_v37 = vsel %vm935_vm2, %v1470_v36, 0 }
 0x428   : > { %2536 = vmatpush3.bf16.xpose.msra.mxu0 %v1477_v37  ;;  %v1175_v38 = vpop.permute.xlu0 %1174 }
 0x429   : > { %1177 = vst.msk [vmem:[#allocation3 + $0x18] sm:$0xff] %vm807_vm4, %v1175_v38  ;;  %2547 = vmatprep.subr.bf16.mxu0 %v3344_v8 }
 0x42a   : > { %v1467_v39 = vld [vmem:[#allocation2 + $0x10] sm:$0xff] }
 0x42b   : > { %v1468_v40 = vpack.c.bf16 %v1467_v39, %v1467_v39 }
 0x42c   : > { %v923_v42 = vpop.permute.xlu0 %922 }
 0x42e   : > { %v903_v41 = vpop.permute.xlu1 %902 }
 0x42f   : > { %906 = vst.msk [vmem:[#allocation2 + $0x18] sm:$0xff] %vm793_vm3, %v903_v41  ;;  %2538 = vmatmul.mubr.msk.bf16.vlgmr.msra.gmra.mrb[12].mxu0 %vm935_vm2, %v1468_v40 }
 0x430   : > { %925 = vst.msk [vmem:[#allocation2 + $0x18] sm:$0xff] %vm807_vm4, %v923_v42  ;;  %v1606_v44 = vld [vmem:[#allocation3 + $0x18] sm:$0xff]  ;;  %2549 = vmatprep.mubr.msk.bf16.mxu0 %vm3345_vm1, %v3344_v8 }
 0x431   : > { %v1607_v45 = vpack.c.bf16 %v1606_v44, %v1606_v44 }
 0x433   : > { %v1614_v46 = vsel %vm935_vm2, %v1607_v45, 0 }
 0x434   : > { %2548 = vmatpush3.bf16.xpose.msra.mxu0 %v1614_v46 }
 0x435   : > { %2559 = vmatprep.subr.bf16.mxu0 %v3344_v8 }
 0x437   : > { %v1604_v47 = vld [vmem:[#allocation2 + $0x18] sm:$0xff] }
 0x438   : > { %v1605_v48 = vpack.c.bf16 %v1604_v47, %v1604_v47 }
 0x43b   : > { %2550 = vmatmul.mubr.msk.bf16.vlgmr.msra.gmra.mrb[16].mxu0 %vm935_vm2, %v1605_v48 }
 0x43c   : > { %2561 = vmatprep.mubr.msk.bf16.mxu0 %vm3345_vm1, %v3344_v8 }
 0x4a7   : > { %v1240_v53 = vpop.f32.mrb[4].mxu0 }
 0x4a8   : > { %v1246_v54 = vsel %vm1193_vm6, %v1240_v53, -1e+09  ;;  %v2515_v55 = vpop.f32.mrb[5].mxu0 }
 0x4a9   : > { %v1243_v56 = vpop.f32.mrb[6].mxu0  ;;  %v1248_v57 = vsel %vm935_vm2, %v1246_v54, -inf }
 0x4aa   : > { %1249 = vmax.xlane.f32.xlu1 %v1248_v57  ;;  %v2516_v58 = vpop.f32.mrb[7].mxu0 }
 0x4f4   : > { %v1376_v60 = vpop.f32.mrb[8].mxu0 }
 0x4f5   : > { %v4063_v61 = vsel %vm1193_vm6, %v1376_v60, -1e+09  ;;  %v2527_v62 = vpop.f32.mrb[9].mxu0 }
 0x4f6   : > { %v1379_v63 = vpop.f32.mrb[10].mxu0  ;;  %v1385_v0 = vsel %vm935_vm2, %v4063_v61, -inf }
 0x4f7   : > { %1386 = vmax.xlane.f32.xlu0 %v1385_v0  ;;  %v2528_v1 = vpop.f32.mrb[11].mxu0 }
 0x502   : > { %v1513_v2 = vpop.f32.mrb[12].mxu0 }
 0x503   : > { %v4068_v3 = vsel %vm1193_vm6, %v1513_v2, -1e+09  ;;  %v2539_v13 = vpop.f32.mrb[13].mxu0 }
 0x504   : > { %v1516_v4 = vpop.f32.mrb[14].mxu0  ;;  %v1522_v5 = vsel %vm935_vm2, %v4068_v3, -inf }
 0x505   : > { %1523 = vmax.xlane.f32.xlu0 %v1522_v5  ;;  %v2540_v6 = vpop.f32.mrb[15].mxu0 }
 0x50e   : > { %v1650_v7 = vpop.f32.mrb[16].mxu0 }
 0x50f   : > { %v4073_v9 = vsel %vm1193_vm6, %v1650_v7, -1e+09  ;;  %v2551_v10 = vpop.f32.mrb[17].mxu0 }
 0x510   : > { %v1653_v12 = vpop.f32.mrb[18].mxu0  ;;  %v1659_v15 = vsel %vm935_vm2, %v4073_v9, -inf }
 0x511   : > { %1660 = vmax.xlane.f32.xlu1 %v1659_v15  ;;  %v2552_v16 = vpop.f32.mrb[19].mxu0 }
 0x537   : > { %v1250_v11 = vpop.xlane.xlu1 %1249 }
 0x538   : > { %v4080_v18 = vmax.f32 %v4077_v17, %v1250_v11 }
 0x53a   : > { %v1252_v19 = vsub.f32 %v4077_v17, %v4080_v18  ;;  %1328 = vst.msk [vmem:[#allocation5] sm:$0xff] %vm926_vm5, %v4080_v18  ;;  %1257 = vperm.xlu0 %2803, %v4080_v18   ;;  %v1754_v17 = vld [vmem:[#allocation16] sm:$0xf] }
 0x53b   : > { %v1821_v18 = vsel %vm1282_vm7, %v1754_v17, 0 }
 0x53c   : > { %v1253_v15 = vmul.f32 1.442695, %v1252_v19  ;;  %v1401_v19 = vld [vmem:[#allocation6 + $0x8] sm:$0xff] }
 0x584   : > { %v1387_v21 = vpop.xlane.xlu0 %1386 }
 0x585   : > { %v1388_v14 = vmax.f32 %v1384_v20, %v1387_v21 }
 0x587   : > { %v1389_v43 = vsub.f32 %v1384_v20, %v1388_v14  ;;  %1465 = vst.msk [vmem:[#allocation5 + $0x8] sm:$0xff] %vm926_vm5, %v1388_v14  ;;  %1394 = vperm.xlu1 %2804, %v1388_v14   ;;  %v1263_v20 = vld [vmem:[#allocation6] sm:$0xff] }
 0x589   : > { %v1390_v33 = vmul.f32 1.442695, %v1389_v43 }
 0x58b   : > { %1052 = vrot.lane.b32.xlu1 %v3936_v35, %s3359_s22  ;;  %s3221_s22 = sshll.u32 %s3364_s1, 4  ;;  %s3222_s22 = int_to_ptr.vmem [resolvable:$false] %s3221_s22 }
 0x58c   : > { %p3224_p9 = scmp.lt.s32.totalorder %s4183_s17, %s3222_s22 }
 0x592   : > { %v1524_v23 = vpop.xlane.xlu0 %1523 }
 0x593   : > { %v1525_v24 = vmax.f32 %v1521_v22, %v1524_v23 }
 0x595   : > { %1602 = vst.msk [vmem:[#allocation5 + $0x10] sm:$0xff] %vm926_vm5, %v1525_v24  ;;  %1531 = vperm.xlu1 %2804, %v1525_v24   ;;  %v1526_v34 = vsub.f32 %v1521_v22, %v1525_v24 }
 0x597   : > { %v1527_v36 = vmul.f32 1.442695, %v1526_v34 }
 0x599   : > { %1094 = vrot.lane.b32.xlu1 %v3936_v35, %s3360_s7  ;;  %s3223_s7 = scalar_lea.vmem %s3222_s22, 256 }
 0x59a   : > { %p3225_p8 = scmp.lt.s32.totalorder %s3223_s7, %s3217_s19 }
 0x59c   : > { %p3226_p3 = por %p3225_p8, %p3224_p9 }
 0x59e   : > { %v1661_v26 = vpop.xlane.xlu1 %1660  ;;  %p3227_p12 = pnand %p3226_p3, %p3220_p1 }
 0x59f   : > { %v1662_v27 = vmax.f32 %v1658_v25, %v1661_v26 }
 0x5a1   : > { %1739 = vst.msk [vmem:[#allocation5 + $0x18] sm:$0xff] %vm926_vm5, %v1662_v27  ;;  %1668 = vperm.xlu1 %2804, %v1662_v27   ;;  %v1663_v37 = vsub.f32 %v1658_v25, %v1662_v27  ;;  %v1538_v27 = vld [vmem:[#allocation6 + $0x10] sm:$0xff] }
 0x5a3   : > { %v1664_v38 = vmul.f32 1.442695, %v1663_v37 }
 0x5a5   : > { %1136 = vrot.lane.b32.xlu1 %v3936_v35, %s3361_s23 }
 0x5a9   : > { %1178 = vrot.lane.b32.xlu1 %v3936_v35, %s3362_s2 }
 0x5b9   : > { %v1258_v28 = vpop.permute.xlu0 %1257 }
 0x5ba   : > { %v1260_v29 = vsub.f32 %v1246_v54, %v1258_v28 }
 0x5bc   : > { %v1261_v30 = vmul.f32 1.442695, %v1260_v29 }
 0x5be   : > { %2819 = vpow2.f32 %v1261_v30 }
 0x5bf   : > { %2821 = vpow2.f32 %v1390_v33  ;;  %v1675_v33 = vld [vmem:[#allocation6 + $0x18] sm:$0xff] }
 0x5c0   : > { %2823 = vpow2.f32 %v1527_v36  ;;  %v1768_v36 = vld [vmem:[#allocation16 + $0x4] sm:$0xf] }
 0x5c1   : > { %2825 = vpow2.f32 %v1664_v38  ;;  %v1775_v38 = vsel %vm1282_vm7, %v1768_v36, 0 }
 0x5c2   : > { %2560 = vmatpush3.bf16.msra.mxu0 %v1775_v38 }
 0x5c3   : > { %2571 = vmatprep.subr.bf16.mxu0 %v3344_v8 }
 0x5c8   : > { %v2820_v31 = vpop.eup %2819 }
 0x5c9   : > { %v1265_v32 = vsel %vm935_vm2, %v2820_v31, 0.0  ;;  %v4095_v39 = vpop.eup %2821  ;;  %v1278_v54 = vpack.c.bf16 %v2820_v31, %v2820_v31 }
 0x5ca   : > { %v4098_v35 = vpop.eup %2823  ;;  %v1402_v24 = vmul.f32 %v4095_v39, %v1401_v19 }
 0x5cb   : > { %v4101_v40 = vpop.eup %2825  ;;  %v1539_v29 = vmul.f32 %v4098_v35, %v1538_v27 }
 0x5cc   : > { %v1676_v37 = vmul.f32 %v4101_v40, %v1675_v33 }
 0x5cd   : > { %1266 = vadd.xlane.f32.xlu1 %v1265_v32 }
 0x5de   : > { %1412 = vperm.xlu1 %2804, %v4095_v39  }
 0x5e2   : > { %1549 = vperm.xlu1 %2804, %v4098_v35  }
 0x5e6   : > { %1686 = vperm.xlu1 %2804, %v4101_v40  }
 0x606   : > { %v1395_v41 = vpop.permute.xlu1 %1394 }
 0x607   : > { %v1397_v42 = vsub.f32 %v4063_v61, %v1395_v41 }
 0x609   : > { %v1398_v44 = vmul.f32 1.442695, %v1397_v42 }
 0x60a   : > { %v1053_v45 = vpop.permute.xlu1 %1052 }
 0x60b   : > { %2827 = vpow2.f32 %v1398_v44  ;;  %1056 = vst.msk [vmem:[#allocation4] sm:$0xff] %vm935_vm2, %v1053_v45 }
 0x612   : > { %v1198_v46 = vld [vmem:[#allocation4] sm:$0xff] }
 0x613   : > { %v1199_v47 = vpack.c.bf16 %v1198_v46, %v1198_v46  ;;  %v1271_v46 = vld [vmem:[#allocation7] sm:$0xff] }
 0x614   : > { %v1532_v48 = vpop.permute.xlu1 %1531 }
 0x615   : > { %v2828_v49 = vpop.eup %2827  ;;  %v1534_v50 = vsub.f32 %v4068_v3, %v1532_v48  ;;  %v1284_v51 = vsel %vm1282_vm7, %v1199_v47, 0 }
 0x616   : > { %2518 = vmatpush3.bf16.msra.mxu1 %v1284_v51  ;;  %v1403_v52 = vsel %vm935_vm2, %v2828_v49, 0.0  ;;  %v1416_v1 = vpack.c.bf16 %v2828_v49, %v2828_v49 }
 0x617   : > { %v1535_v53 = vmul.f32 1.442695, %v1534_v50  ;;  %1404 = vadd.xlane.f32.xlu0 %v1403_v52  ;;  %2529 = vmatprep.subr.bf16.mxu1 %v3344_v8 }
 0x618   : > { %v1095_v55 = vpop.permute.xlu1 %1094 }
 0x619   : > { %2829 = vpow2.f32 %v1535_v53  ;;  %1098 = vst.msk [vmem:[#allocation4 + $0x8] sm:$0xff] %vm935_vm2, %v1095_v55  ;;  %2520 = vmatmul.mubr.msk.bf16.vlgmr.msra.gmra.mrb[4].mxu1 %vm935_vm2, %v1278_v54  ;;  %v1409_v55 = vld [vmem:[#allocation7 + $0x8] sm:$0xff] }
 0x61a   : > { %2531 = vmatprep.mubr.msk.bf16.mxu1 %vm3345_vm1, %v3344_v8 }
 0x620   : > { %v1669_v56 = vpop.permute.xlu1 %1668  ;;  %v1334_v57 = vld [vmem:[#allocation4 + $0x8] sm:$0xff] }
 0x621   : > { %v1671_v58 = vsub.f32 %v4073_v9, %v1669_v56  ;;  %v1335_v59 = vpack.c.bf16 %v1334_v57, %v1334_v57 }
 0x623   : > { %v2830_v60 = vpop.eup %2829  ;;  %v1672_v61 = vmul.f32 1.442695, %v1671_v58  ;;  %v1421_v62 = vsel %vm1282_vm7, %v1335_v59, 0  ;;  %v1937_v58 = vld [vmem:[#allocation16 + $0xc] sm:$0xf] }
 0x624   : > { %v1137_v63 = vpop.permute.xlu1 %1136  ;;  %2530 = vmatpush3.bf16.msra.mxu1 %v1421_v62  ;;  %v1540_v0 = vsel %vm935_vm2, %v2830_v60, 0.0  ;;  %v1553_v9 = vpack.c.bf16 %v2830_v60, %v2830_v60  ;;  %v1942_v62 = vsel %vm1282_vm7, %v1937_v58, 0 }
 0x625   : > { %2831 = vpow2.f32 %v1672_v61  ;;  %1140 = vst.msk [vmem:[#allocation4 + $0x10] sm:$0xff] %vm935_vm2, %v1137_v63  ;;  %1541 = vadd.xlane.f32.xlu0 %v1540_v0  ;;  %2541 = vmatprep.subr.bf16.mxu1 %v3344_v8 }
 0x626   : > { %2833 = vpow2.f32 %v1253_v15 }
 0x627   : > { %2532 = vmatmul.mubr.msk.bf16.vlgmr.msra.gmra.mrb[8].mxu1 %vm935_vm2, %v1416_v1 }
 0x628   : > { %v1179_v2 = vpop.permute.xlu1 %1178  ;;  %2543 = vmatprep.mubr.msk.bf16.mxu1 %vm3345_vm1, %v3344_v8 }
 0x629   : > { %1182 = vst.msk [vmem:[#allocation4 + $0x18] sm:$0xff] %vm935_vm2, %v1179_v2 }
 0x62c   : > { %v1471_v3 = vld [vmem:[#allocation4 + $0x10] sm:$0xff] }
 0x62d   : > { %v1472_v13 = vpack.c.bf16 %v1471_v3, %v1471_v3 }
 0x62f   : > { %v2832_v4 = vpop.eup %2831  ;;  %v1558_v5 = vsel %vm1282_vm7, %v1472_v13, 0  ;;  %v1546_v13 = vld [vmem:[#allocation7 + $0x10] sm:$0xff] }
 0x630   : > { %2542 = vmatpush3.bf16.msra.mxu1 %v1558_v5  ;;  %v1677_v6 = vsel %vm935_vm2, %v2832_v4, 0.0  ;;  %v1608_v7 = vld [vmem:[#allocation4 + $0x18] sm:$0xff]  ;;  %v1690_v16 = vpack.c.bf16 %v2832_v4, %v2832_v4  ;;  %v2834_v11 = vpop.eup %2833 }
 0x631   : > { %1678 = vadd.xlane.f32.xlu0 %v1677_v6  ;;  %2553 = vmatprep.subr.bf16.mxu1 %v3344_v8  ;;  %v1609_v10 = vpack.c.bf16 %v1608_v7, %v1608_v7  ;;  %v1264_v21 = vmul.f32 %v2834_v11, %v1263_v20 }
 0x633   : > { %2544 = vmatmul.mubr.msk.bf16.vlgmr.msra.gmra.mrb[12].mxu1 %vm935_vm2, %v1553_v9  ;;  %v1695_v12 = vsel %vm1282_vm7, %v1609_v10, 0 }
 0x634   : > { %2554 = vmatpush3.bf16.msra.mxu1 %v1695_v12  ;;  %2555 = vmatprep.mubr.msk.bf16.mxu1 %vm3345_vm1, %v3344_v8  ;;  %v1683_v12 = vld [vmem:[#allocation7 + $0x18] sm:$0xff] }
 0x635   : > { %2565 = vmatprep.subr.bf16.mxu1 %v3344_v8 }
 0x63b   : > { %2556 = vmatmul.mubr.msk.bf16.vlgmr.msra.gmra.mrb[16].mxu1 %vm935_vm2, %v1690_v16 }
 0x63c   : > { %2567 = vmatprep.mubr.msk.bf16.mxu1 %vm3345_vm1, %v3344_v8  ;;  %2566 = vmatpush3.bf16.msra.mxu1 %v1821_v18 }
 0x63d   : > { %2577 = vmatprep.subr.bf16.mxu1 %v3344_v8 }
 0x647   : > { %1274 = vperm.xlu0 %2803, %v2834_v11  }
 0x65a   : > { %v1267_v14 = vpop.xlane.xlu1 %1266 }
 0x65b   : > { %v1268_v43 = vadd.f32 %v1267_v14, %v1264_v21 }
 0x65d   : > { %1270 = vst.msk [vmem:[#allocation6] sm:$0xff] %vm926_vm5, %v1268_v43 }
 0x65e   : > { %v1413_v45 = vpop.permute.xlu1 %1412 }
 0x65f   : > { %v1415_v60 = vmul.f32 %v1413_v45, %v1409_v55 }
 0x662   : > { %v1550_v48 = vpop.permute.xlu1 %1549 }
 0x663   : > { %v1552_v4 = vmul.f32 %v1550_v48, %v1546_v13  ;;  %v2813_v13 = vld [vmem:[#allocation19 + $0x10] sm:$0xff]  }
 0x664   : > { %v1745_v22 = vld [vmem:[#allocation6] sm:$0xff] }
 0x665   : > { %2835 = vrcp.f32 %v1745_v22 }
 0x666   : > { %v1687_v54 = vpop.permute.xlu1 %1686 }
 0x667   : > { %v1689_v15 = vmul.f32 %v1687_v54, %v1683_v12 }
 0x66f   : > { %v2836_v23 = vpop.eup %2835 }
 0x670   : > { %1749 = vperm.xlu1 %2804, %v2836_v23   ;;  %v1876_v23 = vld [vmem:[#allocation16 + $0x8] sm:$0xf] }
 0x671   : > { %v1881_v19 = vsel %vm1282_vm7, %v1876_v23, 0 }
 0x6a4   : > { %v1405_v25 = vpop.xlane.xlu0 %1404 }
 0x6a5   : > { %v1406_v26 = vadd.f32 %v1405_v25, %v1402_v24 }
 0x6a7   : > { %1407 = vst.msk [vmem:[#allocation6 + $0x8] sm:$0xff] %vm926_vm5, %v1406_v26 }
 0x6ae   : > { %v1758_v28 = vld [vmem:[#allocation6 + $0x8] sm:$0xff] }
 0x6af   : > { %2837 = vrcp.f32 %v1758_v28 }
 0x6b2   : > { %v1542_v30 = vpop.xlane.xlu0 %1541 }
 0x6b3   : > { %v1543_v31 = vadd.f32 %v1542_v30, %v1539_v29 }
 0x6b5   : > { %1544 = vst.msk [vmem:[#allocation6 + $0x10] sm:$0xff] %vm926_vm5, %v1543_v31 }
 0x6b9   : > { %v2838_v32 = vpop.eup %2837 }
 0x6ba   : > { %1762 = vperm.xlu0 %2803, %v2838_v32  }
 0x6bc   : > { %v1866_v34 = vld [vmem:[#allocation6 + $0x10] sm:$0xff] }
 0x6bd   : > { %2839 = vrcp.f32 %v1866_v34 }
 0x6be   : > { %v1679_v39 = vpop.xlane.xlu0 %1678 }
 0x6bf   : > { %v1680_v41 = vadd.f32 %v1679_v39, %v1676_v37 }
 0x6c1   : > { %1681 = vst.msk [vmem:[#allocation6 + $0x18] sm:$0xff] %vm926_vm5, %v1680_v41 }
 0x6c6   : > { %v1275_v47 = vpop.permute.xlu0 %1274 }
 0x6c7   : > { %v2840_v35 = vpop.eup %2839  ;;  %v1277_v40 = vmul.f32 %v1275_v47, %v1271_v46 }
 0x6c8   : > { %1870 = vperm.xlu0 %2803, %v2840_v35   ;;  %v1927_v42 = vld [vmem:[#allocation6 + $0x18] sm:$0xff] }
 0x6c9   : > { %2841 = vrcp.f32 %v1927_v42 }
 0x6d3   : > { %v2842_v44 = vpop.eup %2841 }
 0x6d4   : > { %1931 = vperm.xlu1 %2804, %v2842_v44  }
 0x6ec   : > { %v1320_v49 = vpop.f32.mrb[4].mxu1 }
 0x6ed   : > { %v1326_v50 = vadd.f32 %v1320_v49, %v1277_v40  ;;  %v2521_v51 = vpop.f32.mrb[5].mxu1  ;;  %v1743_v40 = vld [vmem:[%s594_s4] sm:$0xff]  ;;  %s3363_s4 = smov 64  }
 0x6ee   : > { %v1323_v52 = vpop.f32.mrb[6].mxu1 }
 0x6ef   : > { %1327 = vst.msk [vmem:[#allocation7] sm:$0xff] %vm935_vm2, %v1326_v50  ;;  %v2522_v53 = vpop.f32.mrb[7].mxu1  ;;  %v1750_v56 = vpop.permute.xlu1 %1749 }
 0x6f6   : > { %v1744_v57 = vld [vmem:[#allocation7] sm:$0xff] }
 0x6f7   : > { %v1752_v59 = vmul.f32 %v1750_v56, %v1744_v57  ;;  %v2809_v56 = vld [vmem:[#allocation17] sm:$0xff]   ;;  %v2810_v57 = vld [vmem:[#allocation17 + $0x8] sm:$0xff]  }
 0x6f9   : > { %v1753_v61 = vpack.c.bf16 %v1752_v59, %v1752_v59 }
 0x6fa   : > { %v1457_v63 = vpop.f32.mrb[8].mxu1 }
 0x6fb   : > { %v1463_v0 = vadd.f32 %v1457_v63, %v1415_v60  ;;  %v2533_v1 = vpop.f32.mrb[9].mxu1  ;;  %2568 = vmatmul.mubr.msk.bf16.vlgmr.msra.gmra.mrb[20].mxu1 %vm935_vm2, %v1753_v61 }
 0x6fc   : > { %v1460_v2 = vpop.f32.mrb[10].mxu1  ;;  %2578 = vmatpush3.bf16.msra.mxu1 %v1942_v62  ;;  %2579 = vmatprep.mubr.msk.bf16.mxu1 %vm3345_vm1, %v3344_v8  ;;  %v2443_v62 = vld [vmem:[#allocation22] ss:$0 sm:$0xff] }
 0x6fd   : > { %1464 = vst.msk [vmem:[#allocation7 + $0x8] sm:$0xff] %vm935_vm2, %v1463_v0  ;;  %v2534_v3 = vpop.f32.mrb[11].mxu1  ;;  %2591 = vmatprep.subr.bf16.mxu1 %v3344_v8  ;;  %v2811_v2 = vld [vmem:[#allocation19] sm:$0xff]  }
 0x6fe   : > { %v2812_v3 = vld [vmem:[#allocation19 + $0x8] sm:$0xff]  }
 0x704   : > { %v1756_v43 = vld [vmem:[#allocation7 + $0x8] sm:$0xff] }
 0x706   : > { %v1594_v5 = vpop.f32.mrb[12].mxu1 }
 0x707   : > { %v1600_v6 = vadd.f32 %v1594_v5, %v1552_v4  ;;  %v2545_v7 = vpop.f32.mrb[13].mxu1  ;;  %v2814_v4 = vld [vmem:[#allocation19 + $0x18] sm:$0xff]  }
 0x708   : > { %v1597_v9 = vpop.f32.mrb[14].mxu1 }
 0x709   : > { %1601 = vst.msk [vmem:[#allocation7 + $0x10] sm:$0xff] %vm935_vm2, %v1600_v6  ;;  %v2546_v10 = vpop.f32.mrb[15].mxu1 }
 0x70e   : > { %v1731_v16 = vpop.f32.mrb[16].mxu1 }
 0x70f   : > { %v1737_v11 = vadd.f32 %v1731_v16, %v1689_v15  ;;  %v2557_v20 = vpop.f32.mrb[17].mxu1 }
 0x710   : > { %v1734_v21 = vpop.f32.mrb[18].mxu1  ;;  %v1864_v24 = vld [vmem:[#allocation7 + $0x10] sm:$0xff] }
 0x711   : > { %1738 = vst.msk [vmem:[#allocation7 + $0x18] sm:$0xff] %vm935_vm2, %v1737_v11  ;;  %v2558_v14 = vpop.f32.mrb[19].mxu1 }
 0x718   : > { %v1925_v28 = vld [vmem:[#allocation7 + $0x18] sm:$0xff] }
 0x739   : > { %v1763_v22 = vpop.permute.xlu0 %1762 }
 0x73a   : > { %v1765_v17 = vmul.f32 %v1763_v22, %v1756_v43 }
 0x73c   : > { %v1766_v18 = vpack.c.bf16 %v1765_v17, %v1765_v17 }
 0x73e   : > { %2562 = vmatmul.mubr.msk.bf16.vlgmr.msra.gmra.mrb[20].mxu0 %vm935_vm2, %v1766_v18 }
 0x73f   : > { %2572 = vmatpush3.bf16.msra.mxu0 %v1881_v19  ;;  %2573 = vmatprep.mubr.msk.bf16.mxu0 %vm3345_vm1, %v3344_v8 }
 0x740   : > { %2583 = vmatprep.subr.bf16.mxu0 %v3344_v8 }
 0x747   : > { %v1871_v25 = vpop.permute.xlu0 %1870 }
 0x748   : > { %v1873_v26 = vmul.f32 %v1871_v25, %v1864_v24 }
 0x74a   : > { %v1874_v27 = vpack.c.bf16 %v1873_v26, %v1873_v26 }
 0x74c   : > { %2574 = vmatmul.mubr.msk.bf16.vlgmr.msra.gmra.mrb[24].mxu0 %vm935_vm2, %v1874_v27 }
 0x74d   : > { %2587 = vmatprep.mubr.msk.bf16.mxu0 %vm3345_vm1, %v3344_v8  ;;  %2584 = vmatpush3.bf16.msra.mxu0 %v2809_v56 }
 0x74e   : > { %2585 = vmatprep.subr.bf16.mxu0 %v3344_v8 }
 0x751   : > { %2586 = vmatpush3.bf16.msra.mxu0 %v2810_v57 }
 0x753   : > { %v1932_v29 = vpop.permute.xlu1 %1931 }
 0x754   : > { %v1934_v30 = vmul.f32 %v1932_v29, %v1925_v28 }
 0x756   : > { %v1935_v31 = vpack.c.bf16 %v1934_v30, %v1934_v30 }
 0x758   : > { %2580 = vmatmul.mubr.msk.bf16.vlgmr.msra.gmra.mrb[24].mxu1 %vm935_vm2, %v1935_v31 }
 0x759   : > { %2599 = vmatprep.mubr.msk.bf16.mxu1 %vm3345_vm1, %v3344_v8  ;;  %2592 = vmatpush3.bf16.msra.mxu1 %v2811_v2 }
 0x75a   : > { %2593 = vmatprep.subr.bf16.mxu1 %v3344_v8 }
 0x75d   : > { %2594 = vmatpush3.bf16.msra.mxu1 %v2812_v3 }
 0x75e   : > { %2595 = vmatprep.subr.bf16.mxu1 %v3344_v8 }
 0x761   : > { %2596 = vmatpush3.bf16.msra.mxu1 %v2813_v13 }
 0x762   : > { %2597 = vmatprep.subr.bf16.mxu1 %v3344_v8 }
 0x765   : > { %2598 = vmatpush3.bf16.msra.mxu1 %v2814_v4 }
 0x7ce   : > { %v1857_v32 = vpop.f32.mrb[20].mxu1 }
 0x7cf   : > { %v2569_v33 = vpop.f32.mrb[21].mxu1 }
 0x7d0   : > { %v1860_v34 = vpop.f32.mrb[22].mxu1 }
 0x7d1   : > { %v2570_v36 = vpop.f32.mrb[23].mxu1 }
 0x811   : > { %v1811_v37 = vpop.f32.mrb[20].mxu0 }
 0x812   : > { %v1858_v38 = vadd.f32 %v1857_v32, %v1811_v37  ;;  %v2563_v39 = vpop.f32.mrb[21].mxu0 }
 0x813   : > { %v1814_v41 = vpop.f32.mrb[22].mxu0 }
 0x814   : > { %v2564_v35 = vpop.f32.mrb[23].mxu0 }
 0x81f   : > { %v1917_v42 = vpop.f32.mrb[24].mxu0 }
 0x820   : > { %v1923_v44 = vadd.f32 %v1917_v42, %v1858_v38  ;;  %v2575_v45 = vpop.f32.mrb[25].mxu0 }
 0x821   : > { %v1920_v46 = vpop.f32.mrb[26].mxu0 }
 0x822   : > { %v2576_v47 = vpop.f32.mrb[27].mxu0 }
 0x82b   : > { %v1978_v48 = vpop.f32.mrb[24].mxu1 }
 0x82c   : > { %v1984_v49 = vadd.f32 %v1978_v48, %v1923_v44  ;;  %v2581_v50 = vpop.f32.mrb[25].mxu1 }
 0x82d   : > { %v1981_v51 = vpop.f32.mrb[26].mxu1 }
 0x82e   : > { %v1985_v52 = vadd.f32 %v1984_v49, %v1743_v40  ;;  %v2582_v53 = vpop.f32.mrb[27].mxu1 }
 0x830   : > { %v1987_v54 = vmul.f32 %v1985_v52, %v1985_v52 }
 0x832   : > { %v1989_v55 = vsel %vm703_vm0, %v1987_v54, 0.0 }
 0x833   : > { %1990 = vadd.xlane.f32.xlu0 %v1989_v55 }
 0x8c0   : > { %v1991_v58 = vpop.xlane.xlu0 %1990 }
 0x8c1   : > { %v1993_v59 = vmul.f32 0.03125, %v1991_v58 }
 0x8c3   : > { %v1994_v60 = vadd.f32 1e-05, %v1993_v59 }
 0x8c5   : > { %2843 = vrsqrt.f32 %v1994_v60 }
 0x8cf   : > { %v2844_v61 = vpop.eup %2843 }
 0x8d0   : > { %v1996_v63 = vmul.f32 %v2844_v61, %v1985_v52 }
 0x8d2   : > { %v2003_v0 = vmul.f32 %v2443_v62, %v1996_v63 }
 0x8d4   : > { %v2004_v1 = vpack.c.bf16 %v2003_v0, %v2003_v0 }
 0x8d6   : > { %2588 = vmatmul.mubr.msk.bf16.vlgmr.msra.gmra.mrb[28].mxu0 %vm703_vm0, %v2004_v1 }
 0x9a9   : > { %v2058_v5 = vpop.f32.mrb[28].mxu0 }
 0x9aa   : > { %2072 = vrot.lane.b32.xlu1 %v2058_v5, %s3363_s4  ;;  %v2589_v6 = vpop.f32.mrb[29].mxu0  ;;  %v2447_v10 = vmul.f32 -1.442695, %v2058_v5 }
 0x9ab   : > { %v2061_v7 = vpop.f32.mrb[30].mxu0 }
 0x9ac   : > { %v2590_v9 = vpop.f32.mrb[31].mxu0  ;;  %2845 = vpow2.f32 %v2447_v10 }
 0x9b6   : > { %v2846_v12 = vpop.eup %2845 }
 0x9b7   : > { %v2067_v15 = vadd.f32 1.0, %v2846_v12 }
 0x9b9   : > { %2847 = vrcp.f32 %v2067_v15 }
 0x9c3   : > { %v2848_v16 = vpop.eup %2847 }
 0x9c4   : > { %v2070_v11 = vmul.f32 %v2848_v16, %v2058_v5 }
 0xa1c   : > { %v2073_v20 = vpop.permute.xlu1 %2072 }
 0xa1d   : > { %v2075_v8 = vmul.f32 %v2073_v20, %v2070_v11 }
 0xa1f   : > { %v2076_v21 = vpack.c.bf16 %v2075_v8, %v2075_v8 }
 0xa21   : > { %2600 = vmatmul.mubr.msk.bf16.vlgmr.msra.gmra.mrb[28].mxu1 %vm2109_vm8, %v2076_v21 }
 0xaf4   : > { %v2147_v14 = vpop.f32.mrb[28].mxu1 }
 0xaf5   : > { %v2153_v43 = vadd.f32 %v2147_v14, %v1985_v52  ;;  %v2601_v22 = vpop.f32.mrb[29].mxu1 }
 0xaf6   : > { %v2150_v23 = vpop.f32.mrb[30].mxu1 }
 0xaf7   : > { %v2602_v17 = vpop.f32.mrb[31].mxu1  ;;  %2154 = vst.msk [vmem:[%s694_s8] sm:$0xff] %vm703_vm0, %v2153_v43 }
 0xaf8   : > { %3230 = shalt.err (!%p3227_p12)
}
 0xaf9   : > { %s3231_s6 = scalar_lea.hbm %s4181_s25, 128  ;;  %s3235_s4 = scalar_lea.hbm %s4308_s24, 256 }
 0xafa   : > { %p3232_p13 = scmp.ne.s32.totalorder %s4181_s25, %s3231_s6  ;;  %p3236_p5 = scmp.lt.u32.totalorder %s4181_s25, %s4308_s24 }
 0xafb   : > { %p3237_p2 = scmp.lt.u32.totalorder %s3235_s4, %s3231_s6  ;;  %p3239_p11 = scmp.lt.u32.totalorder %s3231_s6, %s4181_s25 }
 0xafc   : > { %p3233_p0 = pnand %p3232_p13, %p4309_p6 }
 0xafd   : > { %p3238_p4 = por %p3237_p2, %p3236_p5 }
 0xafe   : > { %p3234_p7 = pneg %p3233_p0 }
 0xaff   : > { %p3240_p10 = por %p3239_p11, %p3238_p4 }
 0xb01   : > { %p3241_p1 = pnand %p3240_p10, %p3234_p7 }
 0xb03   : > { %3244 = shalt.err (!%p3241_p1)
}
 0xb04   : > { %2651 = dma.vmem_to_hbm [thread:$0]  (%p4309_p6), %s4183_s17, 128, %s4181_s25, %s2156_s3  }
 0xb05 PF: > { %s4310_s8 = sld [smem:[#allocation39_spill]]  ;;  %p4311_p9 = scmp.ne.s32.totalorder %s4286_s21, 0 }
 0xb06   : > { %p4312_p8 = scmp.ge.s32.totalorder %s3327_s30, 2 }
 0xb08   : > { %p2695_p3 = pnand %p4312_p8, %p4311_p9 }
 0xb0b   : > { %s2182_s15 = sand.u32 1, %s4310_s8  }
 0xb0c   : > { %s2183_s18 = scalar_lea.sflag [#allocation10], %s2182_s15 }
 0xb0d   : > { %3302 = dma.done.wait (!%p2695_p3), %s2183_s18, 128  }
 0xb0e   : > { %3304 = vsyncadd (!%p2695_p3), %s2183_s18, 4294967168  ;;  %s37_s30 = sadd.s32 1, %s3327_s30   ;;  %s4313_s16 = smov %s4320_s28 }
 0xb0f   : > { %p34_p12 = scmp.ge.s32.totalorder %s37_s30, 4   ;;  %s4314_s25 = smov %s3311_s26 }
 0xb10   : > { %s4315_s26 = smov %s3315_s27  ;;  %s4316_s27 = smov %s3749_s0 }
 0xb11   : > { %s4317_s28 = smov %s3323_s29  ;;  %s4318_s29 = smov %s4313_s16 }
 0xb12   :  { %36 = sbr.rel (!%p34_p12) target bundleno = 24 (0x18), region = 220 }
 0xb19   :  { %2188 = vsyncpa [#allocation9], 1 }
 0xb1a   :  { %2190 = vsyncpa [#allocation9 + $0x1], 1 }
 0xb1b   :  { %2191 = vsyncpa [#allocation12], 1 }
 0xb1c   :  { %2193 = vsyncpa [#allocation12 + $0x1], 1 }
 0xb1d   :  { %2194 = vsyncpa [#allocation15], 1 }
 0xb1e   :  { %2195 = vsyncpa [#allocation18], 1 }
 0xb1f   :  { %2196 = vsyncpa [#allocation21], 1 }
 0xb20   :  { %2197 = vsyncpa [#allocation24], 1 }
 0xb21   :  { %2198 = vsyncpa [#allocation27], 1 }
 0xb22   :  { %2199 = vsyncpa [#allocation10], 1 }
 0xb23   :  { %2201 = vsyncpa [#allocation10 + $0x1], 1 }

// kernel: tpu_custom_call.1
= control target key start
LH: loop header
LB: loop body
LE: loop exit
PB: predicated region body
PF: predicated region fallthrough
CT: control target
= control target key end

     0   :  { %s4231_s0 = inlined_call_operand.hbm [shape: f32[2,8,32], index: 0, kind: input, shape index: {}]   ;;  %s4232_s1 = inlined_call_operand.hbm [shape: f32[2,8,32], index: 1, kind: input, shape index: {}]   ;;  %s4233_s2 = inlined_call_operand.hbm [shape: bf16[32,32], index: 2, kind: input, shape index: {}]   ;;  %s4234_s3 = inlined_call_operand.hbm [shape: bf16[32,64], index: 3, kind: input, shape index: {}]   ;;  %s4235_s4 = inlined_call_operand.hbm [shape: bf16[4,8,32], index: 4, kind: input, shape index: {}]   ;;  %s4236_s5 = inlined_call_operand.hbm [shape: bf16[32,128], index: 5, kind: input, shape index: {}]   ;;  %s4237_s6 = inlined_call_operand.hbm [shape: bf16[64,32], index: 6, kind: input, shape index: {}]   ;;  %s4238_s7 = inlined_call_operand.hbm [shape: f32[1,32], index: 7, kind: input, shape index: {}]   ;;  %s4239_s8 = inlined_call_operand.hbm [shape: f32[1,32], index: 8, kind: input, shape index: {}]   ;;  %s4240_s9 = inlined_call_operand.hbm [shape: f32[8,4], index: 9, kind: input, shape index: {}]   ;;  %s4241_s10 = inlined_call_operand.hbm [shape: f32[8,4], index: 10, kind: input, shape index: {}]   ;;  %s4242_s11 = inlined_call_operand.hbm [shape: f32[8,4], index: 11, kind: input, shape index: {}]   ;;  %s4243_s12 = inlined_call_operand.hbm [shape: f32[8,4], index: 12, kind: input, shape index: {}]   ;;  %s4244_s13 = inlined_call_operand.hbm [shape: f32[2,8,32], index: 13, kind: output, shape index: {}]  }
   0x1   :  { %4256 = sst [smem:[#allocation43_spill]] %s4231_s0 }
   0x2   :  { %4257 = sst [smem:[#allocation44_spill]] %s4232_s1 }
   0x3   :  { %4258 = sst [smem:[#allocation45_spill]] %s4233_s2 }
   0x4   :  { %4259 = sst [smem:[#allocation46_spill]] %s4234_s3 }
   0x5   :  { %4260 = sst [smem:[#allocation47_spill]] %s4235_s4 }
   0x6   :  { %4261 = sst [smem:[#allocation48_spill]] %s4236_s5 }
   0x7   :  { %4262 = sst [smem:[#allocation49_spill]] %s4237_s6 }
   0x8   :  { %4263 = sst [smem:[#allocation50_spill]] %s4238_s7 }
   0x9   :  { %4264 = sst [smem:[#allocation51_spill]] %s4239_s8 }
   0xa   :  { %4265 = sst [smem:[#allocation52_spill]] %s4244_s13 }
   0xb   :  { %18 = vsyncpa [#allocation9], 0 }
   0xc   :  { %20 = vsyncpa [#allocation9 + $0x1], 0 }
   0xd   :  { %21 = vsyncpa [#allocation12], 0 }
   0xe   :  { %23 = vsyncpa [#allocation12 + $0x1], 0 }
   0xf   :  { %24 = vsyncpa [#allocation15], 0 }
  0x10   :  { %25 = vsyncpa [#allocation18], 0 }
  0x11   :  { %26 = vsyncpa [#allocation21], 0 }
  0x12   :  { %27 = vsyncpa [#allocation24], 0 }
  0x13   :  { %28 = vsyncpa [#allocation27], 0 }
  0x14   :  { %29 = vsyncpa [#allocation10], 0 }
  0x15   :  { %31 = vsyncpa [#allocation10 + $0x1], 0  ;;  %s3435_s25 = smov 0   ;;  %s3437_s26 = smov 0  }
  0x16   :  { %s3439_s27 = smov 0   ;;  %s3441_s28 = smov 0  }
  0x17   :  { %s3443_s29 = smov 0   ;;  %s3445_s30 = smov 0  }
  0x18 LB: > { %4266 = sst [smem:[#allocation39_spill]] %s3307_s25  ;;  %s3466_s14 = sadd.s32 4294967295, %s3327_s30   ;;  %s3327_s30 = sphi %s3445_s30, %s37_s30   ;;  %s3323_s29 = sphi %s3443_s29, %s4318_s29   ;;  %s3319_s28 = sphi %s3441_s28, %s4317_s28   ;;  %s3315_s27 = sphi %s3439_s27, %s4316_s27   ;;  %s3311_s26 = sphi %s3437_s26, %s4315_s26   ;;  %s3307_s25 = sphi %s3435_s25, %s4314_s25  }
  0x19   : > { %4267 = sst [smem:[#allocation40_spill]] %s3319_s28  ;;  %p2391_p0 = scmp.ge.s32.totalorder %s3327_s30, 1 }
  0x1a   : > { %4268 = sst [smem:[#allocation41_spill]] %s3466_s14  ;;  %p4252_p1 = scmp.eq.s32.totalorder %s3466_s14, 0 }
  0x1b   : > { %p396_p2 = scmp.lt.s32.totalorder %s3327_s30, 3  ;;  %s3329_s16 = smov [#allocation13]  }
  0x1c   : > { %s408_s17 = sshll.u32 %s3329_s16, 4  ;;  %s3330_s19 = smov [#allocation14]   ;;  %s3475_s17 = int_to_ptr.vmem [resolvable:$true] %s408_s17 }
  0x1d   : > { %p3471_p3 = pnand %p2391_p0, %p396_p2  ;;  %s421_s20 = sshll.u32 %s3330_s19, 4  ;;  %s3486_s20 = int_to_ptr.vmem [resolvable:$true] %s421_s20 }
  0x1e   : > { %s3331_s21 = smov [#allocation17]   ;;  %s4272_s2 = sld [smem:[#allocation45_spill]] }
  0x1f   : > { %s4269_s15 = scalar_select %p3471_p3, 1, 0 }
  0x20   : > { %p2653_p4 = pneg %p3471_p3  ;;  %s3488_s22 = sshll.u32 %s3331_s21, 4  ;;  %s448_s22 = int_to_ptr.vmem [resolvable:$true] %s3488_s22 }
  0x21   : > { %4270 = sst [smem:[#allocation42_spill]] %s4269_s15 }
  0x22   : > { %p3482_p6 = pnand %p2653_p4, %p4252_p1 }
  0x24   : > { %s2849_s16 = scalar_lea.hbm %s4272_s2, 256  ;;  %p3498_p8 = pneg %p3482_p6 }
  0x25   : > { %p2850_p7 = scmp.ne.s32.totalorder %s4272_s2, %s2849_s16  ;;  %p2856_p11 = scmp.lt.u32.totalorder %s2849_s16, %s4272_s2 }
  0x27   : > { %p2852_p9 = pnand %p3498_p8, %p2850_p7 }
  0x29   : > { %p2853_p10 = pneg %p2852_p9 }
  0x2b   : > { %p2858_p12 = pnand %p2856_p11, %p2853_p10 }
  0x2d   : > { %2861 = shalt.err (!%p2858_p12)
}
  0x2e   : > { %s2862_s13 = scalar_lea.vmem %s3475_s17, 256  ;;  %p2870_p4 = scmp.lt.s32.totalorder %s3475_s17, %s3475_s17 }
  0x2f   : > { %p2863_p13 = scmp.ne.s32.totalorder %s3475_s17, %s2862_s13  ;;  %p2871_p5 = scmp.lt.s32.totalorder %s2862_s13, %s2862_s13 }
  0x31   : > { %p2865_p0 = pnand %p2863_p13, %p3498_p8  ;;  %p2872_p7 = por %p2871_p5, %p2870_p4 }
  0x33   : > { %p2866_p2 = pneg %p2865_p0 }
  0x35   : > { %p2873_p9 = pnand %p2872_p7, %p2866_p2 }
  0x37   : > { %2876 = shalt.err (!%p2873_p9)
}
  0x38   : > { %s3332_s28 = smov 64   ;;  %s3333_s23 = smov 4  }
  0x39   : > { %2656 = dma.hbm_to_vmem [thread:$0]  (!%p3482_p6), %s4272_s2, 256, %s3475_s17, [#allocation12], %s3332_s28, %s3332_s28, %s3333_s23  }
  0x3a   : > { %s4274_s3 = sld [smem:[#allocation46_spill]] }
  0x40   : > { %s2877_s13 = scalar_lea.hbm %s4274_s3, 256 }
  0x41   : > { %p2878_p5 = scmp.ne.s32.totalorder %s4274_s3, %s2877_s13  ;;  %p2884_p12 = scmp.lt.u32.totalorder %s2877_s13, %s4274_s3 }
  0x43   : > { %p2880_p10 = pnand %p2878_p5, %p3498_p8 }
  0x45   : > { %p2881_p11 = pneg %p2880_p10 }
  0x47   : > { %p2886_p13 = pnand %p2884_p12, %p2881_p11 }
  0x49   : > { %2889 = shalt.err (!%p2886_p13)
}
  0x4a   : > { %s2890_s17 = scalar_lea.vmem %s3486_s20, 256  ;;  %p2898_p7 = scmp.lt.s32.totalorder %s3486_s20, %s3486_s20 }
  0x4b   : > { %p2891_p0 = scmp.ne.s32.totalorder %s3486_s20, %s2890_s17  ;;  %p2899_p9 = scmp.lt.s32.totalorder %s2890_s17, %s2890_s17 }
  0x4d   : > { %p2893_p2 = pnand %p2891_p0, %p3498_p8  ;;  %p2900_p5 = por %p2899_p9, %p2898_p7 }
  0x4f   : > { %p2894_p4 = pneg %p2893_p2 }
  0x51   : > { %p2901_p10 = pnand %p2900_p5, %p2894_p4 }
  0x53   : > { %2904 = shalt.err (!%p2901_p10)
}
  0x54   : > { %2659 = dma.hbm_to_vmem [thread:$0]  (!%p3482_p6), %s4274_s3, 256, %s3486_s20, [#allocation15], %s3332_s28, %s3332_s28, %s3333_s23  }
  0x55   : > { %s4275_s5 = sld [smem:[#allocation48_spill]] }
  0x5b   : > { %s2905_s24 = scalar_lea.hbm %s4275_s5, 256 }
  0x5c   : > { %p2906_p11 = scmp.ne.s32.totalorder %s4275_s5, %s2905_s24  ;;  %p2912_p0 = scmp.lt.u32.totalorder %s2905_s24, %s4275_s5 }
  0x5e   : > { %p2908_p12 = pnand %p2906_p11, %p3498_p8 }
  0x60   : > { %p2909_p13 = pneg %p2908_p12 }
  0x62   : > { %p2914_p2 = pnand %p2912_p0, %p2909_p13 }
  0x64   : > { %2917 = shalt.err (!%p2914_p2)
}
  0x65   : > { %s2918_s17 = scalar_lea.vmem %s448_s22, 256  ;;  %p2926_p5 = scmp.lt.s32.totalorder %s448_s22, %s448_s22 }
  0x66   : > { %p2919_p4 = scmp.ne.s32.totalorder %s448_s22, %s2918_s17  ;;  %p2927_p10 = scmp.lt.s32.totalorder %s2918_s17, %s2918_s17 }
  0x68   : > { %p2921_p7 = pnand %p2919_p4, %p3498_p8  ;;  %p2928_p1 = por %p2927_p10, %p2926_p5 }
  0x6a   : > { %p2922_p9 = pneg %p2921_p7 }
  0x6c   : > { %p2929_p3 = pnand %p2928_p1, %p2922_p9 }
  0x6e   : > { %2932 = shalt.err (!%p2929_p3)
}
  0x6f   : > { %2665 = dma.hbm_to_vmem [thread:$0]  (!%p3482_p6), %s4275_s5, 256, %s448_s22, [#allocation18], %s3332_s28, %s3332_s28, %s3333_s23  }
  0x70   : > { %s3334_s1 = smov [#allocation20]   ;;  %s3335_s14 = smov [#allocation23]  }
  0x71   : > { %s474_s25 = sshll.u32 %s3334_s1, 4  ;;  %s498_s24 = sshll.u32 %s3335_s14, 4  ;;  %s475_s25 = int_to_ptr.vmem [resolvable:$true] %s474_s25  ;;  %s499_s24 = int_to_ptr.vmem [resolvable:$true] %s498_s24 }
  0x72   : > { %s4276_s7 = sld [smem:[#allocation50_spill]] }
  0x78   : > { %s2933_s21 = scalar_lea.hbm %s4276_s7, 16 }
  0x79   : > { %p2934_p1 = scmp.ne.s32.totalorder %s4276_s7, %s2933_s21  ;;  %p2940_p12 = scmp.lt.u32.totalorder %s2933_s21, %s4276_s7 }
  0x7b   : > { %p2936_p3 = pnand %p2934_p1, %p3498_p8 }
  0x7d   : > { %p2937_p11 = pneg %p2936_p3 }
  0x7f   : > { %p2942_p13 = pnand %p2940_p12, %p2937_p11 }
  0x81   : > { %2945 = shalt.err (!%p2942_p13)
}
  0x82   : > { %s2946_s22 = scalar_lea.vmem %s475_s25, 16  ;;  %s2953_s0 = scalar_lea.vmem %s475_s25, 32 }
  0x83   : > { %p2947_p0 = scmp.ne.s32.totalorder %s475_s25, %s2946_s22  ;;  %p2954_p7 = scmp.lt.s32.totalorder %s475_s25, %s475_s25 }
  0x84   : > { %p2955_p9 = scmp.lt.s32.totalorder %s2953_s0, %s2946_s22 }
  0x85   : > { %p2949_p2 = pnand %p2947_p0, %p3498_p8 }
  0x86   : > { %p2956_p5 = por %p2955_p9, %p2954_p7 }
  0x87   : > { %p2950_p4 = pneg %p2949_p2 }
  0x89   : > { %p2957_p10 = pnand %p2956_p5, %p2950_p4 }
  0x8b   : > { %2960 = shalt.err (!%p2957_p10)
}
  0x8c   : > { %2671 = dma.hbm_to_vmem [thread:$0]  (!%p3482_p6), %s4276_s7, 16, %s475_s25, [#allocation21]  }
  0x8d   : > { %s2961_s19 = scalar_lea.hbm %s4240_s9, 128 }
  0x8e   : > { %p2962_p1 = scmp.ne.s32.totalorder %s4240_s9, %s2961_s19  ;;  %p2968_p12 = scmp.lt.u32.totalorder %s2961_s19, %s4240_s9 }
  0x90   : > { %p2964_p3 = pnand %p2962_p1, %p3498_p8 }
  0x92   : > { %p2965_p11 = pneg %p2964_p3 }
  0x94   : > { %p2970_p13 = pnand %p2968_p12, %p2965_p11 }
  0x96   : > { %2973 = shalt.err (!%p2970_p13)
}
  0x97   : > { %s2974_s22 = scalar_lea.vmem %s499_s24, 128  ;;  %p2982_p7 = scmp.lt.s32.totalorder %s499_s24, %s499_s24 }
  0x98   : > { %p2975_p0 = scmp.ne.s32.totalorder %s499_s24, %s2974_s22  ;;  %p2983_p9 = scmp.lt.s32.totalorder %s2974_s22, %s2974_s22 }
  0x9a   : > { %p2977_p2 = pnand %p2975_p0, %p3498_p8  ;;  %p2984_p5 = por %p2983_p9, %p2982_p7 }
  0x9c   : > { %p2978_p4 = pneg %p2977_p2 }
  0x9e   : > { %p2985_p10 = pnand %p2984_p5, %p2978_p4 }
  0xa0   : > { %2988 = shalt.err (!%p2985_p10)
}
  0xa1   : > { %2677 = dma.hbm_to_vmem [thread:$0]  (!%p3482_p6), %s4240_s9, 128, %s499_s24, [#allocation24]  }
  0xa2   : > { %s3336_s1 = smov [#allocation26]   ;;  %s3337_s2 = smov [#allocation16]  }
  0xa3   : > { %s524_s14 = sshll.u32 %s3336_s1, 4  ;;  %s434_s16 = sshll.u32 %s3337_s2, 4  ;;  %s525_s14 = int_to_ptr.vmem [resolvable:$true] %s524_s14  ;;  %s435_s16 = int_to_ptr.vmem [resolvable:$true] %s434_s16 }
  0xa4   : > { %s2989_s13 = scalar_lea.hbm %s4242_s11, 128 }
  0xa5   : > { %p2990_p1 = scmp.ne.s32.totalorder %s4242_s11, %s2989_s13  ;;  %p2996_p12 = scmp.lt.u32.totalorder %s2989_s13, %s4242_s11 }
  0xa7   : > { %p2992_p3 = pnand %p2990_p1, %p3498_p8 }
  0xa9   : > { %p2993_p11 = pneg %p2992_p3 }
  0xab   : > { %p2998_p13 = pnand %p2996_p12, %p2993_p11 }
  0xad   : > { %3001 = shalt.err (!%p2998_p13)
}
  0xae   : > { %s3002_s24 = scalar_lea.vmem %s525_s14, 128  ;;  %p3010_p7 = scmp.lt.s32.totalorder %s525_s14, %s525_s14 }
  0xaf   : > { %p3003_p0 = scmp.ne.s32.totalorder %s525_s14, %s3002_s24  ;;  %p3011_p9 = scmp.lt.s32.totalorder %s3002_s24, %s3002_s24 }
  0xb1   : > { %p3005_p2 = pnand %p3003_p0, %p3498_p8  ;;  %p3012_p5 = por %p3011_p9, %p3010_p7 }
  0xb3   : > { %p3006_p4 = pneg %p3005_p2 }
  0xb5   : > { %p3013_p10 = pnand %p3012_p5, %p3006_p4 }
  0xb7   : > { %3016 = shalt.err (!%p3013_p10)
}
  0xb8   : > { %2683 = dma.hbm_to_vmem [thread:$0]  (!%p3482_p6), %s4242_s11, 128, %s525_s14, [#allocation27]  }
  0xb9   : > { %s4277_s4 = sld [smem:[#allocation47_spill]] }
  0xbf   : > { %s3017_s21 = scalar_lea.hbm %s4277_s4, 256 }
  0xc0   : > { %p3018_p1 = scmp.ne.s32.totalorder %s4277_s4, %s3017_s21  ;;  %p3024_p12 = scmp.lt.u32.totalorder %s3017_s21, %s4277_s4 }
  0xc2   : > { %p3020_p3 = pnand %p3018_p1, %p3498_p8 }
  0xc4   : > { %p3021_p11 = pneg %p3020_p3 }
  0xc6   : > { %p3026_p13 = pnand %p3024_p12, %p3021_p11 }
  0xc8   : > { %3029 = shalt.err (!%p3026_p13)
}
  0xc9   : > { %s3030_s25 = scalar_lea.vmem %s435_s16, 256  ;;  %p3038_p7 = scmp.lt.s32.totalorder %s435_s16, %s435_s16 }
  0xca   : > { %p3031_p0 = scmp.ne.s32.totalorder %s435_s16, %s3030_s25  ;;  %p3039_p9 = scmp.lt.s32.totalorder %s3030_s25, %s3030_s25 }
  0xcc   : > { %p3033_p2 = pnand %p3031_p0, %p3498_p8  ;;  %p3040_p5 = por %p3039_p9, %p3038_p7 }
  0xce   : > { %p3034_p4 = pneg %p3033_p2 }
  0xd0   : > { %p3041_p10 = pnand %p3040_p5, %p3034_p4 }
  0xd2   : > { %3044 = shalt.err (!%p3041_p10)
}
  0xd3   : > { %2662 = dma.hbm_to_vmem [thread:$0]  (!%p3482_p6), %s4277_s4, 256, %s435_s16, [#allocation15], %s3332_s28, %s3332_s28, %s3333_s23  }
  0xd4   : > { %s3338_s0 = smov [#allocation19]   ;;  %s3339_s2 = smov [#allocation22]  }
  0xd5   : > { %s460_s1 = sshll.u32 %s3338_s0, 4  ;;  %s485_s19 = sshll.u32 %s3339_s2, 4  ;;  %s461_s1 = int_to_ptr.vmem [resolvable:$true] %s460_s1  ;;  %s486_s19 = int_to_ptr.vmem [resolvable:$true] %s485_s19 }
  0xd6   : > { %s4278_s6 = sld [smem:[#allocation49_spill]] }
  0xdc   : > { %s3045_s17 = scalar_lea.hbm %s4278_s6, 512 }
  0xdd   : > { %p3046_p1 = scmp.ne.s32.totalorder %s4278_s6, %s3045_s17  ;;  %p3052_p12 = scmp.lt.u32.totalorder %s3045_s17, %s4278_s6 }
  0xdf   : > { %p3048_p3 = pnand %p3046_p1, %p3498_p8 }
  0xe1   : > { %p3049_p11 = pneg %p3048_p3 }
  0xe3   : > { %p3054_p13 = pnand %p3052_p12, %p3049_p11 }
  0xe5   : > { %3057 = shalt.err (!%p3054_p13)
}
  0xe6   : > { %s3058_s16 = scalar_lea.vmem %s461_s1, 512  ;;  %p3066_p7 = scmp.lt.s32.totalorder %s461_s1, %s461_s1 }
  0xe7   : > { %p3059_p0 = scmp.ne.s32.totalorder %s461_s1, %s3058_s16  ;;  %p3067_p9 = scmp.lt.s32.totalorder %s3058_s16, %s3058_s16 }
  0xe9   : > { %p3061_p2 = pnand %p3059_p0, %p3498_p8  ;;  %p3068_p5 = por %p3067_p9, %p3066_p7 }
  0xeb   : > { %p3062_p4 = pneg %p3061_p2 }
  0xed   : > { %p3069_p10 = pnand %p3068_p5, %p3062_p4 }
  0xef   : > { %3072 = shalt.err (!%p3069_p10)
}
  0xf0   : > { %2668 = dma.hbm_to_vmem [thread:$0]  (!%p3482_p6), %s4278_s6, 512, %s461_s1, [#allocation18], %s3332_s28, %s3332_s28, %s3333_s23  }
  0xf1   : > { %s4279_s8 = sld [smem:[#allocation51_spill]] }
  0xf7   : > { %s3073_s13 = scalar_lea.hbm %s4279_s8, 16 }
  0xf8   : > { %p3074_p1 = scmp.ne.s32.totalorder %s4279_s8, %s3073_s13  ;;  %p3080_p12 = scmp.lt.u32.totalorder %s3073_s13, %s4279_s8 }
  0xfa   : > { %p3076_p3 = pnand %p3074_p1, %p3498_p8 }
  0xfc   : > { %p3077_p11 = pneg %p3076_p3 }
  0xfe   : > { %p3082_p13 = pnand %p3080_p12, %p3077_p11 }
 0x100   : > { %3085 = shalt.err (!%p3082_p13)
}
 0x101   : > { %s3086_s14 = scalar_lea.vmem %s486_s19, 16  ;;  %s3093_s28 = scalar_lea.vmem %s486_s19, 32 }
 0x102   : > { %p3087_p0 = scmp.ne.s32.totalorder %s486_s19, %s3086_s14  ;;  %p3094_p7 = scmp.lt.s32.totalorder %s486_s19, %s486_s19 }
 0x103   : > { %p3095_p9 = scmp.lt.s32.totalorder %s3093_s28, %s3086_s14 }
 0x104   : > { %p3089_p2 = pnand %p3087_p0, %p3498_p8 }
 0x105   : > { %p3096_p5 = por %p3095_p9, %p3094_p7 }
 0x106   : > { %p3090_p4 = pneg %p3089_p2 }
 0x108   : > { %p3097_p10 = pnand %p3096_p5, %p3090_p4 }
 0x10a   : > { %3100 = shalt.err (!%p3097_p10)
}
 0x10b   : > { %2674 = dma.hbm_to_vmem [thread:$0]  (!%p3482_p6), %s4279_s8, 16, %s486_s19, [#allocation21]  }
 0x10c   : > { %s3340_s16 = smov [#allocation25]   ;;  %s3341_s0 = smov [#allocation28]  }
 0x10d   : > { %s511_s24 = sshll.u32 %s3340_s16, 4  ;;  %s537_s2 = sshll.u32 %s3341_s0, 4  ;;  %s512_s24 = int_to_ptr.vmem [resolvable:$true] %s511_s24  ;;  %s538_s2 = int_to_ptr.vmem [resolvable:$true] %s537_s2 }
 0x10e   : > { %s3101_s17 = scalar_lea.hbm %s4241_s10, 128 }
 0x10f   : > { %p3102_p1 = scmp.ne.s32.totalorder %s4241_s10, %s3101_s17  ;;  %p3108_p12 = scmp.lt.u32.totalorder %s3101_s17, %s4241_s10 }
 0x111   : > { %p3104_p3 = pnand %p3102_p1, %p3498_p8 }
 0x113   : > { %p3105_p11 = pneg %p3104_p3 }
 0x115   : > { %p3110_p13 = pnand %p3108_p12, %p3105_p11 }
 0x117   : > { %3113 = shalt.err (!%p3110_p13)
}
 0x118   : > { %s3114_s19 = scalar_lea.vmem %s512_s24, 128  ;;  %p3122_p7 = scmp.lt.s32.totalorder %s512_s24, %s512_s24 }
 0x119   : > { %p3115_p0 = scmp.ne.s32.totalorder %s512_s24, %s3114_s19  ;;  %p3123_p9 = scmp.lt.s32.totalorder %s3114_s19, %s3114_s19 }
 0x11b   : > { %p3117_p2 = pnand %p3115_p0, %p3498_p8  ;;  %p3124_p5 = por %p3123_p9, %p3122_p7 }
 0x11d   : > { %p3118_p4 = pneg %p3117_p2 }
 0x11f   : > { %p3125_p10 = pnand %p3124_p5, %p3118_p4 }
 0x121   : > { %3128 = shalt.err (!%p3125_p10)
}
 0x122   : > { %2680 = dma.hbm_to_vmem [thread:$0]  (!%p3482_p6), %s4241_s10, 128, %s512_s24, [#allocation24]  }
 0x123   : > { %s3129_s0 = scalar_lea.hbm %s4243_s12, 128 }
 0x124   : > { %p3130_p1 = scmp.ne.s32.totalorder %s4243_s12, %s3129_s0  ;;  %p3136_p12 = scmp.lt.u32.totalorder %s3129_s0, %s4243_s12 }
 0x126   : > { %p3132_p3 = pnand %p3130_p1, %p3498_p8 }
 0x128   : > { %p3133_p11 = pneg %p3132_p3 }
 0x12a   : > { %p3138_p13 = pnand %p3136_p12, %p3133_p11 }
 0x12c   : > { %3141 = shalt.err (!%p3138_p13)
}
 0x12d   : > { %s3142_s22 = scalar_lea.vmem %s538_s2, 128  ;;  %p3150_p7 = scmp.lt.s32.totalorder %s538_s2, %s538_s2 }
 0x12e   : > { %p3143_p0 = scmp.ne.s32.totalorder %s538_s2, %s3142_s22  ;;  %p3151_p9 = scmp.lt.s32.totalorder %s3142_s22, %s3142_s22 }
 0x130   : > { %p3145_p2 = pnand %p3143_p0, %p3498_p8  ;;  %p3152_p5 = por %p3151_p9, %p3150_p7 }
 0x132   : > { %p3146_p4 = pneg %p3145_p2 }
 0x134   : > { %p3153_p10 = pnand %p3152_p5, %p3146_p4 }
 0x136   : > { %3156 = shalt.err (!%p3153_p10)
}
 0x137   : > { %s4280_s14 = sld [smem:[#allocation39_spill]]  ;;  %s4281_s15 = sld [smem:[#allocation41_spill]] }
 0x138   : > { %2686 = dma.hbm_to_vmem [thread:$0]  (!%p3482_p6), %s4243_s12, 128, %s538_s2, [#allocation27]  }
 0x139   : > { %s2390_s19 = sadd.s32 4294967294, %s3327_s30   ;;  %s56_s28 = sadd.s32 1, %s3323_s29 }
 0x13a   : > { %s65_s18 = sadd.s32 1, %s3315_s27  ;;  %p58_p8 = scmp.ge.s32.totalorder %s56_s28, 2 }
 0x13b   : > { %p72_p1 = scmp.ne.s32.totalorder %s3315_s27, %s3311_s26  ;;  %p73_p3 = scmp.eq.s32.totalorder %s3327_s30, 0 }
 0x13c   : > { %s4320_s28 = smov (%p58_p8, %s56_s28), 0  ;;  %p389_p4 = scmp.eq.s32.totalorder %s2390_s19, 1 }
 0x13d   : > { %p78_p11 = scmp.ne.s32.totalorder %s3311_s26, %s4280_s14  ;;  %p3730_p12 = por %p73_p3, %p72_p1 }
 0x13e   : > { %p4283_p13 = scmp.eq.s32.totalorder %s4281_s15, 0  ;;  %s60_s1 = ssub.s32 %s3323_s29, %s4320_s28 }
 0x13f   : > { %p383_p0 = scmp.eq.s32.totalorder %s4281_s15, 1  ;;  %p63_p2 = scmp.eq.s32.totalorder %s60_s1, 0 }
 0x140   : > { %p3736_p6 = por %p4283_p13, %p78_p11  ;;  %p2709_p9 = scmp.lt.s32.totalorder %s3327_s30, 2 }
 0x141   : > { %p3743_p7 = por %p383_p0, %p72_p1  ;;  %p3751_p5 = por %p389_p4, %p78_p11 }
 0x142   : > { %s4284_s2 = scalar_select %p3736_p6, 1, 0 }
 0x143   : > { %s4285_s16 = scalar_select %p3743_p7, 1, 0 }
 0x144   : > { %s3749_s0 = scalar_select %p63_p2, %s3315_s27, %s65_s18  }
 0x145   : > { %s4286_s21 = scalar_select %p3751_p5, 1, 0 }
 0x146   : > { %s548_s13 = sand.u32 1, %s3315_s27   ;;  %s2405_s20 = sshll.u32 %s3323_s29, 7 }
 0x147   : > { %s3756_s17 = sshll.u32 %s548_s13, 3  ;;  %s4287_s25 = sld [smem:[#allocation43_spill]] }
 0x148   : > { %s552_s19 = scalar_lea.vmem [#allocation8], %s3756_s17  ;;  %p3769_p10 = pnand %p2709_p9, %p3730_p12 }
 0x149   : > { %s560_s18 = sshll.u32 %s552_s19, 4  ;;  %s4290_s5 = sld [smem:[#allocation44_spill]]  ;;  %s3765_s18 = int_to_ptr.vmem [resolvable:$true] %s560_s18 }
 0x14a   : > { %s567_s24 = sand.u32 1, %s3327_s30   ;;  %p3159_p1 = pneg %p3769_p10 }
 0x14d   : > { %s4288_s14 = smov %s4287_s25  ;;  %s3762_s15 = scalar_lea.hbm %s4287_s25, %s2405_s20 }
 0x14e   : > { %s549_s25 = scalar_lea.sflag [#allocation9], %s548_s13  ;;  %s3157_s6 = scalar_lea.hbm %s3762_s15, 128 }
 0x14f   : > { %s3776_s22 = scalar_lea.hbm %s4290_s5, %s2405_s20  ;;  %p3158_p8 = scmp.ne.s32.totalorder %s3762_s15, %s3157_s6 }
 0x150   : > { %s3162_s7 = scalar_lea.hbm %s4288_s14, 256  ;;  %p3163_p12 = scmp.lt.u32.totalorder %s3762_s15, %s4288_s14 }
 0x151   : > { %p3160_p3 = pnand %p3159_p1, %p3158_p8  ;;  %p3164_p13 = scmp.lt.u32.totalorder %s3162_s7, %s3157_s6 }
 0x152   : > { %p3166_p2 = scmp.lt.u32.totalorder %s3157_s6, %s3762_s15 }
 0x153   : > { %p3161_p11 = pneg %p3160_p3  ;;  %p3165_p0 = por %p3164_p13, %p3163_p12 }
 0x155   : > { %p3167_p4 = por %p3166_p2, %p3165_p0 }
 0x157   : > { %p3168_p9 = pnand %p3167_p4, %p3161_p11 }
 0x159   : > { %3171 = shalt.err (!%p3168_p9)
}
 0x15a   : > { %s3172_s4 = scalar_lea.vmem %s3765_s18, 128  ;;  %s3342_s13 = smov [#allocation8]  }
 0x15b   : > { %p3173_p8 = scmp.ne.s32.totalorder %s3765_s18, %s3172_s4  ;;  %s3177_s20 = sshll.u32 %s3342_s13, 4  ;;  %s3178_s20 = int_to_ptr.vmem [resolvable:$false] %s3177_s20 }
 0x15c   : > { %s3179_s8 = scalar_lea.vmem %s3178_s20, 256  ;;  %p3180_p7 = scmp.lt.s32.totalorder %s3765_s18, %s3178_s20 }
 0x15d   : > { %p3175_p3 = pnand %p3173_p8, %p3159_p1  ;;  %p3181_p12 = scmp.lt.s32.totalorder %s3179_s8, %s3172_s4 }
 0x15f   : > { %p3176_p5 = pneg %p3175_p3  ;;  %p3182_p13 = por %p3181_p12, %p3180_p7 }
 0x161   : > { %p3183_p0 = pnand %p3182_p13, %p3176_p5 }
 0x163   : > { %3186 = shalt.err (!%p3183_p0)
}
 0x164   : > { %2690 = dma.hbm_to_vmem [thread:$0]  (!%p3769_p10), %s3762_s15, 128, %s3765_s18, %s549_s25  }
 0x165   : > { %s571_s6 = scalar_lea.vmem [#allocation11], %s3756_s17  ;;  %s568_s23 = scalar_lea.sflag [#allocation12], %s567_s24 }
 0x166   : > { %s579_s7 = sshll.u32 %s571_s6, 4  ;;  %s3187_s19 = scalar_lea.hbm %s3776_s22, 128  ;;  %s580_s7 = int_to_ptr.vmem [resolvable:$true] %s579_s7 }
 0x167   : > { %p3188_p7 = scmp.ne.s32.totalorder %s3776_s22, %s3187_s19  ;;  %s3192_s13 = scalar_lea.hbm %s4290_s5, 256 }
 0x168   : > { %p3193_p2 = scmp.lt.u32.totalorder %s3776_s22, %s4290_s5  ;;  %p3194_p4 = scmp.lt.u32.totalorder %s3192_s13, %s3187_s19 }
 0x169   : > { %p3190_p5 = pnand %p3188_p7, %p3159_p1  ;;  %p3196_p8 = scmp.lt.u32.totalorder %s3187_s19, %s3776_s22 }
 0x16a   : > { %p3195_p9 = por %p3194_p4, %p3193_p2 }
 0x16b   : > { %p3191_p11 = pneg %p3190_p5 }
 0x16c   : > { %p3197_p3 = por %p3196_p8, %p3195_p9 }
 0x16e   : > { %p3198_p12 = pnand %p3197_p3, %p3191_p11 }
 0x170   : > { %3201 = shalt.err (!%p3198_p12)
}
 0x171   : > { %s3202_s17 = scalar_lea.vmem %s580_s7, 128  ;;  %s3343_s15 = smov [#allocation11]  }
 0x172   : > { %p3203_p13 = scmp.ne.s32.totalorder %s580_s7, %s3202_s17  ;;  %s3207_s18 = sshll.u32 %s3343_s15, 4  ;;  %s3208_s18 = int_to_ptr.vmem [resolvable:$false] %s3207_s18 }
 0x173   : > { %s3209_s24 = scalar_lea.vmem %s3208_s18, 256  ;;  %p3210_p5 = scmp.lt.s32.totalorder %s580_s7, %s3208_s18 }
 0x174   : > { %p3205_p0 = pnand %p3203_p13, %p3159_p1  ;;  %p3211_p6 = scmp.lt.s32.totalorder %s3209_s24, %s3202_s17 }
 0x176   : > { %p3206_p7 = pneg %p3205_p0  ;;  %p3212_p2 = por %p3211_p6, %p3210_p5 }
 0x178   : > { %p3213_p4 = pnand %p3212_p2, %p3206_p7 }
 0x17a   : > { %3216 = shalt.err (!%p3213_p4)
}
 0x17b   : > { %2693 = dma.hbm_to_vmem [thread:$0]  (!%p3769_p10), %s3776_s22, 128, %s580_s7, %s568_s23  }
 0x17c   : > { %s4291_s25 = sld [smem:[#allocation42_spill]] }
 0x182   : > { %p4292_p11 = scmp.ne.s32.totalorder %s4291_s25, 0 }
 0x183   : > { %s3829_s6 = sand.u32 (!%p4292_p11), 1, %s3311_s26   ;;  %p4293_p6 = scmp.ne.s32.totalorder (!%p4292_p11), %s4284_s2, 0 }
 0x184   : > { %588 = sbr.rel (%p4292_p11) target bundleno = 2821 (0xb05), region = 72  ;;  %s3832_s19 = sshll.u32 (!%p4292_p11), %s3829_s6, 3 }
 0x185   : > { %s591_s3 = scalar_lea.sflag (!%p4292_p11), [#allocation9], %s3829_s6  ;;  %s594_s4 = scalar_lea.vmem (!%p4292_p11), [#allocation8], %s3832_s19 }
 0x18b   : > { %3270 = dma.done.wait (%p4293_p6), %s591_s3, 128  }
 0x18c   : > { %3272 = vsyncadd (%p4293_p6), %s591_s3, 4294967168  ;;  %s4294_s1 = sld [smem:[#allocation41_spill]]  ;;  %s603_s23 = scalar_lea.vmem [#allocation11], %s3832_s19 }
 0x192   : > { %s599_s22 = sand.u32 1, %s4294_s1  }
 0x193   : > { %s600_s7 = scalar_lea.sflag [#allocation12], %s599_s22 }
 0x194   : > { %3274 = dma.done.wait (%p4293_p6), %s600_s7, 128  }
 0x195   : > { %3276 = vsyncadd (%p4293_p6), %s600_s7, 4294967168  ;;  %p4295_p10 = scmp.eq.s32.totalorder %s4294_s1, 0 }
 0x197   : > { %3278 = dma.done.wait (%p4295_p10), [#allocation12], 256   ;;  %p4296_p1 = pmov %p4295_p10 }
 0x199   : > { %3280 = vsyncadd (%p4296_p1), [#allocation12], 4294967040  ;;  %p4297_p9 = pmov %p4296_p1 }
 0x19a   : > { %p4298_p8 = pmov %p4296_p1 }
 0x19b   : > { %3282 = dma.done.wait (%p4297_p9), [#allocation15], 512  }
 0x19c   : > { %3284 = vsyncadd (%p4298_p8), [#allocation15], 4294966784  ;;  %p4299_p3 = pmov %p4296_p1 }
 0x19d   : > { %p4300_p12 = pmov %p4296_p1 }
 0x19e   : > { %3286 = dma.done.wait (%p4299_p3), [#allocation18], 768  }
 0x19f   : > { %3288 = vsyncadd (%p4300_p12), [#allocation18], 4294966528  ;;  %p4301_p13 = pmov %p4296_p1 }
 0x1a0   : > { %p4302_p0 = pmov %p4296_p1 }
 0x1a1   : > { %3290 = dma.done.wait (%p4301_p13), [#allocation21], 32  }
 0x1a2   : > { %3292 = vsyncadd (%p4302_p0), [#allocation21], 4294967264  ;;  %p4303_p7 = pmov %p4302_p0 }
 0x1a3   : > { %p4304_p5 = pmov %p4302_p0 }
 0x1a4   : > { %3294 = dma.done.wait (%p4303_p7), [#allocation24], 256  }
 0x1a5   : > { %3296 = vsyncadd (%p4304_p5), [#allocation24], 4294967040  ;;  %p4305_p2 = pmov %p4302_p0 }
 0x1a6   : > { %p4306_p4 = pmov %p4302_p0 }
 0x1a7   : > { %3298 = dma.done.wait (%p4305_p2), [#allocation27], 256  }
 0x1a8   : > { %3300 = vsyncadd (%p4306_p4), [#allocation27], 4294967040  ;;  %vm703_vm0 = vcmask 261120   ;;  %v3870_v0 = vld [vmem:[%s603_s23] sm:$0xff]  ;;  %v3874_v1 = vld [vmem:[%s594_s4] sm:$0xff]  ;;  %v3344_v8 = vmov 0.0  }
 0x1a9   : > { %v946_v2 = vmul.f32 %v3870_v0, %v3870_v0  ;;  %v702_v3 = vmul.f32 %v3874_v1, %v3874_v1  ;;  %v2805_v6 = vld [vmem:[#allocation14] sm:$0xff]   ;;  %v2806_v7 = vld [vmem:[#allocation13] sm:$0xff]   ;;  %2503 = vmatprep.subr.bf16.mxu1 %v3344_v8  ;;  %2495 = vmatprep.subr.bf16.mxu0 %v3344_v8  ;;  %v2807_v9 = vld [vmem:[#allocation14 + $0x8] sm:$0xff]   ;;  %vm3345_vm1 = vmmov 0   ;;  %s3346_s2 = smov 12   ;;  %s3347_s13 = smov 8  }
 0x1aa   : > { %2504 = vmatpush3.bf16.msra.mxu1 %v2805_v6  ;;  %2496 = vmatpush3.bf16.msra.mxu0 %v2806_v7  ;;  %v2808_v10 = vld [vmem:[#allocation13 + $0x8] sm:$0xff]   ;;  %v3892_v11 = vld [vmem:[#allocation28] sm:$0xff]  ;;  %s3348_s20 = smov 24   ;;  %s3349_s8 = smov 20   ;;  %v3907_v13 = vld [vmem:[#allocation26] sm:$0xff]  ;;  %vm935_vm2 = vcmask 64512  }
 0x1ab   : > { %v948_v4 = vsel %vm703_vm0, %v946_v2, 0.0  ;;  %v704_v5 = vsel %vm703_vm0, %v702_v3, 0.0  ;;  %2505 = vmatprep.subr.bf16.mxu1 %v3344_v8  ;;  %2507 = vmatprep.mubr.msk.bf16.mxu1 %vm3345_vm1, %v3344_v8  ;;  %v3894_v12 = vld [vmem:[#allocation25] sm:$0xff]  ;;  %s3350_s17 = smov 4   ;;  %s3351_s15 = smov 16   ;;  %v3911_v14 = vld [vmem:[#allocation23] sm:$0xff] }
 0x1ac   : > { %949 = vadd.xlane.f32.xlu0 %v948_v4  ;;  %2497 = vmatprep.subr.bf16.mxu0 %v3344_v8  ;;  %s3352_s18 = smov 28   ;;  %v2427_v22 = vld [vmem:[#allocation20] ss:$0 sm:$0xff]  ;;  %s3353_s24 = smov 124   ;;  %936 = vst.msk [vmem:[#allocation7] sm:$0xff] %vm935_vm2, %v3344_v8  ;;  %937 = vst.msk [vmem:[#allocation7 + $0x8] sm:$0xff] %vm935_vm2, %v3344_v8 }
 0x1ad   : > { %2499 = vmatprep.mubr.msk.bf16.mxu0 %vm3345_vm1, %v3344_v8  ;;  %1061 = vrot.lane.b32.xlu1 %v3892_v11, %s3346_s2  ;;  %938 = vst.msk [vmem:[#allocation7 + $0x10] sm:$0xff] %vm935_vm2, %v3344_v8  ;;  %939 = vst.msk [vmem:[#allocation7 + $0x18] sm:$0xff] %vm935_vm2, %v3344_v8  ;;  %s3354_s25 = smov 120   ;;  %s3355_s3 = smov 112   ;;  %vm793_vm3 = vcmask 31744   ;;  %vm807_vm4 = vcmask 64544  }
 0x1ae   : > { %2506 = vmatpush3.bf16.msra.mxu1 %v2807_v9  ;;  %2498 = vmatpush3.bf16.msra.mxu0 %v2808_v10  ;;  %s3356_s1 = smov 104   ;;  %vm926_vm5 = vcmask 7168   ;;  %s3359_s22 = smov 96   ;;  %vm1282_vm7 = vcmask 1043456   ;;  %vm2109_vm8 = vcmask 523264  }
 0x1af   : > { %2517 = vmatprep.subr.bf16.mxu1 %v3344_v8  ;;  %2511 = vmatprep.subr.bf16.mxu0 %v3344_v8  ;;  %931 = vst.msk [vmem:[#allocation6] sm:$0xff] %vm926_vm5, %v3344_v8  ;;  %932 = vst.msk [vmem:[#allocation6 + $0x8] sm:$0xff] %vm926_vm5, %v3344_v8  ;;  %s3360_s7 = smov 88   ;;  %s3361_s23 = smov 80  }
 0x1b0   : > { %705 = vadd.xlane.f32.xlu0 %v704_v5  ;;  %933 = vst.msk [vmem:[#allocation6 + $0x10] sm:$0xff] %vm926_vm5, %v3344_v8  ;;  %934 = vst.msk [vmem:[#allocation6 + $0x18] sm:$0xff] %vm926_vm5, %v3344_v8  ;;  %p4309_p6 = scmp.ne.s32.totalorder %s4285_s16, 0 }
 0x1b1   : > { %1080 = vrot.lane.b32.xlu1 %v3892_v11, %s3347_s13 }
 0x1b5   : > { %833 = vrot.lane.b32.xlu1 %v3894_v12, %s3347_s13 }
 0x1b9   : > { %1103 = vrot.lane.b32.xlu1 %v3892_v11, %s3349_s8 }
 0x1bd   : > { %1122 = vrot.lane.b32.xlu1 %v3892_v11, %s3351_s15 }
 0x1c1   : > { %852 = vrot.lane.b32.xlu1 %v3894_v12, %s3349_s8 }
 0x1c5   : > { %872 = vrot.lane.b32.xlu1 %v3894_v12, %s3351_s15 }
 0x1c6   : > { %813 = vrot.lane.b32.xlu0 %v3894_v12, %s3346_s2 }
 0x1c9   : > { %1145 = vrot.lane.b32.xlu1 %v3892_v11, %s3352_s18 }
 0x1ca   : > { %1164 = vrot.lane.b32.xlu0 %v3892_v11, %s3348_s20 }
 0x1cd   : > { %891 = vrot.lane.b32.xlu1 %v3894_v12, %s3352_s18 }
 0x1ce   : > { %911 = vrot.lane.b32.xlu0 %v3894_v12, %s3348_s20 }
 0x1d1   : > { %1027 = vrot.lane.b32.xlu1 %v3892_v11, %s3350_s17 }
 0x1d2   : > { %783 = vrot.lane.b32.xlu0 %v3894_v12, %s3350_s17 }
 0x1d5   : > { %1057 = vrot.lane.b32.xlu1 %v3907_v13, %s3347_s13 }
 0x1d6   : > { %1076 = vrot.lane.b32.xlu0 %v3907_v13, %s3346_s2 }
 0x1d9   : > { %809 = vrot.lane.b32.xlu1 %v3911_v14, %s3347_s13  ;;  %s4307_s13 = sld [smem:[#allocation40_spill]] }
 0x1da   : > { %829 = vrot.lane.b32.xlu0 %v3911_v14, %s3346_s2  ;;  %s3362_s2 = smov 72  }
 0x1dd   : > { %848 = vrot.lane.b32.xlu1 %v3911_v14, %s3351_s15 }
 0x1de   : > { %1099 = vrot.lane.b32.xlu0 %v3907_v13, %s3351_s15 }
 0x1e2   : > { %1118 = vrot.lane.b32.xlu0 %v3907_v13, %s3349_s8 }
 0x1e6   : > { %868 = vrot.lane.b32.xlu0 %v3911_v14, %s3349_s8  ;;  %s694_s8 = scalar_lea.vmem [#allocation29], %s3832_s19 }
 0x21f   : > { %v1062_v30 = vpop.permute.xlu1 %1061 }
 0x223   : > { %v1081_v31 = vpop.permute.xlu1 %1080 }
 0x227   : > { %v834_v32 = vpop.permute.xlu1 %833 }
 0x22b   : > { %v1104_v33 = vpop.permute.xlu1 %1103 }
 0x22f   : > { %v1123_v34 = vpop.permute.xlu1 %1122 }
 0x233   : > { %v853_v42 = vpop.permute.xlu1 %852 }
 0x237   : > { %v873_v50 = vpop.permute.xlu1 %872 }
 0x239   : > { %v950_v15 = vpop.xlane.xlu0 %949 }
 0x23a   : > { %v952_v16 = vmul.f32 0.03125, %v950_v15 }
 0x23b   : > { %v1146_v53 = vpop.permute.xlu1 %1145 }
 0x23c   : > { %v953_v17 = vadd.f32 1e-05, %v952_v16 }
 0x23d   : > { %v706_v18 = vpop.xlane.xlu0 %705 }
 0x23e   : > { %2815 = vrsqrt.f32 %v953_v17  ;;  %v708_v19 = vmul.f32 0.03125, %v706_v18 }
 0x23f   : > { %v892_v57 = vpop.permute.xlu1 %891 }
 0x240   : > { %v709_v20 = vadd.f32 1e-05, %v708_v19 }
 0x241   : > { %v814_v40 = vpop.permute.xlu0 %813 }
 0x242   : > { %2817 = vrsqrt.f32 %v709_v20 }
 0x243   : > { %v1028_v61 = vpop.permute.xlu1 %1027 }
 0x245   : > { %v1165_v52 = vpop.permute.xlu0 %1164 }
 0x247   : > { %v1058_v6 = vpop.permute.xlu1 %1057 }
 0x248   : > { %v2816_v21 = vpop.eup %2815 }
 0x249   : > { %v955_v23 = vmul.f32 %v2816_v21, %v3870_v0  ;;  %v912_v58 = vpop.permute.xlu0 %911 }
 0x24b   : > { %v962_v24 = vmul.f32 %v2427_v22, %v955_v23  ;;  %v810_v9 = vpop.permute.xlu1 %809 }
 0x24c   : > { %v2818_v25 = vpop.eup %2817 }
 0x24d   : > { %v963_v26 = vpack.c.bf16 %v962_v24, %v962_v24  ;;  %v711_v27 = vmul.f32 %v2818_v25, %v3874_v1  ;;  %v784_v2 = vpop.permute.xlu0 %783 }
 0x24f   : > { %2508 = vmatmul.mubr.msk.bf16.vlgmr.msra.gmra.mrb[0].mxu1 %vm703_vm0, %v963_v26  ;;  %v718_v28 = vmul.f32 %v2427_v22, %v711_v27 }
 0x250   : > { %2519 = vmatprep.mubr.msk.bf16.mxu1 %vm3345_vm1, %v3344_v8 }
 0x251   : > { %v719_v29 = vpack.c.bf16 %v718_v28, %v718_v28  ;;  %v1077_v4 = vpop.permute.xlu0 %1076 }
 0x253   : > { %2500 = vmatmul.mubr.msk.bf16.vlgmr.msra.gmra.mrb[0].mxu0 %vm703_vm0, %v719_v29 }
 0x254   : > { %2513 = vmatprep.mubr.msk.bf16.mxu0 %vm3345_vm1, %v3344_v8 }
 0x255   : > { %v830_v5 = vpop.permute.xlu0 %829 }
 0x259   : > { %v1100_v7 = vpop.permute.xlu0 %1099 }
 0x25d   : > { %v1119_v10 = vpop.permute.xlu0 %1118 }
 0x261   : > { %v869_v15 = vpop.permute.xlu0 %868 }
 0x322   : > { %v3936_v35 = vpop.f32.mrb[0].mxu1 }
 0x323   : > { %v2509_v36 = vpop.f32.mrb[1].mxu1  ;;  %v1064_v37 = vmul.f32 %v1062_v30, %v3936_v35  ;;  %v1083_v38 = vmul.f32 %v1081_v31, %v3936_v35  ;;  %v1125_v48 = vmul.f32 %v1123_v34, %v3936_v35  ;;  %v1106_v51 = vmul.f32 %v1104_v33, %v3936_v35 }
 0x324   : > { %v1020_v39 = vpop.f32.mrb[2].mxu1  ;;  %v1167_v55 = vmul.f32 %v1165_v52, %v3936_v35  ;;  %v1148_v59 = vmul.f32 %v1146_v53, %v3936_v35  ;;  %v1030_v62 = vmul.f32 %v1028_v61, %v3936_v35  ;;  %v1043_v1 = vmul.f32 %v3892_v11, %v3936_v35 }
 0x325   : > { %v2510_v41 = vpop.f32.mrb[3].mxu1  ;;  %1066 = vrot.lane.b32.xlu1 %v1064_v37, %s3353_s24  ;;  %1085 = vrot.lane.b32.xlu0 %v1083_v38, %s3350_s17  ;;  %v1060_v16 = vmul.f32 %v1058_v6, %v3936_v35  ;;  %v1079_v17 = vmul.f32 %v1077_v4, %v3936_v35  ;;  %v1102_v31 = vmul.f32 %v1100_v7, %v3936_v35 }
 0x326   : > { %v3942_v43 = vpop.f32.mrb[0].mxu0  ;;  %v1121_v36 = vmul.f32 %v1119_v10, %v3936_v35 }
 0x327   : > { %v2501_v44 = vpop.f32.mrb[1].mxu0  ;;  %v816_v45 = vmul.f32 %v814_v40, %v3942_v43  ;;  %v836_v49 = vmul.f32 %v834_v32, %v3942_v43  ;;  %v855_v54 = vmul.f32 %v853_v42, %v3942_v43  ;;  %v875_v56 = vmul.f32 %v873_v50, %v3942_v43 }
 0x328   : > { %v776_v46 = vpop.f32.mrb[2].mxu0  ;;  %v914_v60 = vmul.f32 %v912_v58, %v3942_v43  ;;  %v894_v63 = vmul.f32 %v892_v57, %v3942_v43  ;;  %v800_v0 = vmul.f32 %v3894_v12, %v3942_v43  ;;  %v786_v3 = vmul.f32 %v784_v2, %v3942_v43  ;;  %v849_v12 = vpop.permute.xlu1 %848 }
 0x329   : > { %1141 = vrot.lane.b32.xlu0 %v3907_v13, %s3348_s20  ;;  %v2502_v47 = vpop.f32.mrb[3].mxu0  ;;  %818 = vrot.lane.b32.xlu1 %v816_v45, %s3353_s24  ;;  %v812_v21 = vmul.f32 %v810_v9, %v3942_v43  ;;  %v832_v26 = vmul.f32 %v830_v5, %v3942_v43  ;;  %v851_v37 = vmul.f32 %v849_v12, %v3942_v43 }
 0x32a   : > { %v871_v42 = vmul.f32 %v869_v15, %v3942_v43  ;;  %v781_v9 = vmul.f32 %v3911_v14, %v3942_v43 }
 0x32d   : > { %1127 = vrot.lane.b32.xlu0 %v1125_v48, %s3350_s17  ;;  %838 = vrot.lane.b32.xlu1 %v836_v49, %s3350_s17 }
 0x331   : > { %1160 = vrot.lane.b32.xlu0 %v3907_v13, %s3352_s18  ;;  %1108 = vrot.lane.b32.xlu1 %v1106_v51, %s3353_s24 }
 0x335   : > { %857 = vrot.lane.b32.xlu1 %v855_v54, %s3353_s24  ;;  %1169 = vrot.lane.b32.xlu0 %v1167_v55, %s3350_s17  ;;  %v1025_v55 = vmul.f32 %v3907_v13, %v3936_v35 }
 0x339   : > { %877 = vrot.lane.b32.xlu1 %v875_v56, %s3350_s17  ;;  %907 = vrot.lane.b32.xlu0 %v3911_v14, %s3352_s18 }
 0x33d   : > { %1150 = vrot.lane.b32.xlu1 %v1148_v59, %s3353_s24  ;;  %916 = vrot.lane.b32.xlu0 %v914_v60, %s3350_s17 }
 0x341   : > { %887 = vrot.lane.b32.xlu1 %v3911_v14, %s3348_s20  ;;  %1032 = vrot.lane.b32.xlu0 %v1030_v62, %s3353_s24  ;;  %s2454_s20 = sshll.u32 %s4307_s13, 7 }
 0x345   : > { %896 = vrot.lane.b32.xlu1 %v894_v63, %s3353_s24  ;;  %796 = vrot.lane.b32.xlu0 %v3911_v14, %s3350_s17 }
 0x349   : > { %1039 = vrot.lane.b32.xlu1 %v3907_v13, %s3350_s17  ;;  %802 = vrot.lane.b32.xlu0 %v800_v0, %s3350_s17 }
 0x34d   : > { %1045 = vrot.lane.b32.xlu1 %v1043_v1, %s3350_s17  ;;  %s2170_s17 = sshll.u32 %s694_s8, 4  ;;  %s4183_s17 = int_to_ptr.vmem [resolvable:$true] %s2170_s17 }
 0x34e   : > { %s3217_s19 = scalar_lea.vmem %s4183_s17, 128 }
 0x34f   : > { %p3218_p11 = scmp.ne.s32.totalorder %s4183_s17, %s3217_s19 }
 0x351   : > { %788 = vrot.lane.b32.xlu1 %v786_v3, %s3353_s24  ;;  %s4308_s24 = sld [smem:[#allocation52_spill]]  ;;  %p3219_p10 = pnand %p3218_p11, %p4309_p6 }
 0x353   : > { %p3220_p1 = pneg %p3219_p10 }
 0x397   : > { %v1067_v11 = vpop.permute.xlu1 %1066  ;;  %v1086_v18 = vpop.permute.xlu0 %1085 }
 0x398   : > { %v1069_v19 = vsub.f32 %v1060_v16, %v1067_v11  ;;  %v1088_v20 = vadd.f32 %v1086_v18, %v1079_v17 }
 0x39a   : > { %1071 = vrot.lane.b32.xlu1 %v1069_v19, %s3354_s25  ;;  %1090 = vrot.lane.b32.xlu0 %v1088_v20, %s3354_s25 }
 0x39b   : > { %v819_v22 = vpop.permute.xlu1 %818  ;;  %v1142_v23 = vpop.permute.xlu0 %1141 }
 0x39c   : > { %v821_v24 = vsub.f32 %v812_v21, %v819_v22  ;;  %v1144_v48 = vmul.f32 %v1142_v23, %v3936_v35 }
 0x39e   : > { %v822_v25 = vmul.f32 0.35355338, %v821_v24 }
 0x39f   : > { %v839_v27 = vpop.permute.xlu1 %838  ;;  %v1128_v28 = vpop.permute.xlu0 %1127 }
 0x3a0   : > { %v841_v29 = vadd.f32 %v839_v27, %v832_v26  ;;  %824 = vrot.lane.b32.xlu1 %v822_v25, %s3354_s25  ;;  %v1130_v40 = vadd.f32 %v1128_v28, %v1121_v36 }
 0x3a2   : > { %v842_v30 = vmul.f32 0.35355338, %v841_v29 }
 0x3a3   : > { %v1109_v32 = vpop.permute.xlu1 %1108  ;;  %v1161_v33 = vpop.permute.xlu0 %1160 }
 0x3a4   : > { %v1111_v34 = vsub.f32 %v1102_v31, %v1109_v32  ;;  %844 = vrot.lane.b32.xlu1 %v842_v30, %s3354_s25  ;;  %v1163_v53 = vmul.f32 %v1161_v33, %v3936_v35  ;;  %s4181_s25 = scalar_lea.hbm %s4308_s24, %s2454_s20 }
 0x3a6   : > { %1113 = vrot.lane.b32.xlu0 %v1111_v34, %s3355_s3 }
 0x3a7   : > { %v858_v38 = vpop.permute.xlu1 %857  ;;  %v1170_v39 = vpop.permute.xlu0 %1169 }
 0x3a8   : > { %v860_v41 = vsub.f32 %v851_v37, %v858_v38  ;;  %v1172_v58 = vadd.f32 %v1170_v39, %v1163_v53 }
 0x3aa   : > { %v861_v44 = vmul.f32 0.35355338, %v860_v41  ;;  %1132 = vrot.lane.b32.xlu0 %v1130_v40, %s3355_s3 }
 0x3ab   : > { %v878_v45 = vpop.permute.xlu1 %877  ;;  %v908_v46 = vpop.permute.xlu0 %907 }
 0x3ac   : > { %v880_v47 = vadd.f32 %v878_v45, %v871_v42  ;;  %863 = vrot.lane.b32.xlu1 %v861_v44, %s3355_s3  ;;  %v910_v54 = vmul.f32 %v908_v46, %v3942_v43 }
 0x3ae   : > { %v881_v49 = vmul.f32 0.35355338, %v880_v47 }
 0x3af   : > { %v1151_v50 = vpop.permute.xlu1 %1150  ;;  %v917_v51 = vpop.permute.xlu0 %916 }
 0x3b0   : > { %v1153_v52 = vsub.f32 %v1144_v48, %v1151_v50  ;;  %883 = vrot.lane.b32.xlu1 %v881_v49, %s3355_s3  ;;  %v919_v59 = vadd.f32 %v917_v51, %v910_v54  ;;  %v3357_v49 = vmov -inf   ;;  %v1183_v50 = vlaneseq  ;;  %s2156_s3 = scalar_lea.sflag [#allocation10], %s3829_s6 }
 0x3b1   : > { %927 = vst.msk [vmem:[#allocation5] sm:$0xff] %vm926_vm5, %v3357_v49  ;;  %928 = vst.msk [vmem:[#allocation5 + $0x8] sm:$0xff] %vm926_vm5, %v3357_v49 }
 0x3b2   : > { %1155 = vrot.lane.b32.xlu0 %v1153_v52, %s3356_s1  ;;  %v920_v63 = vmul.f32 0.35355338, %v919_v59  ;;  %929 = vst.msk [vmem:[#allocation5 + $0x10] sm:$0xff] %vm926_vm5, %v3357_v49  ;;  %930 = vst.msk [vmem:[#allocation5 + $0x18] sm:$0xff] %vm926_vm5, %v3357_v49  ;;  %v1184_v51 = vshrl.u32 %v1183_v50, 7  ;;  %v1189_v52 = vand.u32 127, %v1183_v50 }
 0x3b3   : > { %v888_v56 = vpop.permute.xlu1 %887  ;;  %v1033_v57 = vpop.permute.xlu0 %1032  ;;  %v3358_v59 = vmov 0  }
 0x3b4   : > { %v1035_v60 = vsub.f32 %v1025_v55, %v1033_v57  ;;  %v890_v61 = vmul.f32 %v888_v56, %v3942_v43  ;;  %vm1193_vm6 = vcmp.ge.s32.totalorder %v1184_v51, %v1189_v52  ;;  %2803 = vset.pattern.permute.xlu0 %v3358_v59  ;;  %2804 = vset.pattern.permute.xlu1 %v3358_v59 }
 0x3b6   : > { %1037 = vst.msk [vmem:[#allocation3] sm:$0xff] %vm793_vm3, %v1035_v60  ;;  %1174 = vrot.lane.b32.xlu0 %v1172_v58, %s3356_s1 }
 0x3b7   : > { %v897_v62 = vpop.permute.xlu1 %896  ;;  %v797_v2 = vpop.permute.xlu0 %796 }
 0x3b8   : > { %v899_v0 = vsub.f32 %v890_v61, %v897_v62  ;;  %v799_v7 = vmul.f32 %v797_v2, %v3942_v43 }
 0x3ba   : > { %v900_v1 = vmul.f32 0.35355338, %v899_v0  ;;  %922 = vrot.lane.b32.xlu0 %v920_v63, %s3356_s1 }
 0x3bb   : > { %v1040_v3 = vpop.permute.xlu1 %1039  ;;  %v803_v5 = vpop.permute.xlu0 %802 }
 0x3bc   : > { %902 = vrot.lane.b32.xlu1 %v900_v1, %s3356_s1  ;;  %v1042_v13 = vmul.f32 %v1040_v3, %v3936_v35  ;;  %v805_v10 = vadd.f32 %v803_v5, %v799_v7  ;;  %s3364_s1 = smov [#allocation29]  }
 0x3be   : > { %v806_v17 = vmul.f32 0.35355338, %v805_v10 }
 0x3bf   : > { %v1046_v4 = vpop.permute.xlu1 %1045 }
 0x3c0   : > { %v1048_v6 = vadd.f32 %v1046_v4, %v1042_v13 }
 0x3c2   : > { %1050 = vst.msk [vmem:[#allocation3] sm:$0xff] %vm807_vm4, %v1048_v6 }
 0x3c3   : > { %v789_v12 = vpop.permute.xlu1 %788 }
 0x3c4   : > { %v791_v15 = vsub.f32 %v781_v9, %v789_v12 }
 0x3c6   : > { %v792_v16 = vmul.f32 0.35355338, %v791_v15 }
 0x3c8   : > { %794 = vst.msk [vmem:[#allocation2] sm:$0xff] %vm793_vm3, %v792_v16 }
 0x3c9   : > { %808 = vst.msk [vmem:[#allocation2] sm:$0xff] %vm807_vm4, %v806_v17  ;;  %v1196_v11 = vld [vmem:[#allocation3] sm:$0xff] }
 0x3ca   : > { %v1197_v18 = vpack.c.bf16 %v1196_v11, %v1196_v11  ;;  %v4077_v17 = vld [vmem:[#allocation5] sm:$0xff] }
 0x3cc   : > { %v1204_v19 = vsel %vm935_vm2, %v1197_v18, 0 }
 0x3cd   : > { %2512 = vmatpush3.bf16.xpose.msra.mxu0 %v1204_v19 }
 0x3ce   : > { %2523 = vmatprep.subr.bf16.mxu0 %v3344_v8 }
 0x3d0   : > { %v1194_v20 = vld [vmem:[#allocation2] sm:$0xff] }
 0x3d1   : > { %v1195_v21 = vpack.c.bf16 %v1194_v20, %v1194_v20  ;;  %v1384_v20 = vld [vmem:[#allocation5 + $0x8] sm:$0xff] }
 0x3d4   : > { %2514 = vmatmul.mubr.msk.bf16.vlgmr.msra.gmra.mrb[4].mxu0 %vm935_vm2, %v1195_v21 }
 0x3d5   : > { %2525 = vmatprep.mubr.msk.bf16.mxu0 %vm3345_vm1, %v3344_v8 }
 0x40c   : > { %v1072_v14 = vpop.permute.xlu1 %1071  ;;  %v1091_v43 = vpop.permute.xlu0 %1090 }
 0x40d   : > { %1075 = vst.msk [vmem:[#allocation3 + $0x8] sm:$0xff] %vm793_vm3, %v1072_v14 }
 0x40e   : > { %1093 = vst.msk [vmem:[#allocation3 + $0x8] sm:$0xff] %vm807_vm4, %v1091_v43 }
 0x412   : > { %v825_v22 = vpop.permute.xlu1 %824 }
 0x413   : > { %828 = vst.msk [vmem:[#allocation2 + $0x8] sm:$0xff] %vm793_vm3, %v825_v22  ;;  %v1521_v22 = vld [vmem:[#allocation5 + $0x10] sm:$0xff] }
 0x415   : > { %v1332_v23 = vld [vmem:[#allocation3 + $0x8] sm:$0xff] }
 0x416   : > { %v845_v24 = vpop.permute.xlu1 %844  ;;  %v1333_v25 = vpack.c.bf16 %v1332_v23, %v1332_v23 }
 0x417   : > { %847 = vst.msk [vmem:[#allocation2 + $0x8] sm:$0xff] %vm807_vm4, %v845_v24 }
 0x418   : > { %v1114_v26 = vpop.permute.xlu0 %1113  ;;  %v1340_v27 = vsel %vm935_vm2, %v1333_v25, 0  ;;  %v1658_v25 = vld [vmem:[#allocation5 + $0x18] sm:$0xff] }
 0x419   : > { %1117 = vst.msk [vmem:[#allocation3 + $0x10] sm:$0xff] %vm793_vm3, %v1114_v26  ;;  %2524 = vmatpush3.bf16.xpose.msra.mxu0 %v1340_v27 }
 0x41a   : > { %2535 = vmatprep.subr.bf16.mxu0 %v3344_v8 }
 0x41c   : > { %v1133_v28 = vpop.permute.xlu0 %1132 }
 0x41d   : > { %1135 = vst.msk [vmem:[#allocation3 + $0x10] sm:$0xff] %vm807_vm4, %v1133_v28 }
 0x41e   : > { %v864_v29 = vpop.permute.xlu1 %863  ;;  %v1330_v30 = vld [vmem:[#allocation2 + $0x8] sm:$0xff] }
 0x41f   : > { %867 = vst.msk [vmem:[#allocation2 + $0x10] sm:$0xff] %vm793_vm3, %v864_v29  ;;  %v1331_v31 = vpack.c.bf16 %v1330_v30, %v1330_v30 }
 0x421   : > { %2526 = vmatmul.mubr.msk.bf16.vlgmr.msra.gmra.mrb[8].mxu0 %vm935_vm2, %v1331_v31 }
 0x422   : > { %v884_v32 = vpop.permute.xlu1 %883  ;;  %2537 = vmatprep.mubr.msk.bf16.mxu0 %vm3345_vm1, %v3344_v8 }
 0x423   : > { %886 = vst.msk [vmem:[#allocation2 + $0x10] sm:$0xff] %vm807_vm4, %v884_v32 }
 0x424   : > { %v1156_v33 = vpop.permute.xlu0 %1155  ;;  %v1469_v34 = vld [vmem:[#allocation3 + $0x10] sm:$0xff] }
 0x425   : > { %1159 = vst.msk [vmem:[#allocation3 + $0x18] sm:$0xff] %vm793_vm3, %v1156_v33  ;;  %v1470_v36 = vpack.c.bf16 %v1469_v34, %v1469_v34 }
 0x427   : > { %v1477_v37 = vsel %vm935_vm2, %v1470_v36, 0 }
 0x428   : > { %2536 = vmatpush3.bf16.xpose.msra.mxu0 %v1477_v37  ;;  %v1175_v38 = vpop.permute.xlu0 %1174 }
 0x429   : > { %1177 = vst.msk [vmem:[#allocation3 + $0x18] sm:$0xff] %vm807_vm4, %v1175_v38  ;;  %2547 = vmatprep.subr.bf16.mxu0 %v3344_v8 }
 0x42a   : > { %v1467_v39 = vld [vmem:[#allocation2 + $0x10] sm:$0xff] }
 0x42b   : > { %v1468_v40 = vpack.c.bf16 %v1467_v39, %v1467_v39 }
 0x42c   : > { %v923_v42 = vpop.permute.xlu0 %922 }
 0x42e   : > { %v903_v41 = vpop.permute.xlu1 %902 }
 0x42f   : > { %906 = vst.msk [vmem:[#allocation2 + $0x18] sm:$0xff] %vm793_vm3, %v903_v41  ;;  %2538 = vmatmul.mubr.msk.bf16.vlgmr.msra.gmra.mrb[12].mxu0 %vm935_vm2, %v1468_v40 }
 0x430   : > { %925 = vst.msk [vmem:[#allocation2 + $0x18] sm:$0xff] %vm807_vm4, %v923_v42  ;;  %v1606_v44 = vld [vmem:[#allocation3 + $0x18] sm:$0xff]  ;;  %2549 = vmatprep.mubr.msk.bf16.mxu0 %vm3345_vm1, %v3344_v8 }
 0x431   : > { %v1607_v45 = vpack.c.bf16 %v1606_v44, %v1606_v44 }
 0x433   : > { %v1614_v46 = vsel %vm935_vm2, %v1607_v45, 0 }
 0x434   : > { %2548 = vmatpush3.bf16.xpose.msra.mxu0 %v1614_v46 }
 0x435   : > { %2559 = vmatprep.subr.bf16.mxu0 %v3344_v8 }
 0x437   : > { %v1604_v47 = vld [vmem:[#allocation2 + $0x18] sm:$0xff] }
 0x438   : > { %v1605_v48 = vpack.c.bf16 %v1604_v47, %v1604_v47 }
 0x43b   : > { %2550 = vmatmul.mubr.msk.bf16.vlgmr.msra.gmra.mrb[16].mxu0 %vm935_vm2, %v1605_v48 }
 0x43c   : > { %2561 = vmatprep.mubr.msk.bf16.mxu0 %vm3345_vm1, %v3344_v8 }
 0x4a7   : > { %v1240_v53 = vpop.f32.mrb[4].mxu0 }
 0x4a8   : > { %v1246_v54 = vsel %vm1193_vm6, %v1240_v53, -1e+09  ;;  %v2515_v55 = vpop.f32.mrb[5].mxu0 }
 0x4a9   : > { %v1243_v56 = vpop.f32.mrb[6].mxu0  ;;  %v1248_v57 = vsel %vm935_vm2, %v1246_v54, -inf }
 0x4aa   : > { %1249 = vmax.xlane.f32.xlu1 %v1248_v57  ;;  %v2516_v58 = vpop.f32.mrb[7].mxu0 }
 0x4f4   : > { %v1376_v60 = vpop.f32.mrb[8].mxu0 }
 0x4f5   : > { %v4063_v61 = vsel %vm1193_vm6, %v1376_v60, -1e+09  ;;  %v2527_v62 = vpop.f32.mrb[9].mxu0 }
 0x4f6   : > { %v1379_v63 = vpop.f32.mrb[10].mxu0  ;;  %v1385_v0 = vsel %vm935_vm2, %v4063_v61, -inf }
 0x4f7   : > { %1386 = vmax.xlane.f32.xlu0 %v1385_v0  ;;  %v2528_v1 = vpop.f32.mrb[11].mxu0 }
 0x502   : > { %v1513_v2 = vpop.f32.mrb[12].mxu0 }
 0x503   : > { %v4068_v3 = vsel %vm1193_vm6, %v1513_v2, -1e+09  ;;  %v2539_v13 = vpop.f32.mrb[13].mxu0 }
 0x504   : > { %v1516_v4 = vpop.f32.mrb[14].mxu0  ;;  %v1522_v5 = vsel %vm935_vm2, %v4068_v3, -inf }
 0x505   : > { %1523 = vmax.xlane.f32.xlu0 %v1522_v5  ;;  %v2540_v6 = vpop.f32.mrb[15].mxu0 }
 0x50e   : > { %v1650_v7 = vpop.f32.mrb[16].mxu0 }
 0x50f   : > { %v4073_v9 = vsel %vm1193_vm6, %v1650_v7, -1e+09  ;;  %v2551_v10 = vpop.f32.mrb[17].mxu0 }
 0x510   : > { %v1653_v12 = vpop.f32.mrb[18].mxu0  ;;  %v1659_v15 = vsel %vm935_vm2, %v4073_v9, -inf }
 0x511   : > { %1660 = vmax.xlane.f32.xlu1 %v1659_v15  ;;  %v2552_v16 = vpop.f32.mrb[19].mxu0 }
 0x537   : > { %v1250_v11 = vpop.xlane.xlu1 %1249 }
 0x538   : > { %v4080_v18 = vmax.f32 %v4077_v17, %v1250_v11 }
 0x53a   : > { %v1252_v19 = vsub.f32 %v4077_v17, %v4080_v18  ;;  %1328 = vst.msk [vmem:[#allocation5] sm:$0xff] %vm926_vm5, %v4080_v18  ;;  %1257 = vperm.xlu0 %2803, %v4080_v18   ;;  %v1754_v17 = vld [vmem:[#allocation16] sm:$0xf] }
 0x53b   : > { %v1821_v18 = vsel %vm1282_vm7, %v1754_v17, 0 }
 0x53c   : > { %v1253_v15 = vmul.f32 1.442695, %v1252_v19  ;;  %v1401_v19 = vld [vmem:[#allocation6 + $0x8] sm:$0xff] }
 0x584   : > { %v1387_v21 = vpop.xlane.xlu0 %1386 }
 0x585   : > { %v1388_v14 = vmax.f32 %v1384_v20, %v1387_v21 }
 0x587   : > { %v1389_v43 = vsub.f32 %v1384_v20, %v1388_v14  ;;  %1465 = vst.msk [vmem:[#allocation5 + $0x8] sm:$0xff] %vm926_vm5, %v1388_v14  ;;  %1394 = vperm.xlu1 %2804, %v1388_v14   ;;  %v1263_v20 = vld [vmem:[#allocation6] sm:$0xff] }
 0x589   : > { %v1390_v33 = vmul.f32 1.442695, %v1389_v43 }
 0x58b   : > { %1052 = vrot.lane.b32.xlu1 %v3936_v35, %s3359_s22  ;;  %s3221_s22 = sshll.u32 %s3364_s1, 4  ;;  %s3222_s22 = int_to_ptr.vmem [resolvable:$false] %s3221_s22 }
 0x58c   : > { %p3224_p9 = scmp.lt.s32.totalorder %s4183_s17, %s3222_s22 }
 0x592   : > { %v1524_v23 = vpop.xlane.xlu0 %1523 }
 0x593   : > { %v1525_v24 = vmax.f32 %v1521_v22, %v1524_v23 }
 0x595   : > { %1602 = vst.msk [vmem:[#allocation5 + $0x10] sm:$0xff] %vm926_vm5, %v1525_v24  ;;  %1531 = vperm.xlu1 %2804, %v1525_v24   ;;  %v1526_v34 = vsub.f32 %v1521_v22, %v1525_v24 }
 0x597   : > { %v1527_v36 = vmul.f32 1.442695, %v1526_v34 }
 0x599   : > { %1094 = vrot.lane.b32.xlu1 %v3936_v35, %s3360_s7  ;;  %s3223_s7 = scalar_lea.vmem %s3222_s22, 256 }
 0x59a   : > { %p3225_p8 = scmp.lt.s32.totalorder %s3223_s7, %s3217_s19 }
 0x59c   : > { %p3226_p3 = por %p3225_p8, %p3224_p9 }
 0x59e   : > { %v1661_v26 = vpop.xlane.xlu1 %1660  ;;  %p3227_p12 = pnand %p3226_p3, %p3220_p1 }
 0x59f   : > { %v1662_v27 = vmax.f32 %v1658_v25, %v1661_v26 }
 0x5a1   : > { %1739 = vst.msk [vmem:[#allocation5 + $0x18] sm:$0xff] %vm926_vm5, %v1662_v27  ;;  %1668 = vperm.xlu1 %2804, %v1662_v27   ;;  %v1663_v37 = vsub.f32 %v1658_v25, %v1662_v27  ;;  %v1538_v27 = vld [vmem:[#allocation6 + $0x10] sm:$0xff] }
 0x5a3   : > { %v1664_v38 = vmul.f32 1.442695, %v1663_v37 }
 0x5a5   : > { %1136 = vrot.lane.b32.xlu1 %v3936_v35, %s3361_s23 }
 0x5a9   : > { %1178 = vrot.lane.b32.xlu1 %v3936_v35, %s3362_s2 }
 0x5b9   : > { %v1258_v28 = vpop.permute.xlu0 %1257 }
 0x5ba   : > { %v1260_v29 = vsub.f32 %v1246_v54, %v1258_v28 }
 0x5bc   : > { %v1261_v30 = vmul.f32 1.442695, %v1260_v29 }
 0x5be   : > { %2819 = vpow2.f32 %v1261_v30 }
 0x5bf   : > { %2821 = vpow2.f32 %v1390_v33  ;;  %v1675_v33 = vld [vmem:[#allocation6 + $0x18] sm:$0xff] }
 0x5c0   : > { %2823 = vpow2.f32 %v1527_v36  ;;  %v1768_v36 = vld [vmem:[#allocation16 + $0x4] sm:$0xf] }
 0x5c1   : > { %2825 = vpow2.f32 %v1664_v38  ;;  %v1775_v38 = vsel %vm1282_vm7, %v1768_v36, 0 }
 0x5c2   : > { %2560 = vmatpush3.bf16.msra.mxu0 %v1775_v38 }
 0x5c3   : > { %2571 = vmatprep.subr.bf16.mxu0 %v3344_v8 }
 0x5c8   : > { %v2820_v31 = vpop.eup %2819 }
 0x5c9   : > { %v1265_v32 = vsel %vm935_vm2, %v2820_v31, 0.0  ;;  %v4095_v39 = vpop.eup %2821  ;;  %v1278_v54 = vpack.c.bf16 %v2820_v31, %v2820_v31 }
 0x5ca   : > { %v4098_v35 = vpop.eup %2823  ;;  %v1402_v24 = vmul.f32 %v4095_v39, %v1401_v19 }
 0x5cb   : > { %v4101_v40 = vpop.eup %2825  ;;  %v1539_v29 = vmul.f32 %v4098_v35, %v1538_v27 }
 0x5cc   : > { %v1676_v37 = vmul.f32 %v4101_v40, %v1675_v33 }
 0x5cd   : > { %1266 = vadd.xlane.f32.xlu1 %v1265_v32 }
 0x5de   : > { %1412 = vperm.xlu1 %2804, %v4095_v39  }
 0x5e2   : > { %1549 = vperm.xlu1 %2804, %v4098_v35  }
 0x5e6   : > { %1686 = vperm.xlu1 %2804, %v4101_v40  }
 0x606   : > { %v1395_v41 = vpop.permute.xlu1 %1394 }
 0x607   : > { %v1397_v42 = vsub.f32 %v4063_v61, %v1395_v41 }
 0x609   : > { %v1398_v44 = vmul.f32 1.442695, %v1397_v42 }
 0x60a   : > { %v1053_v45 = vpop.permute.xlu1 %1052 }
 0x60b   : > { %2827 = vpow2.f32 %v1398_v44  ;;  %1056 = vst.msk [vmem:[#allocation4] sm:$0xff] %vm935_vm2, %v1053_v45 }
 0x612   : > { %v1198_v46 = vld [vmem:[#allocation4] sm:$0xff] }
 0x613   : > { %v1199_v47 = vpack.c.bf16 %v1198_v46, %v1198_v46  ;;  %v1271_v46 = vld [vmem:[#allocation7] sm:$0xff] }
 0x614   : > { %v1532_v48 = vpop.permute.xlu1 %1531 }
 0x615   : > { %v2828_v49 = vpop.eup %2827  ;;  %v1534_v50 = vsub.f32 %v4068_v3, %v1532_v48  ;;  %v1284_v51 = vsel %vm1282_vm7, %v1199_v47, 0 }
 0x616   : > { %2518 = vmatpush3.bf16.msra.mxu1 %v1284_v51  ;;  %v1403_v52 = vsel %vm935_vm2, %v2828_v49, 0.0  ;;  %v1416_v1 = vpack.c.bf16 %v2828_v49, %v2828_v49 }
 0x617   : > { %v1535_v53 = vmul.f32 1.442695, %v1534_v50  ;;  %1404 = vadd.xlane.f32.xlu0 %v1403_v52  ;;  %2529 = vmatprep.subr.bf16.mxu1 %v3344_v8 }
 0x618   : > { %v1095_v55 = vpop.permute.xlu1 %1094 }
 0x619   : > { %2829 = vpow2.f32 %v1535_v53  ;;  %1098 = vst.msk [vmem:[#allocation4 + $0x8] sm:$0xff] %vm935_vm2, %v1095_v55  ;;  %2520 = vmatmul.mubr.msk.bf16.vlgmr.msra.gmra.mrb[4].mxu1 %vm935_vm2, %v1278_v54  ;;  %v1409_v55 = vld [vmem:[#allocation7 + $0x8] sm:$0xff] }
 0x61a   : > { %2531 = vmatprep.mubr.msk.bf16.mxu1 %vm3345_vm1, %v3344_v8 }
 0x620   : > { %v1669_v56 = vpop.permute.xlu1 %1668  ;;  %v1334_v57 = vld [vmem:[#allocation4 + $0x8] sm:$0xff] }
 0x621   : > { %v1671_v58 = vsub.f32 %v4073_v9, %v1669_v56  ;;  %v1335_v59 = vpack.c.bf16 %v1334_v57, %v1334_v57 }
 0x623   : > { %v2830_v60 = vpop.eup %2829  ;;  %v1672_v61 = vmul.f32 1.442695, %v1671_v58  ;;  %v1421_v62 = vsel %vm1282_vm7, %v1335_v59, 0  ;;  %v1937_v58 = vld [vmem:[#allocation16 + $0xc] sm:$0xf] }
 0x624   : > { %v1137_v63 = vpop.permute.xlu1 %1136  ;;  %2530 = vmatpush3.bf16.msra.mxu1 %v1421_v62  ;;  %v1540_v0 = vsel %vm935_vm2, %v2830_v60, 0.0  ;;  %v1553_v9 = vpack.c.bf16 %v2830_v60, %v2830_v60  ;;  %v1942_v62 = vsel %vm1282_vm7, %v1937_v58, 0 }
 0x625   : > { %2831 = vpow2.f32 %v1672_v61  ;;  %1140 = vst.msk [vmem:[#allocation4 + $0x10] sm:$0xff] %vm935_vm2, %v1137_v63  ;;  %1541 = vadd.xlane.f32.xlu0 %v1540_v0  ;;  %2541 = vmatprep.subr.bf16.mxu1 %v3344_v8 }
 0x626   : > { %2833 = vpow2.f32 %v1253_v15 }
 0x627   : > { %2532 = vmatmul.mubr.msk.bf16.vlgmr.msra.gmra.mrb[8].mxu1 %vm935_vm2, %v1416_v1 }
 0x628   : > { %v1179_v2 = vpop.permute.xlu1 %1178  ;;  %2543 = vmatprep.mubr.msk.bf16.mxu1 %vm3345_vm1, %v3344_v8 }
 0x629   : > { %1182 = vst.msk [vmem:[#allocation4 + $0x18] sm:$0xff] %vm935_vm2, %v1179_v2 }
 0x62c   : > { %v1471_v3 = vld [vmem:[#allocation4 + $0x10] sm:$0xff] }
 0x62d   : > { %v1472_v13 = vpack.c.bf16 %v1471_v3, %v1471_v3 }
 0x62f   : > { %v2832_v4 = vpop.eup %2831  ;;  %v1558_v5 = vsel %vm1282_vm7, %v1472_v13, 0  ;;  %v1546_v13 = vld [vmem:[#allocation7 + $0x10] sm:$0xff] }
 0x630   : > { %2542 = vmatpush3.bf16.msra.mxu1 %v1558_v5  ;;  %v1677_v6 = vsel %vm935_vm2, %v2832_v4, 0.0  ;;  %v1608_v7 = vld [vmem:[#allocation4 + $0x18] sm:$0xff]  ;;  %v1690_v16 = vpack.c.bf16 %v2832_v4, %v2832_v4  ;;  %v2834_v11 = vpop.eup %2833 }
 0x631   : > { %1678 = vadd.xlane.f32.xlu0 %v1677_v6  ;;  %2553 = vmatprep.subr.bf16.mxu1 %v3344_v8  ;;  %v1609_v10 = vpack.c.bf16 %v1608_v7, %v1608_v7  ;;  %v1264_v21 = vmul.f32 %v2834_v11, %v1263_v20 }
 0x633   : > { %2544 = vmatmul.mubr.msk.bf16.vlgmr.msra.gmra.mrb[12].mxu1 %vm935_vm2, %v1553_v9  ;;  %v1695_v12 = vsel %vm1282_vm7, %v1609_v10, 0 }
 0x634   : > { %2554 = vmatpush3.bf16.msra.mxu1 %v1695_v12  ;;  %2555 = vmatprep.mubr.msk.bf16.mxu1 %vm3345_vm1, %v3344_v8  ;;  %v1683_v12 = vld [vmem:[#allocation7 + $0x18] sm:$0xff] }
 0x635   : > { %2565 = vmatprep.subr.bf16.mxu1 %v3344_v8 }
 0x63b   : > { %2556 = vmatmul.mubr.msk.bf16.vlgmr.msra.gmra.mrb[16].mxu1 %vm935_vm2, %v1690_v16 }
 0x63c   : > { %2567 = vmatprep.mubr.msk.bf16.mxu1 %vm3345_vm1, %v3344_v8  ;;  %2566 = vmatpush3.bf16.msra.mxu1 %v1821_v18 }
 0x63d   : > { %2577 = vmatprep.subr.bf16.mxu1 %v3344_v8 }
 0x647   : > { %1274 = vperm.xlu0 %2803, %v2834_v11  }
 0x65a   : > { %v1267_v14 = vpop.xlane.xlu1 %1266 }
 0x65b   : > { %v1268_v43 = vadd.f32 %v1267_v14, %v1264_v21 }
 0x65d   : > { %1270 = vst.msk [vmem:[#allocation6] sm:$0xff] %vm926_vm5, %v1268_v43 }
 0x65e   : > { %v1413_v45 = vpop.permute.xlu1 %1412 }
 0x65f   : > { %v1415_v60 = vmul.f32 %v1413_v45, %v1409_v55 }
 0x662   : > { %v1550_v48 = vpop.permute.xlu1 %1549 }
 0x663   : > { %v1552_v4 = vmul.f32 %v1550_v48, %v1546_v13  ;;  %v2813_v13 = vld [vmem:[#allocation19 + $0x10] sm:$0xff]  }
 0x664   : > { %v1745_v22 = vld [vmem:[#allocation6] sm:$0xff] }
 0x665   : > { %2835 = vrcp.f32 %v1745_v22 }
 0x666   : > { %v1687_v54 = vpop.permute.xlu1 %1686 }
 0x667   : > { %v1689_v15 = vmul.f32 %v1687_v54, %v1683_v12 }
 0x66f   : > { %v2836_v23 = vpop.eup %2835 }
 0x670   : > { %1749 = vperm.xlu1 %2804, %v2836_v23   ;;  %v1876_v23 = vld [vmem:[#allocation16 + $0x8] sm:$0xf] }
 0x671   : > { %v1881_v19 = vsel %vm1282_vm7, %v1876_v23, 0 }
 0x6a4   : > { %v1405_v25 = vpop.xlane.xlu0 %1404 }
 0x6a5   : > { %v1406_v26 = vadd.f32 %v1405_v25, %v1402_v24 }
 0x6a7   : > { %1407 = vst.msk [vmem:[#allocation6 + $0x8] sm:$0xff] %vm926_vm5, %v1406_v26 }
 0x6ae   : > { %v1758_v28 = vld [vmem:[#allocation6 + $0x8] sm:$0xff] }
 0x6af   : > { %2837 = vrcp.f32 %v1758_v28 }
 0x6b2   : > { %v1542_v30 = vpop.xlane.xlu0 %1541 }
 0x6b3   : > { %v1543_v31 = vadd.f32 %v1542_v30, %v1539_v29 }
 0x6b5   : > { %1544 = vst.msk [vmem:[#allocation6 + $0x10] sm:$0xff] %vm926_vm5, %v1543_v31 }
 0x6b9   : > { %v2838_v32 = vpop.eup %2837 }
 0x6ba   : > { %1762 = vperm.xlu0 %2803, %v2838_v32  }
 0x6bc   : > { %v1866_v34 = vld [vmem:[#allocation6 + $0x10] sm:$0xff] }
 0x6bd   : > { %2839 = vrcp.f32 %v1866_v34 }
 0x6be   : > { %v1679_v39 = vpop.xlane.xlu0 %1678 }
 0x6bf   : > { %v1680_v41 = vadd.f32 %v1679_v39, %v1676_v37 }
 0x6c1   : > { %1681 = vst.msk [vmem:[#allocation6 + $0x18] sm:$0xff] %vm926_vm5, %v1680_v41 }
 0x6c6   : > { %v1275_v47 = vpop.permute.xlu0 %1274 }
 0x6c7   : > { %v2840_v35 = vpop.eup %2839  ;;  %v1277_v40 = vmul.f32 %v1275_v47, %v1271_v46 }
 0x6c8   : > { %1870 = vperm.xlu0 %2803, %v2840_v35   ;;  %v1927_v42 = vld [vmem:[#allocation6 + $0x18] sm:$0xff] }
 0x6c9   : > { %2841 = vrcp.f32 %v1927_v42 }
 0x6d3   : > { %v2842_v44 = vpop.eup %2841 }
 0x6d4   : > { %1931 = vperm.xlu1 %2804, %v2842_v44  }
 0x6ec   : > { %v1320_v49 = vpop.f32.mrb[4].mxu1 }
 0x6ed   : > { %v1326_v50 = vadd.f32 %v1320_v49, %v1277_v40  ;;  %v2521_v51 = vpop.f32.mrb[5].mxu1  ;;  %v1743_v40 = vld [vmem:[%s594_s4] sm:$0xff]  ;;  %s3363_s4 = smov 64  }
 0x6ee   : > { %v1323_v52 = vpop.f32.mrb[6].mxu1 }
 0x6ef   : > { %1327 = vst.msk [vmem:[#allocation7] sm:$0xff] %vm935_vm2, %v1326_v50  ;;  %v2522_v53 = vpop.f32.mrb[7].mxu1  ;;  %v1750_v56 = vpop.permute.xlu1 %1749 }
 0x6f6   : > { %v1744_v57 = vld [vmem:[#allocation7] sm:$0xff] }
 0x6f7   : > { %v1752_v59 = vmul.f32 %v1750_v56, %v1744_v57  ;;  %v2809_v56 = vld [vmem:[#allocation17] sm:$0xff]   ;;  %v2810_v57 = vld [vmem:[#allocation17 + $0x8] sm:$0xff]  }
 0x6f9   : > { %v1753_v61 = vpack.c.bf16 %v1752_v59, %v1752_v59 }
 0x6fa   : > { %v1457_v63 = vpop.f32.mrb[8].mxu1 }
 0x6fb   : > { %v1463_v0 = vadd.f32 %v1457_v63, %v1415_v60  ;;  %v2533_v1 = vpop.f32.mrb[9].mxu1  ;;  %2568 = vmatmul.mubr.msk.bf16.vlgmr.msra.gmra.mrb[20].mxu1 %vm935_vm2, %v1753_v61 }
 0x6fc   : > { %v1460_v2 = vpop.f32.mrb[10].mxu1  ;;  %2578 = vmatpush3.bf16.msra.mxu1 %v1942_v62  ;;  %2579 = vmatprep.mubr.msk.bf16.mxu1 %vm3345_vm1, %v3344_v8  ;;  %v2443_v62 = vld [vmem:[#allocation22] ss:$0 sm:$0xff] }
 0x6fd   : > { %1464 = vst.msk [vmem:[#allocation7 + $0x8] sm:$0xff] %vm935_vm2, %v1463_v0  ;;  %v2534_v3 = vpop.f32.mrb[11].mxu1  ;;  %2591 = vmatprep.subr.bf16.mxu1 %v3344_v8  ;;  %v2811_v2 = vld [vmem:[#allocation19] sm:$0xff]  }
 0x6fe   : > { %v2812_v3 = vld [vmem:[#allocation19 + $0x8] sm:$0xff]  }
 0x704   : > { %v1756_v43 = vld [vmem:[#allocation7 + $0x8] sm:$0xff] }
 0x706   : > { %v1594_v5 = vpop.f32.mrb[12].mxu1 }
 0x707   : > { %v1600_v6 = vadd.f32 %v1594_v5, %v1552_v4  ;;  %v2545_v7 = vpop.f32.mrb[13].mxu1  ;;  %v2814_v4 = vld [vmem:[#allocation19 + $0x18] sm:$0xff]  }
 0x708   : > { %v1597_v9 = vpop.f32.mrb[14].mxu1 }
 0x709   : > { %1601 = vst.msk [vmem:[#allocation7 + $0x10] sm:$0xff] %vm935_vm2, %v1600_v6  ;;  %v2546_v10 = vpop.f32.mrb[15].mxu1 }
 0x70e   : > { %v1731_v16 = vpop.f32.mrb[16].mxu1 }
 0x70f   : > { %v1737_v11 = vadd.f32 %v1731_v16, %v1689_v15  ;;  %v2557_v20 = vpop.f32.mrb[17].mxu1 }
 0x710   : > { %v1734_v21 = vpop.f32.mrb[18].mxu1  ;;  %v1864_v24 = vld [vmem:[#allocation7 + $0x10] sm:$0xff] }
 0x711   : > { %1738 = vst.msk [vmem:[#allocation7 + $0x18] sm:$0xff] %vm935_vm2, %v1737_v11  ;;  %v2558_v14 = vpop.f32.mrb[19].mxu1 }
 0x718   : > { %v1925_v28 = vld [vmem:[#allocation7 + $0x18] sm:$0xff] }
 0x739   : > { %v1763_v22 = vpop.permute.xlu0 %1762 }
 0x73a   : > { %v1765_v17 = vmul.f32 %v1763_v22, %v1756_v43 }
 0x73c   : > { %v1766_v18 = vpack.c.bf16 %v1765_v17, %v1765_v17 }
 0x73e   : > { %2562 = vmatmul.mubr.msk.bf16.vlgmr.msra.gmra.mrb[20].mxu0 %vm935_vm2, %v1766_v18 }
 0x73f   : > { %2572 = vmatpush3.bf16.msra.mxu0 %v1881_v19  ;;  %2573 = vmatprep.mubr.msk.bf16.mxu0 %vm3345_vm1, %v3344_v8 }
 0x740   : > { %2583 = vmatprep.subr.bf16.mxu0 %v3344_v8 }
 0x747   : > { %v1871_v25 = vpop.permute.xlu0 %1870 }
 0x748   : > { %v1873_v26 = vmul.f32 %v1871_v25, %v1864_v24 }
 0x74a   : > { %v1874_v27 = vpack.c.bf16 %v1873_v26, %v1873_v26 }
 0x74c   : > { %2574 = vmatmul.mubr.msk.bf16.vlgmr.msra.gmra.mrb[24].mxu0 %vm935_vm2, %v1874_v27 }
 0x74d   : > { %2587 = vmatprep.mubr.msk.bf16.mxu0 %vm3345_vm1, %v3344_v8  ;;  %2584 = vmatpush3.bf16.msra.mxu0 %v2809_v56 }
 0x74e   : > { %2585 = vmatprep.subr.bf16.mxu0 %v3344_v8 }
 0x751   : > { %2586 = vmatpush3.bf16.msra.mxu0 %v2810_v57 }
 0x753   : > { %v1932_v29 = vpop.permute.xlu1 %1931 }
 0x754   : > { %v1934_v30 = vmul.f32 %v1932_v29, %v1925_v28 }
 0x756   : > { %v1935_v31 = vpack.c.bf16 %v1934_v30, %v1934_v30 }
 0x758   : > { %2580 = vmatmul.mubr.msk.bf16.vlgmr.msra.gmra.mrb[24].mxu1 %vm935_vm2, %v1935_v31 }
 0x759   : > { %2599 = vmatprep.mubr.msk.bf16.mxu1 %vm3345_vm1, %v3344_v8  ;;  %2592 = vmatpush3.bf16.msra.mxu1 %v2811_v2 }
 0x75a   : > { %2593 = vmatprep.subr.bf16.mxu1 %v3344_v8 }
 0x75d   : > { %2594 = vmatpush3.bf16.msra.mxu1 %v2812_v3 }
 0x75e   : > { %2595 = vmatprep.subr.bf16.mxu1 %v3344_v8 }
 0x761   : > { %2596 = vmatpush3.bf16.msra.mxu1 %v2813_v13 }
 0x762   : > { %2597 = vmatprep.subr.bf16.mxu1 %v3344_v8 }
 0x765   : > { %2598 = vmatpush3.bf16.msra.mxu1 %v2814_v4 }
 0x7ce   : > { %v1857_v32 = vpop.f32.mrb[20].mxu1 }
 0x7cf   : > { %v2569_v33 = vpop.f32.mrb[21].mxu1 }
 0x7d0   : > { %v1860_v34 = vpop.f32.mrb[22].mxu1 }
 0x7d1   : > { %v2570_v36 = vpop.f32.mrb[23].mxu1 }
 0x811   : > { %v1811_v37 = vpop.f32.mrb[20].mxu0 }
 0x812   : > { %v1858_v38 = vadd.f32 %v1857_v32, %v1811_v37  ;;  %v2563_v39 = vpop.f32.mrb[21].mxu0 }
 0x813   : > { %v1814_v41 = vpop.f32.mrb[22].mxu0 }
 0x814   : > { %v2564_v35 = vpop.f32.mrb[23].mxu0 }
 0x81f   : > { %v1917_v42 = vpop.f32.mrb[24].mxu0 }
 0x820   : > { %v1923_v44 = vadd.f32 %v1917_v42, %v1858_v38  ;;  %v2575_v45 = vpop.f32.mrb[25].mxu0 }
 0x821   : > { %v1920_v46 = vpop.f32.mrb[26].mxu0 }
 0x822   : > { %v2576_v47 = vpop.f32.mrb[27].mxu0 }
 0x82b   : > { %v1978_v48 = vpop.f32.mrb[24].mxu1 }
 0x82c   : > { %v1984_v49 = vadd.f32 %v1978_v48, %v1923_v44  ;;  %v2581_v50 = vpop.f32.mrb[25].mxu1 }
 0x82d   : > { %v1981_v51 = vpop.f32.mrb[26].mxu1 }
 0x82e   : > { %v1985_v52 = vadd.f32 %v1984_v49, %v1743_v40  ;;  %v2582_v53 = vpop.f32.mrb[27].mxu1 }
 0x830   : > { %v1987_v54 = vmul.f32 %v1985_v52, %v1985_v52 }
 0x832   : > { %v1989_v55 = vsel %vm703_vm0, %v1987_v54, 0.0 }
 0x833   : > { %1990 = vadd.xlane.f32.xlu0 %v1989_v55 }
 0x8c0   : > { %v1991_v58 = vpop.xlane.xlu0 %1990 }
 0x8c1   : > { %v1993_v59 = vmul.f32 0.03125, %v1991_v58 }
 0x8c3   : > { %v1994_v60 = vadd.f32 1e-05, %v1993_v59 }
 0x8c5   : > { %2843 = vrsqrt.f32 %v1994_v60 }
 0x8cf   : > { %v2844_v61 = vpop.eup %2843 }
 0x8d0   : > { %v1996_v63 = vmul.f32 %v2844_v61, %v1985_v52 }
 0x8d2   : > { %v2003_v0 = vmul.f32 %v2443_v62, %v1996_v63 }
 0x8d4   : > { %v2004_v1 = vpack.c.bf16 %v2003_v0, %v2003_v0 }
 0x8d6   : > { %2588 = vmatmul.mubr.msk.bf16.vlgmr.msra.gmra.mrb[28].mxu0 %vm703_vm0, %v2004_v1 }
 0x9a9   : > { %v2058_v5 = vpop.f32.mrb[28].mxu0 }
 0x9aa   : > { %2072 = vrot.lane.b32.xlu1 %v2058_v5, %s3363_s4  ;;  %v2589_v6 = vpop.f32.mrb[29].mxu0  ;;  %v2447_v10 = vmul.f32 -1.442695, %v2058_v5 }
 0x9ab   : > { %v2061_v7 = vpop.f32.mrb[30].mxu0 }
 0x9ac   : > { %v2590_v9 = vpop.f32.mrb[31].mxu0  ;;  %2845 = vpow2.f32 %v2447_v10 }
 0x9b6   : > { %v2846_v12 = vpop.eup %2845 }
 0x9b7   : > { %v2067_v15 = vadd.f32 1.0, %v2846_v12 }
 0x9b9   : > { %2847 = vrcp.f32 %v2067_v15 }
 0x9c3   : > { %v2848_v16 = vpop.eup %2847 }
 0x9c4   : > { %v2070_v11 = vmul.f32 %v2848_v16, %v2058_v5 }
 0xa1c   : > { %v2073_v20 = vpop.permute.xlu1 %2072 }
 0xa1d   : > { %v2075_v8 = vmul.f32 %v2073_v20, %v2070_v11 }
 0xa1f   : > { %v2076_v21 = vpack.c.bf16 %v2075_v8, %v2075_v8 }
 0xa21   : > { %2600 = vmatmul.mubr.msk.bf16.vlgmr.msra.gmra.mrb[28].mxu1 %vm2109_vm8, %v2076_v21 }
 0xaf4   : > { %v2147_v14 = vpop.f32.mrb[28].mxu1 }
 0xaf5   : > { %v2153_v43 = vadd.f32 %v2147_v14, %v1985_v52  ;;  %v2601_v22 = vpop.f32.mrb[29].mxu1 }
 0xaf6   : > { %v2150_v23 = vpop.f32.mrb[30].mxu1 }
 0xaf7   : > { %v2602_v17 = vpop.f32.mrb[31].mxu1  ;;  %2154 = vst.msk [vmem:[%s694_s8] sm:$0xff] %vm703_vm0, %v2153_v43 }
 0xaf8   : > { %3230 = shalt.err (!%p3227_p12)
}
 0xaf9   : > { %s3231_s6 = scalar_lea.hbm %s4181_s25, 128  ;;  %s3235_s4 = scalar_lea.hbm %s4308_s24, 256 }
 0xafa   : > { %p3232_p13 = scmp.ne.s32.totalorder %s4181_s25, %s3231_s6  ;;  %p3236_p5 = scmp.lt.u32.totalorder %s4181_s25, %s4308_s24 }
 0xafb   : > { %p3237_p2 = scmp.lt.u32.totalorder %s3235_s4, %s3231_s6  ;;  %p3239_p11 = scmp.lt.u32.totalorder %s3231_s6, %s4181_s25 }
 0xafc   : > { %p3233_p0 = pnand %p3232_p13, %p4309_p6 }
 0xafd   : > { %p3238_p4 = por %p3237_p2, %p3236_p5 }
 0xafe   : > { %p3234_p7 = pneg %p3233_p0 }
 0xaff   : > { %p3240_p10 = por %p3239_p11, %p3238_p4 }
 0xb01   : > { %p3241_p1 = pnand %p3240_p10, %p3234_p7 }
 0xb03   : > { %3244 = shalt.err (!%p3241_p1)
}
 0xb04   : > { %2651 = dma.vmem_to_hbm [thread:$0]  (%p4309_p6), %s4183_s17, 128, %s4181_s25, %s2156_s3  }
 0xb05 PF: > { %s4310_s8 = sld [smem:[#allocation39_spill]]  ;;  %p4311_p9 = scmp.ne.s32.totalorder %s4286_s21, 0 }
 0xb06   : > { %p4312_p8 = scmp.ge.s32.totalorder %s3327_s30, 2 }
 0xb08   : > { %p2695_p3 = pnand %p4312_p8, %p4311_p9 }
 0xb0b   : > { %s2182_s15 = sand.u32 1, %s4310_s8  }
 0xb0c   : > { %s2183_s18 = scalar_lea.sflag [#allocation10], %s2182_s15 }
 0xb0d   : > { %3302 = dma.done.wait (!%p2695_p3), %s2183_s18, 128  }
 0xb0e   : > { %3304 = vsyncadd (!%p2695_p3), %s2183_s18, 4294967168  ;;  %s37_s30 = sadd.s32 1, %s3327_s30   ;;  %s4313_s16 = smov %s4320_s28 }
 0xb0f   : > { %p34_p12 = scmp.ge.s32.totalorder %s37_s30, 4   ;;  %s4314_s25 = smov %s3311_s26 }
 0xb10   : > { %s4315_s26 = smov %s3315_s27  ;;  %s4316_s27 = smov %s3749_s0 }
 0xb11   : > { %s4317_s28 = smov %s3323_s29  ;;  %s4318_s29 = smov %s4313_s16 }
 0xb12   :  { %36 = sbr.rel (!%p34_p12) target bundleno = 24 (0x18), region = 220 }
 0xb19   :  { %2188 = vsyncpa [#allocation9], 1 }
 0xb1a   :  { %2190 = vsyncpa [#allocation9 + $0x1], 1 }
 0xb1b   :  { %2191 = vsyncpa [#allocation12], 1 }
 0xb1c   :  { %2193 = vsyncpa [#allocation12 + $0x1], 1 }
 0xb1d   :  { %2194 = vsyncpa [#allocation15], 1 }
 0xb1e   :  { %2195 = vsyncpa [#allocation18], 1 }
 0xb1f   :  { %2196 = vsyncpa [#allocation21], 1 }
 0xb20   :  { %2197 = vsyncpa [#allocation24], 1 }
 0xb21   :  { %2198 = vsyncpa [#allocation27], 1 }
 0xb22   :  { %2199 = vsyncpa [#allocation10], 1 }
 0xb23   :  { %2201 = vsyncpa [#allocation10 + $0x1], 1 }

</bundles_post_ra>
